<compile_context>
chip_gen: v7x
topology: tpu7x:2x2x1
jax: 0.10.0
libtpu: 0.0.40
codegen_flags: <defaults>
</compile_context>

<pallas_src>
import functools

import jax
import jax.numpy as jnp
from jax import lax
from jax.experimental import pallas as pl
from jax.experimental.pallas import tpu as pltpu

K = 7          # conv kernel size
PAD = K // 2   # 3


def _round_up(a, b):
    return (a + b - 1) // b * b


def _pick_c_tile(C, S, itemsize, budget_bytes):
    """Largest multiple-of-8 divisor of C whose double-buffered x block fits."""
    s_pad = _round_up(S, 128)

    def fits(ct):
        return 2 * _round_up(ct, 8) * s_pad * itemsize <= budget_bytes

    mult8 = [d for d in range(8, C + 1, 8) if C % d == 0]
    if not mult8:
        return C                       # e.g. C < 8: single reduction step
    fitting = [d for d in mult8 if fits(d)]
    return max(fitting) if fitting else min(mult8)


def _vmem_capacity_bytes():
    try:
        return int(pltpu.get_tpu_info().vmem_capacity_bytes)
    except Exception:
        return 64 << 20                # conservative (v7x-sized): safe everywhere


def _spatial_attention_kernel(C, H, W, acc_rows, w_ref, x_ref, o_ref,
                              sum_ref, max_ref, avg_pl_ref, max_pl_ref):
    # w_ref   : SMEM (2*K*K,) f32 conv weights, order [in_channel, kh, kw]
    # x_ref   : VMEM (1, c_tile, H*W) lane-dense channel tile of x
    # o_ref   : VMEM (1, 1, H, W) output block (written only at the last k)
    # sum_ref / max_ref       : VMEM (acc_rows, H*W) running channel sum / max
    # avg_pl_ref / max_pl_ref : VMEM (HP8, WP128) zero-padded conv planes
    S = H * W
    k = pl.program_id(1)
    nk = pl.num_programs(1)

    @pl.when(k == 0)
    def _init():
        sum_ref[...] = jnp.zeros_like(sum_ref)
        max_ref[...] = jnp.full_like(max_ref, -jnp.inf)

    # Fused mean/max pass over this channel tile (lane-dense, f32 accumulation).
    xs = x_ref[0].astype(jnp.float32)                       # (c_tile, S)
    if acc_rows == 8:
        # Per-sublane partials: reduce only the leading (vreg-group) axis ->
        # pure VPU adds/maxes, full-vreg accumulator read-modify-write.  The
        # single 8->1 cross-sublane (XLU) reduce is deferred to _finalize.
        xs3 = xs.reshape(xs.shape[0] // 8, 8, S)            # leading split: free
        sum_ref[...] = sum_ref[...] + jnp.sum(xs3, axis=0)
        max_ref[...] = jnp.maximum(max_ref[...], jnp.max(xs3, axis=0))
    else:
        sum_ref[...] = sum_ref[...] + jnp.sum(xs, axis=0, keepdims=True)
        max_ref[...] = jnp.maximum(max_ref[...],
                                   jnp.max(xs, axis=0, keepdims=True))

    @pl.when(k == nk - 1)
    def _finalize():
        # Single cross-sublane combine per batch element.
        avg = jnp.sum(sum_ref[...], axis=0, keepdims=True) * jnp.float32(1.0 / C)
        mx = jnp.max(max_ref[...], axis=0, keepdims=True)   # (1, S)

        # Zero the aligned padded planes (borders must be 0; the interior is
        # fully overwritten below).  Tiny; re-zeroing per batch element is
        # free and stays correct under megacore sharding.
        avg_pl_ref[...] = jnp.zeros_like(avg_pl_ref)
        max_pl_ref[...] = jnp.zeros_like(max_pl_ref)

        # Scatter the lane-dense rows into the interior of the padded planes.
        # (A single reshape(H, W) + one sliced store was considered — see the
        # header: Mosaic shape_cast cannot unflatten lanes into sublanes when
        # the minor dim W is not a multiple of 128, so the proven per-row
        # form is kept; cost ~4H ops, once per batch element.)
        for i in range(H):
            row = slice(i * W, (i + 1) * W)
            avg_pl_ref[PAD + i:PAD + i + 1, PAD:PAD + W] = avg[:, row]
            max_pl_ref[PAD + i:PAD + i + 1, PAD:PAD + W] = mx[:, row]

        # 7x7, 2->1 channel conv on the VPU.  K independent accumulators (one
        # per kh) break the 98-deep serial dependency chain so the VPU FMAs
        # and XLU sublane-slice relayouts can pipeline; kw lane shifts are
        # hoisted (14 lane-offset loads total).
        accs = [None] * K
        for c, plane_ref in enumerate((avg_pl_ref, max_pl_ref)):
            for kw in range(K):
                cols = plane_ref[:, kw:kw + W]               # (HP8, W) lane slice
                for kh in range(K):
                    wgt = w_ref[c * K * K + kh * K + kw]     # SMEM scalar
                    term = wgt * cols[kh:kh + H, :]          # sublane slice
                    accs[kh] = term if accs[kh] is None else accs[kh] + term
        while len(accs) > 1:                                 # tree combine
            nxt = [accs[i] + accs[i + 1] for i in range(0, len(accs) - 1, 2)]
            if len(accs) % 2:
                nxt.append(accs[-1])
            accs = nxt

        o_ref[0, 0] = jax.nn.sigmoid(accs[0]).astype(o_ref.dtype)


def spatial_attention(x, conv_weight, *, x_block_budget_bytes=None):
    """x: (N, C, H, W); conv_weight: (1, 2, K, K) -> returns (N, 1, H, W)."""
    N, C, H, W = x.shape
    S = H * W
    itemsize = jnp.dtype(x.dtype).itemsize

    # Lane-dense layout for the channel reduction; the reshape is free
    # (contiguous NCHW), so there is no extra HBM pass over x.  Do NOT
    # pre-cast x to f32 here (would double the read traffic).
    x_flat = x.reshape(N, C, S)

    # Generation-aware budgets: ~5 MiB per x buffer already sits near the HBM
    # roofline, so 64 MiB parts (v7x) stay conservative; 128 MiB parts
    # (v5e/v6e) spend more so the once-per-n finalize epilogue amortizes over
    # fewer, larger steps.
    vmem_cap = _vmem_capacity_bytes()
    big_vmem = vmem_cap >= (100 << 20)
    if x_block_budget_bytes is None:
        x_block_budget_bytes = (28 << 20) if big_vmem else (10 << 20)

    c_tile = _pick_c_tile(C, S, itemsize, x_block_budget_bytes)
    assert C % c_tile == 0
    n_k = C // c_tile
    acc_rows = 8 if c_tile % 8 == 0 else 1

    hp8 = _round_up(H + 2 * PAD, 8)       # sublane-aligned padded plane rows
    wp128 = _round_up(W + 2 * PAD, 128)   # lane-aligned padded plane cols
    s_pad = _round_up(S, 128)

    w_flat = conv_weight.reshape(2 * K * K).astype(jnp.float32)

    # Declared VMEM limit from the actual double-buffered blocks + scratch +
    # margin; never more than physical capacity minus headroom for Mosaic
    # internals.  (Output estimate uses round_up(W, 128), fixing the previous
    # hard-coded 128-lane assumption.)
    vmem_need = (2 * _round_up(c_tile, 8) * s_pad * itemsize            # x dbl buf
                 + 2 * _round_up(H, 8) * _round_up(W, 128) * itemsize   # out dbl buf
                 + 2 * 8 * s_pad * 4                                    # sum/max scratch
                 + 2 * hp8 * wp128 * 4                                  # padded planes
                 + (4 << 20))                                           # margin
    vmem_limit = int(min(max(vmem_need, 16 << 20), vmem_cap - (8 << 20)))

    kernel = functools.partial(_spatial_attention_kernel, C, H, W, acc_rows)

    # TODO(synk): v7x small-batch (N==1): add a second "parallel" grid axis
    # (split channels per TensorCore with a cross-core combine, or split H
    # with a 3-row conv halo) so both cores are busy.
    # TODO(synk): very large H*W (where even c_tile=8 overflows the budget)
    # needs an S-tiled grid axis.
    # TODO(synk): when W % 128 == 0, a native (1, c_tile, H, W) block path
    # (accumulate straight into an (H, W) scratch) removes the row scatter.
    return pl.pallas_call(
        kernel,
        out_shape=jax.ShapeDtypeStruct((N, 1, H, W), x.dtype),
        grid=(N, n_k),
        in_specs=[
            # Weights live in SMEM for the whole kernel; functionally
            # equivalent to scalar prefetch here (98 floats, not used in any
            # index_map), and this placement is proven on all generations.
            pl.BlockSpec(memory_space=pltpu.MemorySpace.SMEM),
            pl.BlockSpec((1, c_tile, S), lambda n, k: (n, k, 0)),    # x tile
        ],
        out_specs=pl.BlockSpec((1, 1, H, W), lambda n, k: (n, 0, 0, 0)),
        scratch_shapes=[
            pltpu.VMEM((acc_rows, S), jnp.float32),   # running channel sum
            pltpu.VMEM((acc_rows, S), jnp.float32),   # running channel max
            pltpu.VMEM((hp8, wp128), jnp.float32),    # padded avg plane
            pltpu.VMEM((hp8, wp128), jnp.float32),    # padded max plane
        ],
        compiler_params=pltpu.CompilerParams(
            dimension_semantics=("parallel", "arbitrary"),
            vmem_limit_bytes=vmem_limit),
    )(w_flat, x_flat)


def reference(x, conv_weight):
    """Pure-JAX reference (matches the PyTorch module)."""
    avg = jnp.mean(x, axis=1, keepdims=True)
    mx = jnp.max(x, axis=1, keepdims=True)
    cat = jnp.concatenate([avg, mx], axis=1)                 # (N, 2, H, W)
    y = lax.conv_general_dilated(
        cat.astype(jnp.float32), conv_weight.astype(jnp.float32),
        window_strides=(1, 1), padding=((PAD, PAD), (PAD, PAD)),
        dimension_numbers=("NCHW", "OIHW", "NCHW"))
    return jax.nn.sigmoid(y).astype(x.dtype)


if __name__ == "__main__":
    key = jax.random.PRNGKey(0)
    kx, kw2 = jax.random.split(key)

    N, C, H, W = 2, 4, 16, 16
    x = jax.random.normal(kx, (N, C, H, W), dtype=jnp.float32)

    # Deterministic synthetic conv weight, shape (out=1, in=2, K, K),
    # scaled roughly like PyTorch's default kaiming-uniform bound.
    bound = 1.0 / (2 * K * K) ** 0.5
    conv_weight = jax.random.uniform(
        kw2, (1, 2, K, K), minval=-bound, maxval=bound, dtype=jnp.float32)

    out = jax.block_until_ready(spatial_attention(x, conv_weight))
    ref = jax.block_until_ready(reference(x, conv_weight))

    assert out.shape == (N, 1, H, W)
    assert jnp.allclose(out, ref, atol=1e-5, rtol=1e-5)

    print("KERNEL_OK")
</pallas_src>

<mosaic_0001>
module attributes {stable_mosaic.version = 11 : i64} {
  func.func @_spatial_attention_kernel(%arg0: i32, %arg1: i32, %arg2: memref<98xf32, #tpu.memory_space<smem>>, %arg3: memref<1x4x256xf32, #tpu.memory_space<vmem>>, %arg4: memref<1x1x16x16xf32, #tpu.memory_space<vmem>>, %arg5: memref<1x256xf32, #tpu.memory_space<vmem>>, %arg6: memref<1x256xf32, #tpu.memory_space<vmem>>, %arg7: memref<24x128xf32, #tpu.memory_space<vmem>>, %arg8: memref<24x128xf32, #tpu.memory_space<vmem>>) attributes {dimension_semantics = [#tpu.dimension_semantics<parallel>, #tpu.dimension_semantics<arbitrary>], iteration_bounds = array<i64: 2, 1>, scalar_prefetch = 0 : i64, scratch_operands = 4 : i64, tpu.core_type = #tpu.core_type<tc>, window_params = [{transform_indices = @transform_0, window_bounds = array<i64: 98>}, {transform_indices = @transform_1, window_bounds = array<i64: 1, 4, 256>}, {transform_indices = @transform_2, window_bounds = array<i64: 1, 1, 16, 16>}]} {
    %c0_i32 = arith.constant 0 : i32
    %0 = arith.cmpi eq, %arg1, %c0_i32 : i32
    %1 = arith.extui %0 : i1 to i32
    %c0_i32_0 = arith.constant 0 : i32
    %2 = arith.cmpi ne, %1, %c0_i32_0 : i32
    scf.if %2 {
      %cst_14 = arith.constant 0.000000e+00 : f32
      %18 = vector.broadcast %cst_14 : f32 to vector<1x256xf32>
      %c0_15 = arith.constant 0 : index
      %c0_16 = arith.constant 0 : index
      %19 = vector.load %arg5[%c0_15, %c0_16] : memref<1x256xf32, #tpu.memory_space<vmem>>, vector<1x256xf32>
      tpu.vector_store %arg5[%c0_15, %c0_16], %18 {strides = array<i32>} : memref<1x256xf32, #tpu.memory_space<vmem>>, vector<1x256xf32>,
      %cst_17 = arith.constant 0xFF800000 : f32
      %20 = vector.broadcast %cst_17 : f32 to vector<1x256xf32>
      %c0_18 = arith.constant 0 : index
      %c0_19 = arith.constant 0 : index
      %21 = vector.load %arg6[%c0_18, %c0_19] : memref<1x256xf32, #tpu.memory_space<vmem>>, vector<1x256xf32>
      tpu.vector_store %arg6[%c0_18, %c0_19], %20 {strides = array<i32>} : memref<1x256xf32, #tpu.memory_space<vmem>>, vector<1x256xf32>,
    } else {
    }
    %c0 = arith.constant 0 : index
    %c0_1 = arith.constant 0 : index
    %c0_2 = arith.constant 0 : index
    %3 = vector.load %arg3[%c0, %c0_1, %c0_2] : memref<1x4x256xf32, #tpu.memory_space<vmem>>, vector<1x4x256xf32>
    %4 = vector.shape_cast %3 : vector<1x4x256xf32> to vector<4x256xf32>
    %c0_3 = arith.constant 0 : index
    %c0_4 = arith.constant 0 : index
    %5 = vector.load %arg5[%c0_3, %c0_4] : memref<1x256xf32, #tpu.memory_space<vmem>>, vector<1x256xf32>
    %cst = arith.constant dense<0.000000e+00> : vector<256xf32>
    %6 = vector.multi_reduction <add>, %4, %cst [0] : vector<4x256xf32> to vector<256xf32>
    %7 = vector.shape_cast %6 : vector<256xf32> to vector<1x256xf32>
    %8 = arith.addf %5, %7 : vector<1x256xf32>
    %c0_5 = arith.constant 0 : index
    %c0_6 = arith.constant 0 : index
    %9 = vector.load %arg5[%c0_5, %c0_6] : memref<1x256xf32, #tpu.memory_space<vmem>>, vector<1x256xf32>
    tpu.vector_store %arg5[%c0_5, %c0_6], %8 {strides = array<i32>} : memref<1x256xf32, #tpu.memory_space<vmem>>, vector<1x256xf32>,
    %c0_7 = arith.constant 0 : index
    %c0_8 = arith.constant 0 : index
    %10 = vector.load %arg6[%c0_7, %c0_8] : memref<1x256xf32, #tpu.memory_space<vmem>>, vector<1x256xf32>
    %cst_9 = arith.constant dense<0xFF800000> : vector<256xf32>
    %11 = vector.multi_reduction <maximumf>, %4, %cst_9 [0] : vector<4x256xf32> to vector<256xf32>
    %12 = vector.shape_cast %11 : vector<256xf32> to vector<1x256xf32>
    %13 = arith.maximumf %10, %12 : vector<1x256xf32>
    %c0_10 = arith.constant 0 : index
    %c0_11 = arith.constant 0 : index
    %14 = vector.load %arg6[%c0_10, %c0_11] : memref<1x256xf32, #tpu.memory_space<vmem>>, vector<1x256xf32>
    tpu.vector_store %arg6[%c0_10, %c0_11], %13 {strides = array<i32>} : memref<1x256xf32, #tpu.memory_space<vmem>>, vector<1x256xf32>,
    %c0_i32_12 = arith.constant 0 : i32
    %15 = arith.cmpi eq, %arg1, %c0_i32_12 : i32
    %16 = arith.extui %15 : i1 to i32
    %c0_i32_13 = arith.constant 0 : i32
    %17 = arith.cmpi ne, %16, %c0_i32_13 : i32
    scf.if %17 {
      %c0_14 = arith.constant 0 : index
      %c0_15 = arith.constant 0 : index
      %18 = vector.load %arg5[%c0_14, %c0_15] : memref<1x256xf32, #tpu.memory_space<vmem>>, vector<1x256xf32>
      %cst_16 = arith.constant dense<0.000000e+00> : vector<256xf32>
      %19 = vector.multi_reduction <add>, %18, %cst_16 [0] : vector<1x256xf32> to vector<256xf32>
      %20 = vector.shape_cast %19 : vector<256xf32> to vector<1x256xf32>
      %cst_17 = arith.constant 2.500000e-01 : f32
      %21 = vector.broadcast %cst_17 : f32 to vector<1x256xf32>
      %22 = arith.mulf %20, %21 : vector<1x256xf32>
      %c0_18 = arith.constant 0 : index
      %c0_19 = arith.constant 0 : index
      %23 = vector.load %arg6[%c0_18, %c0_19] : memref<1x256xf32, #tpu.memory_space<vmem>>, vector<1x256xf32>
      %cst_20 = arith.constant dense<0xFF800000> : vector<256xf32>
      %24 = vector.multi_reduction <maximumf>, %23, %cst_20 [0] : vector<1x256xf32> to vector<256xf32>
      %25 = vector.shape_cast %24 : vector<256xf32> to vector<1x256xf32>
      %cst_21 = arith.constant 0.000000e+00 : f32
      %26 = vector.broadcast %cst_21 : f32 to vector<24x128xf32>
      %c0_22 = arith.constant 0 : index
      %c0_23 = arith.constant 0 : index
      %27 = vector.load %arg7[%c0_22, %c0_23] : memref<24x128xf32, #tpu.memory_space<vmem>>, vector<24x128xf32>
      tpu.vector_store %arg7[%c0_22, %c0_23], %26 {strides = array<i32>} : memref<24x128xf32, #tpu.memory_space<vmem>>, vector<24x128xf32>,
      %cst_24 = arith.constant 0.000000e+00 : f32
      %28 = vector.broadcast %cst_24 : f32 to vector<24x128xf32>
      %c0_25 = arith.constant 0 : index
      %c0_26 = arith.constant 0 : index
      %29 = vector.load %arg8[%c0_25, %c0_26] : memref<24x128xf32, #tpu.memory_space<vmem>>, vector<24x128xf32>
      tpu.vector_store %arg8[%c0_25, %c0_26], %28 {strides = array<i32>} : memref<24x128xf32, #tpu.memory_space<vmem>>, vector<24x128xf32>,
      %30 = vector.extract_strided_slice %22 {offsets = [0, 0], sizes = [1, 16], strides = [1, 1]} : vector<1x256xf32> to vector<1x16xf32>
      %c3 = arith.constant 3 : index
      %c3_27 = arith.constant 3 : index
      %31 = vector.load %arg7[%c3, %c3_27] : memref<24x128xf32, #tpu.memory_space<vmem>>, vector<1x16xf32>
      tpu.vector_store %arg7[%c3, %c3_27], %30 {strides = array<i32>} : memref<24x128xf32, #tpu.memory_space<vmem>>, vector<1x16xf32>,
      %32 = vector.extract_strided_slice %25 {offsets = [0, 0], sizes = [1, 16], strides = [1, 1]} : vector<1x256xf32> to vector<1x16xf32>
      %c3_28 = arith.constant 3 : index
      %c3_29 = arith.constant 3 : index
      %33 = vector.load %arg8[%c3_28, %c3_29] : memref<24x128xf32, #tpu.memory_space<vmem>>, vector<1x16xf32>
      tpu.vector_store %arg8[%c3_28, %c3_29], %32 {strides = array<i32>} : memref<24x128xf32, #tpu.memory_space<vmem>>, vector<1x16xf32>,
      %34 = vector.extract_strided_slice %22 {offsets = [0, 16], sizes = [1, 16], strides = [1, 1]} : vector<1x256xf32> to vector<1x16xf32>
      %c4 = arith.constant 4 : index
      %c3_30 = arith.constant 3 : index
      %35 = vector.load %arg7[%c4, %c3_30] : memref<24x128xf32, #tpu.memory_space<vmem>>, vector<1x16xf32>
      tpu.vector_store %arg7[%c4, %c3_30], %34 {strides = array<i32>} : memref<24x128xf32, #tpu.memory_space<vmem>>, vector<1x16xf32>,
      %36 = vector.extract_strided_slice %25 {offsets = [0, 16], sizes = [1, 16], strides = [1, 1]} : vector<1x256xf32> to vector<1x16xf32>
      %c4_31 = arith.constant 4 : index
      %c3_32 = arith.constant 3 : index
      %37 = vector.load %arg8[%c4_31, %c3_32] : memref<24x128xf32, #tpu.memory_space<vmem>>, vector<1x16xf32>
      tpu.vector_store %arg8[%c4_31, %c3_32], %36 {strides = array<i32>} : memref<24x128xf32, #tpu.memory_space<vmem>>, vector<1x16xf32>,
      %38 = vector.extract_strided_slice %22 {offsets = [0, 32], sizes = [1, 16], strides = [1, 1]} : vector<1x256xf32> to vector<1x16xf32>
      %c5 = arith.constant 5 : index
      %c3_33 = arith.constant 3 : index
      %39 = vector.load %arg7[%c5, %c3_33] : memref<24x128xf32, #tpu.memory_space<vmem>>, vector<1x16xf32>
      tpu.vector_store %arg7[%c5, %c3_33], %38 {strides = array<i32>} : memref<24x128xf32, #tpu.memory_space<vmem>>, vector<1x16xf32>,
      %40 = vector.extract_strided_slice %25 {offsets = [0, 32], sizes = [1, 16], strides = [1, 1]} : vector<1x256xf32> to vector<1x16xf32>
      %c5_34 = arith.constant 5 : index
      %c3_35 = arith.constant 3 : index
      %41 = vector.load %arg8[%c5_34, %c3_35] : memref<24x128xf32, #tpu.memory_space<vmem>>, vector<1x16xf32>
      tpu.vector_store %arg8[%c5_34, %c3_35], %40 {strides = array<i32>} : memref<24x128xf32, #tpu.memory_space<vmem>>, vector<1x16xf32>,
      %42 = vector.extract_strided_slice %22 {offsets = [0, 48], sizes = [1, 16], strides = [1, 1]} : vector<1x256xf32> to vector<1x16xf32>
      %c6 = arith.constant 6 : index
      %c3_36 = arith.constant 3 : index
      %43 = vector.load %arg7[%c6, %c3_36] : memref<24x128xf32, #tpu.memory_space<vmem>>, vector<1x16xf32>
      tpu.vector_store %arg7[%c6, %c3_36], %42 {strides = array<i32>} : memref<24x128xf32, #tpu.memory_space<vmem>>, vector<1x16xf32>,
      %44 = vector.extract_strided_slice %25 {offsets = [0, 48], sizes = [1, 16], strides = [1, 1]} : vector<1x256xf32> to vector<1x16xf32>
      %c6_37 = arith.constant 6 : index
      %c3_38 = arith.constant 3 : index
      %45 = vector.load %arg8[%c6_37, %c3_38] : memref<24x128xf32, #tpu.memory_space<vmem>>, vector<1x16xf32>
      tpu.vector_store %arg8[%c6_37, %c3_38], %44 {strides = array<i32>} : memref<24x128xf32, #tpu.memory_space<vmem>>, vector<1x16xf32>,
      %46 = vector.extract_strided_slice %22 {offsets = [0, 64], sizes = [1, 16], strides = [1, 1]} : vector<1x256xf32> to vector<1x16xf32>
      %c7 = arith.constant 7 : index
      %c3_39 = arith.constant 3 : index
      %47 = vector.load %arg7[%c7, %c3_39] : memref<24x128xf32, #tpu.memory_space<vmem>>, vector<1x16xf32>
      tpu.vector_store %arg7[%c7, %c3_39], %46 {strides = array<i32>} : memref<24x128xf32, #tpu.memory_space<vmem>>, vector<1x16xf32>,
      %48 = vector.extract_strided_slice %25 {offsets = [0, 64], sizes = [1, 16], strides = [1, 1]} : vector<1x256xf32> to vector<1x16xf32>
      %c7_40 = arith.constant 7 : index
      %c3_41 = arith.constant 3 : index
      %49 = vector.load %arg8[%c7_40, %c3_41] : memref<24x128xf32, #tpu.memory_space<vmem>>, vector<1x16xf32>
      tpu.vector_store %arg8[%c7_40, %c3_41], %48 {strides = array<i32>} : memref<24x128xf32, #tpu.memory_space<vmem>>, vector<1x16xf32>,
      %50 = vector.extract_strided_slice %22 {offsets = [0, 80], sizes = [1, 16], strides = [1, 1]} : vector<1x256xf32> to vector<1x16xf32>
      %c8 = arith.constant 8 : index
      %c3_42 = arith.constant 3 : index
      %51 = vector.load %arg7[%c8, %c3_42] : memref<24x128xf32, #tpu.memory_space<vmem>>, vector<1x16xf32>
      tpu.vector_store %arg7[%c8, %c3_42], %50 {strides = array<i32>} : memref<24x128xf32, #tpu.memory_space<vmem>>, vector<1x16xf32>,
      %52 = vector.extract_strided_slice %25 {offsets = [0, 80], sizes = [1, 16], strides = [1, 1]} : vector<1x256xf32> to vector<1x16xf32>
      %c8_43 = arith.constant 8 : index
      %c3_44 = arith.constant 3 : index
      %53 = vector.load %arg8[%c8_43, %c3_44] : memref<24x128xf32, #tpu.memory_space<vmem>>, vector<1x16xf32>
      tpu.vector_store %arg8[%c8_43, %c3_44], %52 {strides = array<i32>} : memref<24x128xf32, #tpu.memory_space<vmem>>, vector<1x16xf32>,
      %54 = vector.extract_strided_slice %22 {offsets = [0, 96], sizes = [1, 16], strides = [1, 1]} : vector<1x256xf32> to vector<1x16xf32>
      %c9 = arith.constant 9 : index
      %c3_45 = arith.constant 3 : index
      %55 = vector.load %arg7[%c9, %c3_45] : memref<24x128xf32, #tpu.memory_space<vmem>>, vector<1x16xf32>
      tpu.vector_store %arg7[%c9, %c3_45], %54 {strides = array<i32>} : memref<24x128xf32, #tpu.memory_space<vmem>>, vector<1x16xf32>,
      %56 = vector.extract_strided_slice %25 {offsets = [0, 96], sizes = [1, 16], strides = [1, 1]} : vector<1x256xf32> to vector<1x16xf32>
      %c9_46 = arith.constant 9 : index
      %c3_47 = arith.constant 3 : index
      %57 = vector.load %arg8[%c9_46, %c3_47] : memref<24x128xf32, #tpu.memory_space<vmem>>, vector<1x16xf32>
      tpu.vector_store %arg8[%c9_46, %c3_47], %56 {strides = array<i32>} : memref<24x128xf32, #tpu.memory_space<vmem>>, vector<1x16xf32>,
      %58 = vector.extract_strided_slice %22 {offsets = [0, 112], sizes = [1, 16], strides = [1, 1]} : vector<1x256xf32> to vector<1x16xf32>
      %c10 = arith.constant 10 : index
      %c3_48 = arith.constant 3 : index
      %59 = vector.load %arg7[%c10, %c3_48] : memref<24x128xf32, #tpu.memory_space<vmem>>, vector<1x16xf32>
      tpu.vector_store %arg7[%c10, %c3_48], %58 {strides = array<i32>} : memref<24x128xf32, #tpu.memory_space<vmem>>, vector<1x16xf32>,
      %60 = vector.extract_strided_slice %25 {offsets = [0, 112], sizes = [1, 16], strides = [1, 1]} : vector<1x256xf32> to vector<1x16xf32>
      %c10_49 = arith.constant 10 : index
      %c3_50 = arith.constant 3 : index
      %61 = vector.load %arg8[%c10_49, %c3_50] : memref<24x128xf32, #tpu.memory_space<vmem>>, vector<1x16xf32>
      tpu.vector_store %arg8[%c10_49, %c3_50], %60 {strides = array<i32>} : memref<24x128xf32, #tpu.memory_space<vmem>>, vector<1x16xf32>,
      %62 = vector.extract_strided_slice %22 {offsets = [0, 128], sizes = [1, 16], strides = [1, 1]} : vector<1x256xf32> to vector<1x16xf32>
      %c11 = arith.constant 11 : index
      %c3_51 = arith.constant 3 : index
      %63 = vector.load %arg7[%c11, %c3_51] : memref<24x128xf32, #tpu.memory_space<vmem>>, vector<1x16xf32>
      tpu.vector_store %arg7[%c11, %c3_51], %62 {strides = array<i32>} : memref<24x128xf32, #tpu.memory_space<vmem>>, vector<1x16xf32>,
      %64 = vector.extract_strided_slice %25 {offsets = [0, 128], sizes = [1, 16], strides = [1, 1]} : vector<1x256xf32> to vector<1x16xf32>
      %c11_52 = arith.constant 11 : index
      %c3_53 = arith.constant 3 : index
      %65 = vector.load %arg8[%c11_52, %c3_53] : memref<24x128xf32, #tpu.memory_space<vmem>>, vector<1x16xf32>
      tpu.vector_store %arg8[%c11_52, %c3_53], %64 {strides = array<i32>} : memref<24x128xf32, #tpu.memory_space<vmem>>, vector<1x16xf32>,
      %66 = vector.extract_strided_slice %22 {offsets = [0, 144], sizes = [1, 16], strides = [1, 1]} : vector<1x256xf32> to vector<1x16xf32>
      %c12 = arith.constant 12 : index
      %c3_54 = arith.constant 3 : index
      %67 = vector.load %arg7[%c12, %c3_54] : memref<24x128xf32, #tpu.memory_space<vmem>>, vector<1x16xf32>
      tpu.vector_store %arg7[%c12, %c3_54], %66 {strides = array<i32>} : memref<24x128xf32, #tpu.memory_space<vmem>>, vector<1x16xf32>,
      %68 = vector.extract_strided_slice %25 {offsets = [0, 144], sizes = [1, 16], strides = [1, 1]} : vector<1x256xf32> to vector<1x16xf32>
      %c12_55 = arith.constant 12 : index
      %c3_56 = arith.constant 3 : index
      %69 = vector.load %arg8[%c12_55, %c3_56] : memref<24x128xf32, #tpu.memory_space<vmem>>, vector<1x16xf32>
      tpu.vector_store %arg8[%c12_55, %c3_56], %68 {strides = array<i32>} : memref<24x128xf32, #tpu.memory_space<vmem>>, vector<1x16xf32>,
      %70 = vector.extract_strided_slice %22 {offsets = [0, 160], sizes = [1, 16], strides = [1, 1]} : vector<1x256xf32> to vector<1x16xf32>
      %c13 = arith.constant 13 : index
      %c3_57 = arith.constant 3 : index
      %71 = vector.load %arg7[%c13, %c3_57] : memref<24x128xf32, #tpu.memory_space<vmem>>, vector<1x16xf32>
      tpu.vector_store %arg7[%c13, %c3_57], %70 {strides = array<i32>} : memref<24x128xf32, #tpu.memory_space<vmem>>, vector<1x16xf32>,
      %72 = vector.extract_strided_slice %25 {offsets = [0, 160], sizes = [1, 16], strides = [1, 1]} : vector<1x256xf32> to vector<1x16xf32>
      %c13_58 = arith.constant 13 : index
      %c3_59 = arith.constant 3 : index
      %73 = vector.load %arg8[%c13_58, %c3_59] : memref<24x128xf32, #tpu.memory_space<vmem>>, vector<1x16xf32>
      tpu.vector_store %arg8[%c13_58, %c3_59], %72 {strides = array<i32>} : memref<24x128xf32, #tpu.memory_space<vmem>>, vector<1x16xf32>,
      %74 = vector.extract_strided_slice %22 {offsets = [0, 176], sizes = [1, 16], strides = [1, 1]} : vector<1x256xf32> to vector<1x16xf32>
      %c14 = arith.constant 14 : index
      %c3_60 = arith.constant 3 : index
      %75 = vector.load %arg7[%c14, %c3_60] : memref<24x128xf32, #tpu.memory_space<vmem>>, vector<1x16xf32>
      tpu.vector_store %arg7[%c14, %c3_60], %74 {strides = array<i32>} : memref<24x128xf32, #tpu.memory_space<vmem>>, vector<1x16xf32>,
      %76 = vector.extract_strided_slice %25 {offsets = [0, 176], sizes = [1, 16], strides = [1, 1]} : vector<1x256xf32> to vector<1x16xf32>
      %c14_61 = arith.constant 14 : index
      %c3_62 = arith.constant 3 : index
      %77 = vector.load %arg8[%c14_61, %c3_62] : memref<24x128xf32, #tpu.memory_space<vmem>>, vector<1x16xf32>
      tpu.vector_store %arg8[%c14_61, %c3_62], %76 {strides = array<i32>} : memref<24x128xf32, #tpu.memory_space<vmem>>, vector<1x16xf32>,
      %78 = vector.extract_strided_slice %22 {offsets = [0, 192], sizes = [1, 16], strides = [1, 1]} : vector<1x256xf32> to vector<1x16xf32>
      %c15 = arith.constant 15 : index
      %c3_63 = arith.constant 3 : index
      %79 = vector.load %arg7[%c15, %c3_63] : memref<24x128xf32, #tpu.memory_space<vmem>>, vector<1x16xf32>
      tpu.vector_store %arg7[%c15, %c3_63], %78 {strides = array<i32>} : memref<24x128xf32, #tpu.memory_space<vmem>>, vector<1x16xf32>,
      %80 = vector.extract_strided_slice %25 {offsets = [0, 192], sizes = [1, 16], strides = [1, 1]} : vector<1x256xf32> to vector<1x16xf32>
      %c15_64 = arith.constant 15 : index
      %c3_65 = arith.constant 3 : index
      %81 = vector.load %arg8[%c15_64, %c3_65] : memref<24x128xf32, #tpu.memory_space<vmem>>, vector<1x16xf32>
      tpu.vector_store %arg8[%c15_64, %c3_65], %80 {strides = array<i32>} : memref<24x128xf32, #tpu.memory_space<vmem>>, vector<1x16xf32>,
      %82 = vector.extract_strided_slice %22 {offsets = [0, 208], sizes = [1, 16], strides = [1, 1]} : vector<1x256xf32> to vector<1x16xf32>
      %c16 = arith.constant 16 : index
      %c3_66 = arith.constant 3 : index
      %83 = vector.load %arg7[%c16, %c3_66] : memref<24x128xf32, #tpu.memory_space<vmem>>, vector<1x16xf32>
      tpu.vector_store %arg7[%c16, %c3_66], %82 {strides = array<i32>} : memref<24x128xf32, #tpu.memory_space<vmem>>, vector<1x16xf32>,
      %84 = vector.extract_strided_slice %25 {offsets = [0, 208], sizes = [1, 16], strides = [1, 1]} : vector<1x256xf32> to vector<1x16xf32>
      %c16_67 = arith.constant 16 : index
      %c3_68 = arith.constant 3 : index
      %85 = vector.load %arg8[%c16_67, %c3_68] : memref<24x128xf32, #tpu.memory_space<vmem>>, vector<1x16xf32>
      tpu.vector_store %arg8[%c16_67, %c3_68], %84 {strides = array<i32>} : memref<24x128xf32, #tpu.memory_space<vmem>>, vector<1x16xf32>,
      %86 = vector.extract_strided_slice %22 {offsets = [0, 224], sizes = [1, 16], strides = [1, 1]} : vector<1x256xf32> to vector<1x16xf32>
      %c17 = arith.constant 17 : index
      %c3_69 = arith.constant 3 : index
      %87 = vector.load %arg7[%c17, %c3_69] : memref<24x128xf32, #tpu.memory_space<vmem>>, vector<1x16xf32>
      tpu.vector_store %arg7[%c17, %c3_69], %86 {strides = array<i32>} : memref<24x128xf32, #tpu.memory_space<vmem>>, vector<1x16xf32>,
      %88 = vector.extract_strided_slice %25 {offsets = [0, 224], sizes = [1, 16], strides = [1, 1]} : vector<1x256xf32> to vector<1x16xf32>
      %c17_70 = arith.constant 17 : index
      %c3_71 = arith.constant 3 : index
      %89 = vector.load %arg8[%c17_70, %c3_71] : memref<24x128xf32, #tpu.memory_space<vmem>>, vector<1x16xf32>
      tpu.vector_store %arg8[%c17_70, %c3_71], %88 {strides = array<i32>} : memref<24x128xf32, #tpu.memory_space<vmem>>, vector<1x16xf32>,
      %90 = vector.extract_strided_slice %22 {offsets = [0, 240], sizes = [1, 16], strides = [1, 1]} : vector<1x256xf32> to vector<1x16xf32>
      %c18 = arith.constant 18 : index
      %c3_72 = arith.constant 3 : index
      %91 = vector.load %arg7[%c18, %c3_72] : memref<24x128xf32, #tpu.memory_space<vmem>>, vector<1x16xf32>
      tpu.vector_store %arg7[%c18, %c3_72], %90 {strides = array<i32>} : memref<24x128xf32, #tpu.memory_space<vmem>>, vector<1x16xf32>,
      %92 = vector.extract_strided_slice %25 {offsets = [0, 240], sizes = [1, 16], strides = [1, 1]} : vector<1x256xf32> to vector<1x16xf32>
      %c18_73 = arith.constant 18 : index
      %c3_74 = arith.constant 3 : index
      %93 = vector.load %arg8[%c18_73, %c3_74] : memref<24x128xf32, #tpu.memory_space<vmem>>, vector<1x16xf32>
      tpu.vector_store %arg8[%c18_73, %c3_74], %92 {strides = array<i32>} : memref<24x128xf32, #tpu.memory_space<vmem>>, vector<1x16xf32>,
      %c0_75 = arith.constant 0 : index
      %c0_76 = arith.constant 0 : index
      %94 = vector.load %arg7[%c0_75, %c0_76] : memref<24x128xf32, #tpu.memory_space<vmem>>, vector<24x16xf32>
      %c0_77 = arith.constant 0 : index
      %95 = memref.load %arg2[%c0_77] : memref<98xf32, #tpu.memory_space<smem>>
      %96 = vector.extract_strided_slice %94 {offsets = [0, 0], sizes = [16, 16], strides = [1, 1]} : vector<24x16xf32> to vector<16x16xf32>
      %97 = vector.broadcast %95 : f32 to vector<16x16xf32>
      %98 = arith.mulf %97, %96 : vector<16x16xf32>
      %c7_78 = arith.constant 7 : index
      %99 = memref.load %arg2[%c7_78] : memref<98xf32, #tpu.memory_space<smem>>
      %100 = vector.extract_strided_slice %94 {offsets = [1, 0], sizes = [16, 16], strides = [1, 1]} : vector<24x16xf32> to vector<16x16xf32>
      %101 = vector.broadcast %99 : f32 to vector<16x16xf32>
      %102 = arith.mulf %101, %100 : vector<16x16xf32>
      %c14_79 = arith.constant 14 : index
      %103 = memref.load %arg2[%c14_79] : memref<98xf32, #tpu.memory_space<smem>>
      %104 = vector.extract_strided_slice %94 {offsets = [2, 0], sizes = [16, 16], strides = [1, 1]} : vector<24x16xf32> to vector<16x16xf32>
      %105 = vector.broadcast %103 : f32 to vector<16x16xf32>
      %106 = arith.mulf %105, %104 : vector<16x16xf32>
      %c21 = arith.constant 21 : index
      %107 = memref.load %arg2[%c21] : memref<98xf32, #tpu.memory_space<smem>>
      %108 = vector.extract_strided_slice %94 {offsets = [3, 0], sizes = [16, 16], strides = [1, 1]} : vector<24x16xf32> to vector<16x16xf32>
      %109 = vector.broadcast %107 : f32 to vector<16x16xf32>
      %110 = arith.mulf %109, %108 : vector<16x16xf32>
      %c28 = arith.constant 28 : index
      %111 = memref.load %arg2[%c28] : memref<98xf32, #tpu.memory_space<smem>>
      %112 = vector.extract_strided_slice %94 {offsets = [4, 0], sizes = [16, 16], strides = [1, 1]} : vector<24x16xf32> to vector<16x16xf32>
      %113 = vector.broadcast %111 : f32 to vector<16x16xf32>
      %114 = arith.mulf %113, %112 : vector<16x16xf32>
      %c35 = arith.constant 35 : index
      %115 = memref.load %arg2[%c35] : memref<98xf32, #tpu.memory_space<smem>>
      %116 = vector.extract_strided_slice %94 {offsets = [5, 0], sizes = [16, 16], strides = [1, 1]} : vector<24x16xf32> to vector<16x16xf32>
      %117 = vector.broadcast %115 : f32 to vector<16x16xf32>
      %118 = arith.mulf %117, %116 : vector<16x16xf32>
      %c42 = arith.constant 42 : index
      %119 = memref.load %arg2[%c42] : memref<98xf32, #tpu.memory_space<smem>>
      %120 = vector.extract_strided_slice %94 {offsets = [6, 0], sizes = [16, 16], strides = [1, 1]} : vector<24x16xf32> to vector<16x16xf32>
      %121 = vector.broadcast %119 : f32 to vector<16x16xf32>
      %122 = arith.mulf %121, %120 : vector<16x16xf32>
      %c0_80 = arith.constant 0 : index
      %c1 = arith.constant 1 : index
      %123 = vector.load %arg7[%c0_80, %c1] : memref<24x128xf32, #tpu.memory_space<vmem>>, vector<24x16xf32>
      %c1_81 = arith.constant 1 : index
      %124 = memref.load %arg2[%c1_81] : memref<98xf32, #tpu.memory_space<smem>>
      %125 = vector.extract_strided_slice %123 {offsets = [0, 0], sizes = [16, 16], strides = [1, 1]} : vector<24x16xf32> to vector<16x16xf32>
      %126 = vector.broadcast %124 : f32 to vector<16x16xf32>
      %127 = arith.mulf %126, %125 : vector<16x16xf32>
      %128 = arith.addf %98, %127 : vector<16x16xf32>
      %c8_82 = arith.constant 8 : index
      %129 = memref.load %arg2[%c8_82] : memref<98xf32, #tpu.memory_space<smem>>
      %130 = vector.extract_strided_slice %123 {offsets = [1, 0], sizes = [16, 16], strides = [1, 1]} : vector<24x16xf32> to vector<16x16xf32>
      %131 = vector.broadcast %129 : f32 to vector<16x16xf32>
      %132 = arith.mulf %131, %130 : vector<16x16xf32>
      %133 = arith.addf %102, %132 : vector<16x16xf32>
      %c15_83 = arith.constant 15 : index
      %134 = memref.load %arg2[%c15_83] : memref<98xf32, #tpu.memory_space<smem>>
      %135 = vector.extract_strided_slice %123 {offsets = [2, 0], sizes = [16, 16], strides = [1, 1]} : vector<24x16xf32> to vector<16x16xf32>
      %136 = vector.broadcast %134 : f32 to vector<16x16xf32>
      %137 = arith.mulf %136, %135 : vector<16x16xf32>
      %138 = arith.addf %106, %137 : vector<16x16xf32>
      %c22 = arith.constant 22 : index
      %139 = memref.load %arg2[%c22] : memref<98xf32, #tpu.memory_space<smem>>
      %140 = vector.extract_strided_slice %123 {offsets = [3, 0], sizes = [16, 16], strides = [1, 1]} : vector<24x16xf32> to vector<16x16xf32>
      %141 = vector.broadcast %139 : f32 to vector<16x16xf32>
      %142 = arith.mulf %141, %140 : vector<16x16xf32>
      %143 = arith.addf %110, %142 : vector<16x16xf32>
      %c29 = arith.constant 29 : index
      %144 = memref.load %arg2[%c29] : memref<98xf32, #tpu.memory_space<smem>>
      %145 = vector.extract_strided_slice %123 {offsets = [4, 0], sizes = [16, 16], strides = [1, 1]} : vector<24x16xf32> to vector<16x16xf32>
      %146 = vector.broadcast %144 : f32 to vector<16x16xf32>
      %147 = arith.mulf %146, %145 : vector<16x16xf32>
      %148 = arith.addf %114, %147 : vector<16x16xf32>
      %c36 = arith.constant 36 : index
      %149 = memref.load %arg2[%c36] : memref<98xf32, #tpu.memory_space<smem>>
      %150 = vector.extract_strided_slice %123 {offsets = [5, 0], sizes = [16, 16], strides = [1, 1]} : vector<24x16xf32> to vector<16x16xf32>
      %151 = vector.broadcast %149 : f32 to vector<16x16xf32>
      %152 = arith.mulf %151, %150 : vector<16x16xf32>
      %153 = arith.addf %118, %152 : vector<16x16xf32>
      %c43 = arith.constant 43 : index
      %154 = memref.load %arg2[%c43] : memref<98xf32, #tpu.memory_space<smem>>
      %155 = vector.extract_strided_slice %123 {offsets = [6, 0], sizes = [16, 16], strides = [1, 1]} : vector<24x16xf32> to vector<16x16xf32>
      %156 = vector.broadcast %154 : f32 to vector<16x16xf32>
      %157 = arith.mulf %156, %155 : vector<16x16xf32>
      %158 = arith.addf %122, %157 : vector<16x16xf32>
      %c0_84 = arith.constant 0 : index
      %c2 = arith.constant 2 : index
      %159 = vector.load %arg7[%c0_84, %c2] : memref<24x128xf32, #tpu.memory_space<vmem>>, vector<24x16xf32>
      %c2_85 = arith.constant 2 : index
      %160 = memref.load %arg2[%c2_85] : memref<98xf32, #tpu.memory_space<smem>>
      %161 = vector.extract_strided_slice %159 {offsets = [0, 0], sizes = [16, 16], strides = [1, 1]} : vector<24x16xf32> to vector<16x16xf32>
      %162 = vector.broadcast %160 : f32 to vector<16x16xf32>
      %163 = arith.mulf %162, %161 : vector<16x16xf32>
      %164 = arith.addf %128, %163 : vector<16x16xf32>
      %c9_86 = arith.constant 9 : index
      %165 = memref.load %arg2[%c9_86] : memref<98xf32, #tpu.memory_space<smem>>
      %166 = vector.extract_strided_slice %159 {offsets = [1, 0], sizes = [16, 16], strides = [1, 1]} : vector<24x16xf32> to vector<16x16xf32>
      %167 = vector.broadcast %165 : f32 to vector<16x16xf32>
      %168 = arith.mulf %167, %166 : vector<16x16xf32>
      %169 = arith.addf %133, %168 : vector<16x16xf32>
      %c16_87 = arith.constant 16 : index
      %170 = memref.load %arg2[%c16_87] : memref<98xf32, #tpu.memory_space<smem>>
      %171 = vector.extract_strided_slice %159 {offsets = [2, 0], sizes = [16, 16], strides = [1, 1]} : vector<24x16xf32> to vector<16x16xf32>
      %172 = vector.broadcast %170 : f32 to vector<16x16xf32>
      %173 = arith.mulf %172, %171 : vector<16x16xf32>
      %174 = arith.addf %138, %173 : vector<16x16xf32>
      %c23 = arith.constant 23 : index
      %175 = memref.load %arg2[%c23] : memref<98xf32, #tpu.memory_space<smem>>
      %176 = vector.extract_strided_slice %159 {offsets = [3, 0], sizes = [16, 16], strides = [1, 1]} : vector<24x16xf32> to vector<16x16xf32>
      %177 = vector.broadcast %175 : f32 to vector<16x16xf32>
      %178 = arith.mulf %177, %176 : vector<16x16xf32>
      %179 = arith.addf %143, %178 : vector<16x16xf32>
      %c30 = arith.constant 30 : index
      %180 = memref.load %arg2[%c30] : memref<98xf32, #tpu.memory_space<smem>>
      %181 = vector.extract_strided_slice %159 {offsets = [4, 0], sizes = [16, 16], strides = [1, 1]} : vector<24x16xf32> to vector<16x16xf32>
      %182 = vector.broadcast %180 : f32 to vector<16x16xf32>
      %183 = arith.mulf %182, %181 : vector<16x16xf32>
      %184 = arith.addf %148, %183 : vector<16x16xf32>
      %c37 = arith.constant 37 : index
      %185 = memref.load %arg2[%c37] : memref<98xf32, #tpu.memory_space<smem>>
      %186 = vector.extract_strided_slice %159 {offsets = [5, 0], sizes = [16, 16], strides = [1, 1]} : vector<24x16xf32> to vector<16x16xf32>
      %187 = vector.broadcast %185 : f32 to vector<16x16xf32>
      %188 = arith.mulf %187, %186 : vector<16x16xf32>
      %189 = arith.addf %153, %188 : vector<16x16xf32>
      %c44 = arith.constant 44 : index
      %190 = memref.load %arg2[%c44] : memref<98xf32, #tpu.memory_space<smem>>
      %191 = vector.extract_strided_slice %159 {offsets = [6, 0], sizes = [16, 16], strides = [1, 1]} : vector<24x16xf32> to vector<16x16xf32>
      %192 = vector.broadcast %190 : f32 to vector<16x16xf32>
      %193 = arith.mulf %192, %191 : vector<16x16xf32>
      %194 = arith.addf %158, %193 : vector<16x16xf32>
      %c0_88 = arith.constant 0 : index
      %c3_89 = arith.constant 3 : index
      %195 = vector.load %arg7[%c0_88, %c3_89] : memref<24x128xf32, #tpu.memory_space<vmem>>, vector<24x16xf32>
      %c3_90 = arith.constant 3 : index
      %196 = memref.load %arg2[%c3_90] : memref<98xf32, #tpu.memory_space<smem>>
      %197 = vector.extract_strided_slice %195 {offsets = [0, 0], sizes = [16, 16], strides = [1, 1]} : vector<24x16xf32> to vector<16x16xf32>
      %198 = vector.broadcast %196 : f32 to vector<16x16xf32>
      %199 = arith.mulf %198, %197 : vector<16x16xf32>
      %200 = arith.addf %164, %199 : vector<16x16xf32>
      %c10_91 = arith.constant 10 : index
      %201 = memref.load %arg2[%c10_91] : memref<98xf32, #tpu.memory_space<smem>>
      %202 = vector.extract_strided_slice %195 {offsets = [1, 0], sizes = [16, 16], strides = [1, 1]} : vector<24x16xf32> to vector<16x16xf32>
      %203 = vector.broadcast %201 : f32 to vector<16x16xf32>
      %204 = arith.mulf %203, %202 : vector<16x16xf32>
      %205 = arith.addf %169, %204 : vector<16x16xf32>
      %c17_92 = arith.constant 17 : index
      %206 = memref.load %arg2[%c17_92] : memref<98xf32, #tpu.memory_space<smem>>
      %207 = vector.extract_strided_slice %195 {offsets = [2, 0], sizes = [16, 16], strides = [1, 1]} : vector<24x16xf32> to vector<16x16xf32>
      %208 = vector.broadcast %206 : f32 to vector<16x16xf32>
      %209 = arith.mulf %208, %207 : vector<16x16xf32>
      %210 = arith.addf %174, %209 : vector<16x16xf32>
      %c24 = arith.constant 24 : index
      %211 = memref.load %arg2[%c24] : memref<98xf32, #tpu.memory_space<smem>>
      %212 = vector.extract_strided_slice %195 {offsets = [3, 0], sizes = [16, 16], strides = [1, 1]} : vector<24x16xf32> to vector<16x16xf32>
      %213 = vector.broadcast %211 : f32 to vector<16x16xf32>
      %214 = arith.mulf %213, %212 : vector<16x16xf32>
      %215 = arith.addf %179, %214 : vector<16x16xf32>
      %c31 = arith.constant 31 : index
      %216 = memref.load %arg2[%c31] : memref<98xf32, #tpu.memory_space<smem>>
      %217 = vector.extract_strided_slice %195 {offsets = [4, 0], sizes = [16, 16], strides = [1, 1]} : vector<24x16xf32> to vector<16x16xf32>
      %218 = vector.broadcast %216 : f32 to vector<16x16xf32>
      %219 = arith.mulf %218, %217 : vector<16x16xf32>
      %220 = arith.addf %184, %219 : vector<16x16xf32>
      %c38 = arith.constant 38 : index
      %221 = memref.load %arg2[%c38] : memref<98xf32, #tpu.memory_space<smem>>
      %222 = vector.extract_strided_slice %195 {offsets = [5, 0], sizes = [16, 16], strides = [1, 1]} : vector<24x16xf32> to vector<16x16xf32>
      %223 = vector.broadcast %221 : f32 to vector<16x16xf32>
      %224 = arith.mulf %223, %222 : vector<16x16xf32>
      %225 = arith.addf %189, %224 : vector<16x16xf32>
      %c45 = arith.constant 45 : index
      %226 = memref.load %arg2[%c45] : memref<98xf32, #tpu.memory_space<smem>>
      %227 = vector.extract_strided_slice %195 {offsets = [6, 0], sizes = [16, 16], strides = [1, 1]} : vector<24x16xf32> to vector<16x16xf32>
      %228 = vector.broadcast %226 : f32 to vector<16x16xf32>
      %229 = arith.mulf %228, %227 : vector<16x16xf32>
      %230 = arith.addf %194, %229 : vector<16x16xf32>
      %c0_93 = arith.constant 0 : index
      %c4_94 = arith.constant 4 : index
      %231 = vector.load %arg7[%c0_93, %c4_94] : memref<24x128xf32, #tpu.memory_space<vmem>>, vector<24x16xf32>
      %c4_95 = arith.constant 4 : index
      %232 = memref.load %arg2[%c4_95] : memref<98xf32, #tpu.memory_space<smem>>
      %233 = vector.extract_strided_slice %231 {offsets = [0, 0], sizes = [16, 16], strides = [1, 1]} : vector<24x16xf32> to vector<16x16xf32>
      %234 = vector.broadcast %232 : f32 to vector<16x16xf32>
      %235 = arith.mulf %234, %233 : vector<16x16xf32>
      %236 = arith.addf %200, %235 : vector<16x16xf32>
      %c11_96 = arith.constant 11 : index
      %237 = memref.load %arg2[%c11_96] : memref<98xf32, #tpu.memory_space<smem>>
      %238 = vector.extract_strided_slice %231 {offsets = [1, 0], sizes = [16, 16], strides = [1, 1]} : vector<24x16xf32> to vector<16x16xf32>
      %239 = vector.broadcast %237 : f32 to vector<16x16xf32>
      %240 = arith.mulf %239, %238 : vector<16x16xf32>
      %241 = arith.addf %205, %240 : vector<16x16xf32>
      %c18_97 = arith.constant 18 : index
      %242 = memref.load %arg2[%c18_97] : memref<98xf32, #tpu.memory_space<smem>>
      %243 = vector.extract_strided_slice %231 {offsets = [2, 0], sizes = [16, 16], strides = [1, 1]} : vector<24x16xf32> to vector<16x16xf32>
      %244 = vector.broadcast %242 : f32 to vector<16x16xf32>
      %245 = arith.mulf %244, %243 : vector<16x16xf32>
      %246 = arith.addf %210, %245 : vector<16x16xf32>
      %c25 = arith.constant 25 : index
      %247 = memref.load %arg2[%c25] : memref<98xf32, #tpu.memory_space<smem>>
      %248 = vector.extract_strided_slice %231 {offsets = [3, 0], sizes = [16, 16], strides = [1, 1]} : vector<24x16xf32> to vector<16x16xf32>
      %249 = vector.broadcast %247 : f32 to vector<16x16xf32>
      %250 = arith.mulf %249, %248 : vector<16x16xf32>
      %251 = arith.addf %215, %250 : vector<16x16xf32>
      %c32 = arith.constant 32 : index
      %252 = memref.load %arg2[%c32] : memref<98xf32, #tpu.memory_space<smem>>
      %253 = vector.extract_strided_slice %231 {offsets = [4, 0], sizes = [16, 16], strides = [1, 1]} : vector<24x16xf32> to vector<16x16xf32>
      %254 = vector.broadcast %252 : f32 to vector<16x16xf32>
      %255 = arith.mulf %254, %253 : vector<16x16xf32>
      %256 = arith.addf %220, %255 : vector<16x16xf32>
      %c39 = arith.constant 39 : index
      %257 = memref.load %arg2[%c39] : memref<98xf32, #tpu.memory_space<smem>>
      %258 = vector.extract_strided_slice %231 {offsets = [5, 0], sizes = [16, 16], strides = [1, 1]} : vector<24x16xf32> to vector<16x16xf32>
      %259 = vector.broadcast %257 : f32 to vector<16x16xf32>
      %260 = arith.mulf %259, %258 : vector<16x16xf32>
      %261 = arith.addf %225, %260 : vector<16x16xf32>
      %c46 = arith.constant 46 : index
      %262 = memref.load %arg2[%c46] : memref<98xf32, #tpu.memory_space<smem>>
      %263 = vector.extract_strided_slice %231 {offsets = [6, 0], sizes = [16, 16], strides = [1, 1]} : vector<24x16xf32> to vector<16x16xf32>
      %264 = vector.broadcast %262 : f32 to vector<16x16xf32>
      %265 = arith.mulf %264, %263 : vector<16x16xf32>
      %266 = arith.addf %230, %265 : vector<16x16xf32>
      %c0_98 = arith.constant 0 : index
      %c5_99 = arith.constant 5 : index
      %267 = vector.load %arg7[%c0_98, %c5_99] : memref<24x128xf32, #tpu.memory_space<vmem>>, vector<24x16xf32>
      %c5_100 = arith.constant 5 : index
      %268 = memref.load %arg2[%c5_100] : memref<98xf32, #tpu.memory_space<smem>>
      %269 = vector.extract_strided_slice %267 {offsets = [0, 0], sizes = [16, 16], strides = [1, 1]} : vector<24x16xf32> to vector<16x16xf32>
      %270 = vector.broadcast %268 : f32 to vector<16x16xf32>
      %271 = arith.mulf %270, %269 : vector<16x16xf32>
      %272 = arith.addf %236, %271 : vector<16x16xf32>
      %c12_101 = arith.constant 12 : index
      %273 = memref.load %arg2[%c12_101] : memref<98xf32, #tpu.memory_space<smem>>
      %274 = vector.extract_strided_slice %267 {offsets = [1, 0], sizes = [16, 16], strides = [1, 1]} : vector<24x16xf32> to vector<16x16xf32>
      %275 = vector.broadcast %273 : f32 to vector<16x16xf32>
      %276 = arith.mulf %275, %274 : vector<16x16xf32>
      %277 = arith.addf %241, %276 : vector<16x16xf32>
      %c19 = arith.constant 19 : index
      %278 = memref.load %arg2[%c19] : memref<98xf32, #tpu.memory_space<smem>>
      %279 = vector.extract_strided_slice %267 {offsets = [2, 0], sizes = [16, 16], strides = [1, 1]} : vector<24x16xf32> to vector<16x16xf32>
      %280 = vector.broadcast %278 : f32 to vector<16x16xf32>
      %281 = arith.mulf %280, %279 : vector<16x16xf32>
      %282 = arith.addf %246, %281 : vector<16x16xf32>
      %c26 = arith.constant 26 : index
      %283 = memref.load %arg2[%c26] : memref<98xf32, #tpu.memory_space<smem>>
      %284 = vector.extract_strided_slice %267 {offsets = [3, 0], sizes = [16, 16], strides = [1, 1]} : vector<24x16xf32> to vector<16x16xf32>
      %285 = vector.broadcast %283 : f32 to vector<16x16xf32>
      %286 = arith.mulf %285, %284 : vector<16x16xf32>
      %287 = arith.addf %251, %286 : vector<16x16xf32>
      %c33 = arith.constant 33 : index
      %288 = memref.load %arg2[%c33] : memref<98xf32, #tpu.memory_space<smem>>
      %289 = vector.extract_strided_slice %267 {offsets = [4, 0], sizes = [16, 16], strides = [1, 1]} : vector<24x16xf32> to vector<16x16xf32>
      %290 = vector.broadcast %288 : f32 to vector<16x16xf32>
      %291 = arith.mulf %290, %289 : vector<16x16xf32>
      %292 = arith.addf %256, %291 : vector<16x16xf32>
      %c40 = arith.constant 40 : index
      %293 = memref.load %arg2[%c40] : memref<98xf32, #tpu.memory_space<smem>>
      %294 = vector.extract_strided_slice %267 {offsets = [5, 0], sizes = [16, 16], strides = [1, 1]} : vector<24x16xf32> to vector<16x16xf32>
      %295 = vector.broadcast %293 : f32 to vector<16x16xf32>
      %296 = arith.mulf %295, %294 : vector<16x16xf32>
      %297 = arith.addf %261, %296 : vector<16x16xf32>
      %c47 = arith.constant 47 : index
      %298 = memref.load %arg2[%c47] : memref<98xf32, #tpu.memory_space<smem>>
      %299 = vector.extract_strided_slice %267 {offsets = [6, 0], sizes = [16, 16], strides = [1, 1]} : vector<24x16xf32> to vector<16x16xf32>
      %300 = vector.broadcast %298 : f32 to vector<16x16xf32>
      %301 = arith.mulf %300, %299 : vector<16x16xf32>
      %302 = arith.addf %266, %301 : vector<16x16xf32>
      %c0_102 = arith.constant 0 : index
      %c6_103 = arith.constant 6 : index
      %303 = vector.load %arg7[%c0_102, %c6_103] : memref<24x128xf32, #tpu.memory_space<vmem>>, vector<24x16xf32>
      %c6_104 = arith.constant 6 : index
      %304 = memref.load %arg2[%c6_104] : memref<98xf32, #tpu.memory_space<smem>>
      %305 = vector.extract_strided_slice %303 {offsets = [0, 0], sizes = [16, 16], strides = [1, 1]} : vector<24x16xf32> to vector<16x16xf32>
      %306 = vector.broadcast %304 : f32 to vector<16x16xf32>
      %307 = arith.mulf %306, %305 : vector<16x16xf32>
      %308 = arith.addf %272, %307 : vector<16x16xf32>
      %c13_105 = arith.constant 13 : index
      %309 = memref.load %arg2[%c13_105] : memref<98xf32, #tpu.memory_space<smem>>
      %310 = vector.extract_strided_slice %303 {offsets = [1, 0], sizes = [16, 16], strides = [1, 1]} : vector<24x16xf32> to vector<16x16xf32>
      %311 = vector.broadcast %309 : f32 to vector<16x16xf32>
      %312 = arith.mulf %311, %310 : vector<16x16xf32>
      %313 = arith.addf %277, %312 : vector<16x16xf32>
      %c20 = arith.constant 20 : index
      %314 = memref.load %arg2[%c20] : memref<98xf32, #tpu.memory_space<smem>>
      %315 = vector.extract_strided_slice %303 {offsets = [2, 0], sizes = [16, 16], strides = [1, 1]} : vector<24x16xf32> to vector<16x16xf32>
      %316 = vector.broadcast %314 : f32 to vector<16x16xf32>
      %317 = arith.mulf %316, %315 : vector<16x16xf32>
      %318 = arith.addf %282, %317 : vector<16x16xf32>
      %c27 = arith.constant 27 : index
      %319 = memref.load %arg2[%c27] : memref<98xf32, #tpu.memory_space<smem>>
      %320 = vector.extract_strided_slice %303 {offsets = [3, 0], sizes = [16, 16], strides = [1, 1]} : vector<24x16xf32> to vector<16x16xf32>
      %321 = vector.broadcast %319 : f32 to vector<16x16xf32>
      %322 = arith.mulf %321, %320 : vector<16x16xf32>
      %323 = arith.addf %287, %322 : vector<16x16xf32>
      %c34 = arith.constant 34 : index
      %324 = memref.load %arg2[%c34] : memref<98xf32, #tpu.memory_space<smem>>
      %325 = vector.extract_strided_slice %303 {offsets = [4, 0], sizes = [16, 16], strides = [1, 1]} : vector<24x16xf32> to vector<16x16xf32>
      %326 = vector.broadcast %324 : f32 to vector<16x16xf32>
      %327 = arith.mulf %326, %325 : vector<16x16xf32>
      %328 = arith.addf %292, %327 : vector<16x16xf32>
      %c41 = arith.constant 41 : index
      %329 = memref.load %arg2[%c41] : memref<98xf32, #tpu.memory_space<smem>>
      %330 = vector.extract_strided_slice %303 {offsets = [5, 0], sizes = [16, 16], strides = [1, 1]} : vector<24x16xf32> to vector<16x16xf32>
      %331 = vector.broadcast %329 : f32 to vector<16x16xf32>
      %332 = arith.mulf %331, %330 : vector<16x16xf32>
      %333 = arith.addf %297, %332 : vector<16x16xf32>
      %c48 = arith.constant 48 : index
      %334 = memref.load %arg2[%c48] : memref<98xf32, #tpu.memory_space<smem>>
      %335 = vector.extract_strided_slice %303 {offsets = [6, 0], sizes = [16, 16], strides = [1, 1]} : vector<24x16xf32> to vector<16x16xf32>
      %336 = vector.broadcast %334 : f32 to vector<16x16xf32>
      %337 = arith.mulf %336, %335 : vector<16x16xf32>
      %338 = arith.addf %302, %337 : vector<16x16xf32>
      %c0_106 = arith.constant 0 : index
      %c0_107 = arith.constant 0 : index
      %339 = vector.load %arg8[%c0_106, %c0_107] : memref<24x128xf32, #tpu.memory_space<vmem>>, vector<24x16xf32>
      %c49 = arith.constant 49 : index
      %340 = memref.load %arg2[%c49] : memref<98xf32, #tpu.memory_space<smem>>
      %341 = vector.extract_strided_slice %339 {offsets = [0, 0], sizes = [16, 16], strides = [1, 1]} : vector<24x16xf32> to vector<16x16xf32>
      %342 = vector.broadcast %340 : f32 to vector<16x16xf32>
      %343 = arith.mulf %342, %341 : vector<16x16xf32>
      %344 = arith.addf %308, %343 : vector<16x16xf32>
      %c56 = arith.constant 56 : index
      %345 = memref.load %arg2[%c56] : memref<98xf32, #tpu.memory_space<smem>>
      %346 = vector.extract_strided_slice %339 {offsets = [1, 0], sizes = [16, 16], strides = [1, 1]} : vector<24x16xf32> to vector<16x16xf32>
      %347 = vector.broadcast %345 : f32 to vector<16x16xf32>
      %348 = arith.mulf %347, %346 : vector<16x16xf32>
      %349 = arith.addf %313, %348 : vector<16x16xf32>
      %c63 = arith.constant 63 : index
      %350 = memref.load %arg2[%c63] : memref<98xf32, #tpu.memory_space<smem>>
      %351 = vector.extract_strided_slice %339 {offsets = [2, 0], sizes = [16, 16], strides = [1, 1]} : vector<24x16xf32> to vector<16x16xf32>
      %352 = vector.broadcast %350 : f32 to vector<16x16xf32>
      %353 = arith.mulf %352, %351 : vector<16x16xf32>
      %354 = arith.addf %318, %353 : vector<16x16xf32>
      %c70 = arith.constant 70 : index
      %355 = memref.load %arg2[%c70] : memref<98xf32, #tpu.memory_space<smem>>
      %356 = vector.extract_strided_slice %339 {offsets = [3, 0], sizes = [16, 16], strides = [1, 1]} : vector<24x16xf32> to vector<16x16xf32>
      %357 = vector.broadcast %355 : f32 to vector<16x16xf32>
      %358 = arith.mulf %357, %356 : vector<16x16xf32>
      %359 = arith.addf %323, %358 : vector<16x16xf32>
      %c77 = arith.constant 77 : index
      %360 = memref.load %arg2[%c77] : memref<98xf32, #tpu.memory_space<smem>>
      %361 = vector.extract_strided_slice %339 {offsets = [4, 0], sizes = [16, 16], strides = [1, 1]} : vector<24x16xf32> to vector<16x16xf32>
      %362 = vector.broadcast %360 : f32 to vector<16x16xf32>
      %363 = arith.mulf %362, %361 : vector<16x16xf32>
      %364 = arith.addf %328, %363 : vector<16x16xf32>
      %c84 = arith.constant 84 : index
      %365 = memref.load %arg2[%c84] : memref<98xf32, #tpu.memory_space<smem>>
      %366 = vector.extract_strided_slice %339 {offsets = [5, 0], sizes = [16, 16], strides = [1, 1]} : vector<24x16xf32> to vector<16x16xf32>
      %367 = vector.broadcast %365 : f32 to vector<16x16xf32>
      %368 = arith.mulf %367, %366 : vector<16x16xf32>
      %369 = arith.addf %333, %368 : vector<16x16xf32>
      %c91 = arith.constant 91 : index
      %370 = memref.load %arg2[%c91] : memref<98xf32, #tpu.memory_space<smem>>
      %371 = vector.extract_strided_slice %339 {offsets = [6, 0], sizes = [16, 16], strides = [1, 1]} : vector<24x16xf32> to vector<16x16xf32>
      %372 = vector.broadcast %370 : f32 to vector<16x16xf32>
      %373 = arith.mulf %372, %371 : vector<16x16xf32>
      %374 = arith.addf %338, %373 : vector<16x16xf32>
      %c0_108 = arith.constant 0 : index
      %c1_109 = arith.constant 1 : index
      %375 = vector.load %arg8[%c0_108, %c1_109] : memref<24x128xf32, #tpu.memory_space<vmem>>, vector<24x16xf32>
      %c50 = arith.constant 50 : index
      %376 = memref.load %arg2[%c50] : memref<98xf32, #tpu.memory_space<smem>>
      %377 = vector.extract_strided_slice %375 {offsets = [0, 0], sizes = [16, 16], strides = [1, 1]} : vector<24x16xf32> to vector<16x16xf32>
      %378 = vector.broadcast %376 : f32 to vector<16x16xf32>
      %379 = arith.mulf %378, %377 : vector<16x16xf32>
      %380 = arith.addf %344, %379 : vector<16x16xf32>
      %c57 = arith.constant 57 : index
      %381 = memref.load %arg2[%c57] : memref<98xf32, #tpu.memory_space<smem>>
      %382 = vector.extract_strided_slice %375 {offsets = [1, 0], sizes = [16, 16], strides = [1, 1]} : vector<24x16xf32> to vector<16x16xf32>
      %383 = vector.broadcast %381 : f32 to vector<16x16xf32>
      %384 = arith.mulf %383, %382 : vector<16x16xf32>
      %385 = arith.addf %349, %384 : vector<16x16xf32>
      %c64 = arith.constant 64 : index
      %386 = memref.load %arg2[%c64] : memref<98xf32, #tpu.memory_space<smem>>
      %387 = vector.extract_strided_slice %375 {offsets = [2, 0], sizes = [16, 16], strides = [1, 1]} : vector<24x16xf32> to vector<16x16xf32>
      %388 = vector.broadcast %386 : f32 to vector<16x16xf32>
      %389 = arith.mulf %388, %387 : vector<16x16xf32>
      %390 = arith.addf %354, %389 : vector<16x16xf32>
      %c71 = arith.constant 71 : index
      %391 = memref.load %arg2[%c71] : memref<98xf32, #tpu.memory_space<smem>>
      %392 = vector.extract_strided_slice %375 {offsets = [3, 0], sizes = [16, 16], strides = [1, 1]} : vector<24x16xf32> to vector<16x16xf32>
      %393 = vector.broadcast %391 : f32 to vector<16x16xf32>
      %394 = arith.mulf %393, %392 : vector<16x16xf32>
      %395 = arith.addf %359, %394 : vector<16x16xf32>
      %c78 = arith.constant 78 : index
      %396 = memref.load %arg2[%c78] : memref<98xf32, #tpu.memory_space<smem>>
      %397 = vector.extract_strided_slice %375 {offsets = [4, 0], sizes = [16, 16], strides = [1, 1]} : vector<24x16xf32> to vector<16x16xf32>
      %398 = vector.broadcast %396 : f32 to vector<16x16xf32>
      %399 = arith.mulf %398, %397 : vector<16x16xf32>
      %400 = arith.addf %364, %399 : vector<16x16xf32>
      %c85 = arith.constant 85 : index
      %401 = memref.load %arg2[%c85] : memref<98xf32, #tpu.memory_space<smem>>
      %402 = vector.extract_strided_slice %375 {offsets = [5, 0], sizes = [16, 16], strides = [1, 1]} : vector<24x16xf32> to vector<16x16xf32>
      %403 = vector.broadcast %401 : f32 to vector<16x16xf32>
      %404 = arith.mulf %403, %402 : vector<16x16xf32>
      %405 = arith.addf %369, %404 : vector<16x16xf32>
      %c92 = arith.constant 92 : index
      %406 = memref.load %arg2[%c92] : memref<98xf32, #tpu.memory_space<smem>>
      %407 = vector.extract_strided_slice %375 {offsets = [6, 0], sizes = [16, 16], strides = [1, 1]} : vector<24x16xf32> to vector<16x16xf32>
      %408 = vector.broadcast %406 : f32 to vector<16x16xf32>
      %409 = arith.mulf %408, %407 : vector<16x16xf32>
      %410 = arith.addf %374, %409 : vector<16x16xf32>
      %c0_110 = arith.constant 0 : index
      %c2_111 = arith.constant 2 : index
      %411 = vector.load %arg8[%c0_110, %c2_111] : memref<24x128xf32, #tpu.memory_space<vmem>>, vector<24x16xf32>
      %c51 = arith.constant 51 : index
      %412 = memref.load %arg2[%c51] : memref<98xf32, #tpu.memory_space<smem>>
      %413 = vector.extract_strided_slice %411 {offsets = [0, 0], sizes = [16, 16], strides = [1, 1]} : vector<24x16xf32> to vector<16x16xf32>
      %414 = vector.broadcast %412 : f32 to vector<16x16xf32>
      %415 = arith.mulf %414, %413 : vector<16x16xf32>
      %416 = arith.addf %380, %415 : vector<16x16xf32>
      %c58 = arith.constant 58 : index
      %417 = memref.load %arg2[%c58] : memref<98xf32, #tpu.memory_space<smem>>
      %418 = vector.extract_strided_slice %411 {offsets = [1, 0], sizes = [16, 16], strides = [1, 1]} : vector<24x16xf32> to vector<16x16xf32>
      %419 = vector.broadcast %417 : f32 to vector<16x16xf32>
      %420 = arith.mulf %419, %418 : vector<16x16xf32>
      %421 = arith.addf %385, %420 : vector<16x16xf32>
      %c65 = arith.constant 65 : index
      %422 = memref.load %arg2[%c65] : memref<98xf32, #tpu.memory_space<smem>>
      %423 = vector.extract_strided_slice %411 {offsets = [2, 0], sizes = [16, 16], strides = [1, 1]} : vector<24x16xf32> to vector<16x16xf32>
      %424 = vector.broadcast %422 : f32 to vector<16x16xf32>
      %425 = arith.mulf %424, %423 : vector<16x16xf32>
      %426 = arith.addf %390, %425 : vector<16x16xf32>
      %c72 = arith.constant 72 : index
      %427 = memref.load %arg2[%c72] : memref<98xf32, #tpu.memory_space<smem>>
      %428 = vector.extract_strided_slice %411 {offsets = [3, 0], sizes = [16, 16], strides = [1, 1]} : vector<24x16xf32> to vector<16x16xf32>
      %429 = vector.broadcast %427 : f32 to vector<16x16xf32>
      %430 = arith.mulf %429, %428 : vector<16x16xf32>
      %431 = arith.addf %395, %430 : vector<16x16xf32>
      %c79 = arith.constant 79 : index
      %432 = memref.load %arg2[%c79] : memref<98xf32, #tpu.memory_space<smem>>
      %433 = vector.extract_strided_slice %411 {offsets = [4, 0], sizes = [16, 16], strides = [1, 1]} : vector<24x16xf32> to vector<16x16xf32>
      %434 = vector.broadcast %432 : f32 to vector<16x16xf32>
      %435 = arith.mulf %434, %433 : vector<16x16xf32>
      %436 = arith.addf %400, %435 : vector<16x16xf32>
      %c86 = arith.constant 86 : index
      %437 = memref.load %arg2[%c86] : memref<98xf32, #tpu.memory_space<smem>>
      %438 = vector.extract_strided_slice %411 {offsets = [5, 0], sizes = [16, 16], strides = [1, 1]} : vector<24x16xf32> to vector<16x16xf32>
      %439 = vector.broadcast %437 : f32 to vector<16x16xf32>
      %440 = arith.mulf %439, %438 : vector<16x16xf32>
      %441 = arith.addf %405, %440 : vector<16x16xf32>
      %c93 = arith.constant 93 : index
      %442 = memref.load %arg2[%c93] : memref<98xf32, #tpu.memory_space<smem>>
      %443 = vector.extract_strided_slice %411 {offsets = [6, 0], sizes = [16, 16], strides = [1, 1]} : vector<24x16xf32> to vector<16x16xf32>
      %444 = vector.broadcast %442 : f32 to vector<16x16xf32>
      %445 = arith.mulf %444, %443 : vector<16x16xf32>
      %446 = arith.addf %410, %445 : vector<16x16xf32>
      %c0_112 = arith.constant 0 : index
      %c3_113 = arith.constant 3 : index
      %447 = vector.load %arg8[%c0_112, %c3_113] : memref<24x128xf32, #tpu.memory_space<vmem>>, vector<24x16xf32>
      %c52 = arith.constant 52 : index
      %448 = memref.load %arg2[%c52] : memref<98xf32, #tpu.memory_space<smem>>
      %449 = vector.extract_strided_slice %447 {offsets = [0, 0], sizes = [16, 16], strides = [1, 1]} : vector<24x16xf32> to vector<16x16xf32>
      %450 = vector.broadcast %448 : f32 to vector<16x16xf32>
      %451 = arith.mulf %450, %449 : vector<16x16xf32>
      %452 = arith.addf %416, %451 : vector<16x16xf32>
      %c59 = arith.constant 59 : index
      %453 = memref.load %arg2[%c59] : memref<98xf32, #tpu.memory_space<smem>>
      %454 = vector.extract_strided_slice %447 {offsets = [1, 0], sizes = [16, 16], strides = [1, 1]} : vector<24x16xf32> to vector<16x16xf32>
      %455 = vector.broadcast %453 : f32 to vector<16x16xf32>
      %456 = arith.mulf %455, %454 : vector<16x16xf32>
      %457 = arith.addf %421, %456 : vector<16x16xf32>
      %c66 = arith.constant 66 : index
      %458 = memref.load %arg2[%c66] : memref<98xf32, #tpu.memory_space<smem>>
      %459 = vector.extract_strided_slice %447 {offsets = [2, 0], sizes = [16, 16], strides = [1, 1]} : vector<24x16xf32> to vector<16x16xf32>
      %460 = vector.broadcast %458 : f32 to vector<16x16xf32>
      %461 = arith.mulf %460, %459 : vector<16x16xf32>
      %462 = arith.addf %426, %461 : vector<16x16xf32>
      %c73 = arith.constant 73 : index
      %463 = memref.load %arg2[%c73] : memref<98xf32, #tpu.memory_space<smem>>
      %464 = vector.extract_strided_slice %447 {offsets = [3, 0], sizes = [16, 16], strides = [1, 1]} : vector<24x16xf32> to vector<16x16xf32>
      %465 = vector.broadcast %463 : f32 to vector<16x16xf32>
      %466 = arith.mulf %465, %464 : vector<16x16xf32>
      %467 = arith.addf %431, %466 : vector<16x16xf32>
      %c80 = arith.constant 80 : index
      %468 = memref.load %arg2[%c80] : memref<98xf32, #tpu.memory_space<smem>>
      %469 = vector.extract_strided_slice %447 {offsets = [4, 0], sizes = [16, 16], strides = [1, 1]} : vector<24x16xf32> to vector<16x16xf32>
      %470 = vector.broadcast %468 : f32 to vector<16x16xf32>
      %471 = arith.mulf %470, %469 : vector<16x16xf32>
      %472 = arith.addf %436, %471 : vector<16x16xf32>
      %c87 = arith.constant 87 : index
      %473 = memref.load %arg2[%c87] : memref<98xf32, #tpu.memory_space<smem>>
      %474 = vector.extract_strided_slice %447 {offsets = [5, 0], sizes = [16, 16], strides = [1, 1]} : vector<24x16xf32> to vector<16x16xf32>
      %475 = vector.broadcast %473 : f32 to vector<16x16xf32>
      %476 = arith.mulf %475, %474 : vector<16x16xf32>
      %477 = arith.addf %441, %476 : vector<16x16xf32>
      %c94 = arith.constant 94 : index
      %478 = memref.load %arg2[%c94] : memref<98xf32, #tpu.memory_space<smem>>
      %479 = vector.extract_strided_slice %447 {offsets = [6, 0], sizes = [16, 16], strides = [1, 1]} : vector<24x16xf32> to vector<16x16xf32>
      %480 = vector.broadcast %478 : f32 to vector<16x16xf32>
      %481 = arith.mulf %480, %479 : vector<16x16xf32>
      %482 = arith.addf %446, %481 : vector<16x16xf32>
      %c0_114 = arith.constant 0 : index
      %c4_115 = arith.constant 4 : index
      %483 = vector.load %arg8[%c0_114, %c4_115] : memref<24x128xf32, #tpu.memory_space<vmem>>, vector<24x16xf32>
      %c53 = arith.constant 53 : index
      %484 = memref.load %arg2[%c53] : memref<98xf32, #tpu.memory_space<smem>>
      %485 = vector.extract_strided_slice %483 {offsets = [0, 0], sizes = [16, 16], strides = [1, 1]} : vector<24x16xf32> to vector<16x16xf32>
      %486 = vector.broadcast %484 : f32 to vector<16x16xf32>
      %487 = arith.mulf %486, %485 : vector<16x16xf32>
      %488 = arith.addf %452, %487 : vector<16x16xf32>
      %c60 = arith.constant 60 : index
      %489 = memref.load %arg2[%c60] : memref<98xf32, #tpu.memory_space<smem>>
      %490 = vector.extract_strided_slice %483 {offsets = [1, 0], sizes = [16, 16], strides = [1, 1]} : vector<24x16xf32> to vector<16x16xf32>
      %491 = vector.broadcast %489 : f32 to vector<16x16xf32>
      %492 = arith.mulf %491, %490 : vector<16x16xf32>
      %493 = arith.addf %457, %492 : vector<16x16xf32>
      %c67 = arith.constant 67 : index
      %494 = memref.load %arg2[%c67] : memref<98xf32, #tpu.memory_space<smem>>
      %495 = vector.extract_strided_slice %483 {offsets = [2, 0], sizes = [16, 16], strides = [1, 1]} : vector<24x16xf32> to vector<16x16xf32>
      %496 = vector.broadcast %494 : f32 to vector<16x16xf32>
      %497 = arith.mulf %496, %495 : vector<16x16xf32>
      %498 = arith.addf %462, %497 : vector<16x16xf32>
      %c74 = arith.constant 74 : index
      %499 = memref.load %arg2[%c74] : memref<98xf32, #tpu.memory_space<smem>>
      %500 = vector.extract_strided_slice %483 {offsets = [3, 0], sizes = [16, 16], strides = [1, 1]} : vector<24x16xf32> to vector<16x16xf32>
      %501 = vector.broadcast %499 : f32 to vector<16x16xf32>
      %502 = arith.mulf %501, %500 : vector<16x16xf32>
      %503 = arith.addf %467, %502 : vector<16x16xf32>
      %c81 = arith.constant 81 : index
      %504 = memref.load %arg2[%c81] : memref<98xf32, #tpu.memory_space<smem>>
      %505 = vector.extract_strided_slice %483 {offsets = [4, 0], sizes = [16, 16], strides = [1, 1]} : vector<24x16xf32> to vector<16x16xf32>
      %506 = vector.broadcast %504 : f32 to vector<16x16xf32>
      %507 = arith.mulf %506, %505 : vector<16x16xf32>
      %508 = arith.addf %472, %507 : vector<16x16xf32>
      %c88 = arith.constant 88 : index
      %509 = memref.load %arg2[%c88] : memref<98xf32, #tpu.memory_space<smem>>
      %510 = vector.extract_strided_slice %483 {offsets = [5, 0], sizes = [16, 16], strides = [1, 1]} : vector<24x16xf32> to vector<16x16xf32>
      %511 = vector.broadcast %509 : f32 to vector<16x16xf32>
      %512 = arith.mulf %511, %510 : vector<16x16xf32>
      %513 = arith.addf %477, %512 : vector<16x16xf32>
      %c95 = arith.constant 95 : index
      %514 = memref.load %arg2[%c95] : memref<98xf32, #tpu.memory_space<smem>>
      %515 = vector.extract_strided_slice %483 {offsets = [6, 0], sizes = [16, 16], strides = [1, 1]} : vector<24x16xf32> to vector<16x16xf32>
      %516 = vector.broadcast %514 : f32 to vector<16x16xf32>
      %517 = arith.mulf %516, %515 : vector<16x16xf32>
      %518 = arith.addf %482, %517 : vector<16x16xf32>
      %c0_116 = arith.constant 0 : index
      %c5_117 = arith.constant 5 : index
      %519 = vector.load %arg8[%c0_116, %c5_117] : memref<24x128xf32, #tpu.memory_space<vmem>>, vector<24x16xf32>
      %c54 = arith.constant 54 : index
      %520 = memref.load %arg2[%c54] : memref<98xf32, #tpu.memory_space<smem>>
      %521 = vector.extract_strided_slice %519 {offsets = [0, 0], sizes = [16, 16], strides = [1, 1]} : vector<24x16xf32> to vector<16x16xf32>
      %522 = vector.broadcast %520 : f32 to vector<16x16xf32>
      %523 = arith.mulf %522, %521 : vector<16x16xf32>
      %524 = arith.addf %488, %523 : vector<16x16xf32>
      %c61 = arith.constant 61 : index
      %525 = memref.load %arg2[%c61] : memref<98xf32, #tpu.memory_space<smem>>
      %526 = vector.extract_strided_slice %519 {offsets = [1, 0], sizes = [16, 16], strides = [1, 1]} : vector<24x16xf32> to vector<16x16xf32>
      %527 = vector.broadcast %525 : f32 to vector<16x16xf32>
      %528 = arith.mulf %527, %526 : vector<16x16xf32>
      %529 = arith.addf %493, %528 : vector<16x16xf32>
      %c68 = arith.constant 68 : index
      %530 = memref.load %arg2[%c68] : memref<98xf32, #tpu.memory_space<smem>>
      %531 = vector.extract_strided_slice %519 {offsets = [2, 0], sizes = [16, 16], strides = [1, 1]} : vector<24x16xf32> to vector<16x16xf32>
      %532 = vector.broadcast %530 : f32 to vector<16x16xf32>
      %533 = arith.mulf %532, %531 : vector<16x16xf32>
      %534 = arith.addf %498, %533 : vector<16x16xf32>
      %c75 = arith.constant 75 : index
      %535 = memref.load %arg2[%c75] : memref<98xf32, #tpu.memory_space<smem>>
      %536 = vector.extract_strided_slice %519 {offsets = [3, 0], sizes = [16, 16], strides = [1, 1]} : vector<24x16xf32> to vector<16x16xf32>
      %537 = vector.broadcast %535 : f32 to vector<16x16xf32>
      %538 = arith.mulf %537, %536 : vector<16x16xf32>
      %539 = arith.addf %503, %538 : vector<16x16xf32>
      %c82 = arith.constant 82 : index
      %540 = memref.load %arg2[%c82] : memref<98xf32, #tpu.memory_space<smem>>
      %541 = vector.extract_strided_slice %519 {offsets = [4, 0], sizes = [16, 16], strides = [1, 1]} : vector<24x16xf32> to vector<16x16xf32>
      %542 = vector.broadcast %540 : f32 to vector<16x16xf32>
      %543 = arith.mulf %542, %541 : vector<16x16xf32>
      %544 = arith.addf %508, %543 : vector<16x16xf32>
      %c89 = arith.constant 89 : index
      %545 = memref.load %arg2[%c89] : memref<98xf32, #tpu.memory_space<smem>>
      %546 = vector.extract_strided_slice %519 {offsets = [5, 0], sizes = [16, 16], strides = [1, 1]} : vector<24x16xf32> to vector<16x16xf32>
      %547 = vector.broadcast %545 : f32 to vector<16x16xf32>
      %548 = arith.mulf %547, %546 : vector<16x16xf32>
      %549 = arith.addf %513, %548 : vector<16x16xf32>
      %c96 = arith.constant 96 : index
      %550 = memref.load %arg2[%c96] : memref<98xf32, #tpu.memory_space<smem>>
      %551 = vector.extract_strided_slice %519 {offsets = [6, 0], sizes = [16, 16], strides = [1, 1]} : vector<24x16xf32> to vector<16x16xf32>
      %552 = vector.broadcast %550 : f32 to vector<16x16xf32>
      %553 = arith.mulf %552, %551 : vector<16x16xf32>
      %554 = arith.addf %518, %553 : vector<16x16xf32>
      %c0_118 = arith.constant 0 : index
      %c6_119 = arith.constant 6 : index
      %555 = vector.load %arg8[%c0_118, %c6_119] : memref<24x128xf32, #tpu.memory_space<vmem>>, vector<24x16xf32>
      %c55 = arith.constant 55 : index
      %556 = memref.load %arg2[%c55] : memref<98xf32, #tpu.memory_space<smem>>
      %557 = vector.extract_strided_slice %555 {offsets = [0, 0], sizes = [16, 16], strides = [1, 1]} : vector<24x16xf32> to vector<16x16xf32>
      %558 = vector.broadcast %556 : f32 to vector<16x16xf32>
      %559 = arith.mulf %558, %557 : vector<16x16xf32>
      %560 = arith.addf %524, %559 : vector<16x16xf32>
      %c62 = arith.constant 62 : index
      %561 = memref.load %arg2[%c62] : memref<98xf32, #tpu.memory_space<smem>>
      %562 = vector.extract_strided_slice %555 {offsets = [1, 0], sizes = [16, 16], strides = [1, 1]} : vector<24x16xf32> to vector<16x16xf32>
      %563 = vector.broadcast %561 : f32 to vector<16x16xf32>
      %564 = arith.mulf %563, %562 : vector<16x16xf32>
      %565 = arith.addf %529, %564 : vector<16x16xf32>
      %c69 = arith.constant 69 : index
      %566 = memref.load %arg2[%c69] : memref<98xf32, #tpu.memory_space<smem>>
      %567 = vector.extract_strided_slice %555 {offsets = [2, 0], sizes = [16, 16], strides = [1, 1]} : vector<24x16xf32> to vector<16x16xf32>
      %568 = vector.broadcast %566 : f32 to vector<16x16xf32>
      %569 = arith.mulf %568, %567 : vector<16x16xf32>
      %570 = arith.addf %534, %569 : vector<16x16xf32>
      %c76 = arith.constant 76 : index
      %571 = memref.load %arg2[%c76] : memref<98xf32, #tpu.memory_space<smem>>
      %572 = vector.extract_strided_slice %555 {offsets = [3, 0], sizes = [16, 16], strides = [1, 1]} : vector<24x16xf32> to vector<16x16xf32>
      %573 = vector.broadcast %571 : f32 to vector<16x16xf32>
      %574 = arith.mulf %573, %572 : vector<16x16xf32>
      %575 = arith.addf %539, %574 : vector<16x16xf32>
      %c83 = arith.constant 83 : index
      %576 = memref.load %arg2[%c83] : memref<98xf32, #tpu.memory_space<smem>>
      %577 = vector.extract_strided_slice %555 {offsets = [4, 0], sizes = [16, 16], strides = [1, 1]} : vector<24x16xf32> to vector<16x16xf32>
      %578 = vector.broadcast %576 : f32 to vector<16x16xf32>
      %579 = arith.mulf %578, %577 : vector<16x16xf32>
      %580 = arith.addf %544, %579 : vector<16x16xf32>
      %c90 = arith.constant 90 : index
      %581 = memref.load %arg2[%c90] : memref<98xf32, #tpu.memory_space<smem>>
      %582 = vector.extract_strided_slice %555 {offsets = [5, 0], sizes = [16, 16], strides = [1, 1]} : vector<24x16xf32> to vector<16x16xf32>
      %583 = vector.broadcast %581 : f32 to vector<16x16xf32>
      %584 = arith.mulf %583, %582 : vector<16x16xf32>
      %585 = arith.addf %549, %584 : vector<16x16xf32>
      %c97 = arith.constant 97 : index
      %586 = memref.load %arg2[%c97] : memref<98xf32, #tpu.memory_space<smem>>
      %587 = vector.extract_strided_slice %555 {offsets = [6, 0], sizes = [16, 16], strides = [1, 1]} : vector<24x16xf32> to vector<16x16xf32>
      %588 = vector.broadcast %586 : f32 to vector<16x16xf32>
      %589 = arith.mulf %588, %587 : vector<16x16xf32>
      %590 = arith.addf %554, %589 : vector<16x16xf32>
      %591 = arith.addf %560, %565 : vector<16x16xf32>
      %592 = arith.addf %570, %575 : vector<16x16xf32>
      %593 = arith.addf %580, %585 : vector<16x16xf32>
      %594 = arith.addf %591, %592 : vector<16x16xf32>
      %595 = arith.addf %593, %590 : vector<16x16xf32>
      %596 = arith.addf %594, %595 : vector<16x16xf32>
      %597 = arith.negf %596 : vector<16x16xf32>
      %598 = math.exp %597 : vector<16x16xf32>
      %cst_120 = arith.constant 1.000000e+00 : f32
      %599 = vector.broadcast %cst_120 : f32 to vector<16x16xf32>
      %600 = arith.addf %599, %598 : vector<16x16xf32>
      %601 = arith.divf %599, %600 : vector<16x16xf32>
      %c0_121 = arith.constant 0 : index
      %c0_122 = arith.constant 0 : index
      %c0_123 = arith.constant 0 : index
      %c0_124 = arith.constant 0 : index
      %602 = vector.load %arg4[%c0_121, %c0_122, %c0_123, %c0_124] : memref<1x1x16x16xf32, #tpu.memory_space<vmem>>, vector<1x1x16x16xf32>
      %603 = vector.shape_cast %602 : vector<1x1x16x16xf32> to vector<16x16xf32>
      %604 = vector.shape_cast %601 : vector<16x16xf32> to vector<1x1x16x16xf32>
      tpu.vector_store %arg4[%c0_121, %c0_122, %c0_123, %c0_124], %604 {strides = array<i32>} : memref<1x1x16x16xf32, #tpu.memory_space<vmem>>, vector<1x1x16x16xf32>,
    } else {
    }
    return
  }
  func.func @transform_0(%arg0: i32, %arg1: i32) -> i32 {
    %c0_i32 = arith.constant 0 : i32
    %c0_i32_0 = arith.constant 0 : i32
    return %c0_i32 : i32
  }
  func.func @transform_1(%arg0: i32, %arg1: i32) -> (i32, i32, i32) {
    %c0_i32 = arith.constant 0 : i32
    %c0_i32_0 = arith.constant 0 : i32
    return %arg0, %arg1, %c0_i32 : i32, i32, i32
  }
  func.func @transform_2(%arg0: i32, %arg1: i32) -> (i32, i32, i32, i32) {
    %c0_i32 = arith.constant 0 : i32
    %c0_i32_0 = arith.constant 0 : i32
    %c0_i32_1 = arith.constant 0 : i32
    %c0_i32_2 = arith.constant 0 : i32
    return %arg0, %c0_i32, %c0_i32_0, %c0_i32_1 : i32, i32, i32, i32
  }
}

</mosaic_0001>

<bundles_post_ra>
// kernel: tpu_custom_call.1
= control target key start
LH: loop header
LB: loop body
LE: loop exit
PB: predicated region body
PF: predicated region fallthrough
CT: control target
= control target key end

     0   :  { %s4404_s0 = inlined_call_operand.hbm [shape: f32[98], index: 0, kind: input, shape index: {}]   ;;  %s4405_s1 = inlined_call_operand.hbm [shape: f32[2,4,256], index: 1, kind: input, shape index: {}]   ;;  %s4406_s2 = inlined_call_operand.hbm [shape: f32[2,1,16,16], index: 2, kind: output, shape index: {}]  }
   0x1   :  { %4432 = sst [smem:[#allocation108_spill]] %s4404_s0 }
   0x2   :  { %4433 = sst [smem:[#allocation109_spill]] %s4405_s1 }
   0x3   :  { %7 = vsyncpa [#allocation9], 0 }
   0x4   :  { %8 = vsyncpa [#allocation7], 0 }
   0x5   :  { %10 = vsyncpa [#allocation7 + $0x1], 0 }
   0x6   :  { %11 = vsyncpa [#allocation8], 0 }
   0x7   :  { %13 = vsyncpa [#allocation8 + $0x1], 0  ;;  %s2737_s9 = smov 0   ;;  %s2739_s10 = smov 0  }
   0x8   :  { %s2741_s11 = smov 0   ;;  %s2743_s12 = smov 0  }
   0x9   :  { %s2745_s13 = smov 0   ;;  %s2747_s14 = smov 0  }
   0xa LB: > { %4434 = sst [smem:[#allocation15_spill]] %s2686_s11  ;;  %s2344_s15 = sadd.s32 4294967295, %s2698_s14   ;;  %s2698_s14 = sphi %s2747_s14, %s19_s14   ;;  %s2694_s13 = sphi %s2745_s13, %s4652_s13   ;;  %s2690_s12 = sphi %s2743_s12, %s4648_s12   ;;  %s2686_s11 = sphi %s2741_s11, %s4647_s11   ;;  %s2682_s10 = sphi %s2739_s10, %s4651_s10   ;;  %s2678_s9 = sphi %s2737_s9, %s4650_s9  }
   0xb   : > { %4435 = sst [smem:[#allocation16_spill]] %s2694_s13  ;;  %s2345_s16 = sadd.s32 4294967294, %s2698_s14  }
   0xc   : > { %p74_p0 = scmp.ne.s32.totalorder %s2682_s10, %s2678_s9  ;;  %p2771_p1 = scmp.eq.s32.totalorder %s2344_s15, 0 }
   0xd   : > { %p2775_p2 = scmp.eq.s32.totalorder %s2344_s15, 1  ;;  %p104_p3 = scmp.eq.s32.totalorder %s2345_s16, 1 }
   0xe   : > { %s4436_s17 = scalar_select %p2771_p1, 1, 0 }
   0xf   : > { %p2781_p4 = por %p2771_p1, %p74_p0  ;;  %p2346_p5 = scmp.ge.s32.totalorder %s2698_s14, 1 }
  0x10   : > { %p2786_p6 = por %p104_p3, %p74_p0  ;;  %p111_p7 = scmp.lt.s32.totalorder %s2698_s14, 3 }
  0x11   : > { %s4438_s19 = scalar_select %p2781_p4, 1, 0 }
  0x12   : > { %s4439_s20 = scalar_select %p2786_p6, 1, 0 }
  0x13   : > { %p2791_p8 = pnand %p2346_p5, %p111_p7  ;;  %s31_s22 = sadd.s32 1, %s2694_s13 }
  0x14   : > { %p2805_p12 = scmp.ge.s32.totalorder %s31_s22, 2  ;;  %s61_s25 = sadd.s32 1, %s2686_s11 }
  0x15   : > { %p2470_p10 = pneg %p2791_p8  ;;  %p68_p13 = scmp.ne.s32.totalorder %s2686_s11, %s2682_s10 }
  0x16   : > { %p69_p0 = scmp.eq.s32.totalorder %s2698_s14, 0  ;;  %s4443_s0 = sld [smem:[#allocation108_spill]] }
  0x17   : > { %p2801_p11 = pnand %p2470_p10, %p2771_p1 }
  0x19   : > { %p2571_p5 = pneg %p2801_p11 }
  0x1c   : > { %s2569_s28 = scalar_lea.hbm %s4443_s0, 16 }
  0x1d   : > { %p2570_p3 = scmp.ne.s32.totalorder %s4443_s0, %s2569_s28  ;;  %p2576_p9 = scmp.lt.u32.totalorder %s2569_s28, %s4443_s0 }
  0x1f   : > { %p2572_p7 = pnand %p2571_p5, %p2570_p3 }
  0x21   : > { %p2573_p10 = pneg %p2572_p7 }
  0x23   : > { %p2578_p6 = pnand %p2576_p9, %p2573_p10 }
  0x25   : > { %2581 = shalt.err (!%p2578_p6)
}
  0x26   : > { %s2700_s5 = smov [#allocation6]   ;;  %s4654_s22 = smov (%p2805_p12, %s31_s22), 0 }
  0x27   : > { %2473 = dma.hbm_to_smem (!%p2801_p11), %s4443_s0, 16, %s2700_s5, [#allocation9]  }
  0x28   : > { %4444 = sst [smem:[#allocation17_spill]] %s4654_s22  ;;  %p2836_p6 = por %p69_p0, %p68_p13 }
  0x29   : > { %p2845_p9 = por %p2775_p2, %p68_p13  ;;  %s56_s16 = ssub.s32 %s2694_s13, %s4654_s22 }
  0x2a   : > { %p2483_p3 = scmp.lt.s32.totalorder %s2698_s14, 2  ;;  %p59_p5 = scmp.eq.s32.totalorder %s56_s16, 0 }
  0x2b   : > { %s4446_s15 = scalar_select %p2845_p9, 1, 0 }
  0x2c   : > { %s133_s23 = sand.u32 1, %s2686_s11   ;;  %s2460_s27 = sshll.u32 %s2694_s13, 7 }
  0x2d   : > { %s2349_s24 = sshll.u32 %s133_s23, 3  ;;  %s4448_s1 = sld [smem:[#allocation109_spill]] }
  0x2e   : > { %s2854_s26 = scalar_select %p59_p5, %s2686_s11, %s61_s25  }
  0x2f   : > { %s137_s18 = scalar_lea.vmem [#allocation10], %s2349_s24  ;;  %p2866_p2 = pnand %p2483_p3, %p2836_p6 }
  0x30   : > { %4447 = sst [smem:[#allocation18_spill]] %s2854_s26  ;;  %s147_s3 = sshll.u32 %s137_s18, 4  ;;  %s2862_s3 = int_to_ptr.vmem [resolvable:$true] %s147_s3 }
  0x31   : > { %s134_s25 = scalar_lea.sflag [#allocation7], %s133_s23  ;;  %p2584_p12 = pneg %p2866_p2 }
  0x33   : > { %s2860_s30 = scalar_lea.hbm %s4448_s1, %s2460_s27  ;;  %s2587_s16 = scalar_lea.hbm %s4448_s1, 256 }
  0x34   : > { %s2582_s5 = scalar_lea.hbm %s2860_s30, 128  ;;  %p2588_p7 = scmp.lt.u32.totalorder %s2860_s30, %s4448_s1 }
  0x35   : > { %p2583_p11 = scmp.ne.s32.totalorder %s2860_s30, %s2582_s5  ;;  %p2589_p10 = scmp.lt.u32.totalorder %s2587_s16, %s2582_s5 }
  0x36   : > { %p2591_p3 = scmp.lt.u32.totalorder %s2582_s5, %s2860_s30 }
  0x37   : > { %p2585_p13 = pnand %p2584_p12, %p2583_p11  ;;  %p2590_p6 = por %p2589_p10, %p2588_p7 }
  0x39   : > { %p2586_p0 = pneg %p2585_p13  ;;  %p2592_p5 = por %p2591_p3, %p2590_p6 }
  0x3b   : > { %p2593_p9 = pnand %p2592_p5, %p2586_p0 }
  0x3d   : > { %2596 = shalt.err (!%p2593_p9)
}
  0x3e   : > { %s2597_s23 = scalar_lea.vmem %s2862_s3, 128  ;;  %s2701_s27 = smov [#allocation10]  }
  0x3f   : > { %p2598_p11 = scmp.ne.s32.totalorder %s2862_s3, %s2597_s23  ;;  %s2602_s28 = sshll.u32 %s2701_s27, 4  ;;  %s2603_s28 = int_to_ptr.vmem [resolvable:$false] %s2602_s28 }
  0x40   : > { %s2604_s29 = scalar_lea.vmem %s2603_s28, 256  ;;  %p2605_p1 = scmp.lt.s32.totalorder %s2862_s3, %s2603_s28 }
  0x41   : > { %p2600_p13 = pnand %p2598_p11, %p2584_p12  ;;  %p2606_p7 = scmp.lt.s32.totalorder %s2604_s29, %s2597_s23 }
  0x43   : > { %p2601_p4 = pneg %p2600_p13  ;;  %p2607_p10 = por %p2606_p7, %p2605_p1 }
  0x45   : > { %p2608_p6 = pnand %p2607_p10, %p2601_p4 }
  0x47   : > { %2611 = shalt.err (!%p2608_p6)
}
  0x48   : > { %2477 = dma.hbm_to_vmem [thread:$0]  (!%p2866_p2), %s2860_s30, 128, %s2862_s3, %s134_s25  }
  0x49   : > { %156 = sbr.rel (%p2791_p8) target bundleno = 942 (0x3ae), region = 28 }
  0x50   : > { %p4450_p9 = scmp.ne.s32.totalorder %s4436_s17, 0 }
  0x52   : > { %2665 = dma.done.wait (%p4450_p9), [#allocation9], 16  }
  0x53   : > { %2667 = vsyncadd (%p4450_p9), [#allocation9], 4294967280  ;;  %s2902_s18 = sand.u32 1, %s2682_s10   ;;  %p4451_p1 = scmp.ne.s32.totalorder %s4438_s19, 0 }
  0x54   : > { %s2354_s5 = sshll.u32 %s2902_s18, 3  ;;  %s163_s4 = scalar_lea.sflag [#allocation7], %s2902_s18 }
  0x55   : > { %s166_s6 = scalar_lea.vmem [#allocation10], %s2354_s5 }
  0x56   : > { %2669 = dma.done.wait (%p4451_p1), %s163_s4, 128  }
  0x57   : > { %2671 = vsyncadd (%p4451_p1), %s163_s4, 4294967168 }
  0x58   : > { %171 = sfence }
  0x59   : > { %v192_v0 = vlaneseq  ;;  %v198_v1 = vld [vmem:[%s166_s6] sm:$0xff]  ;;  %vm203_vm0 = vcmask 1043456   ;;  %v2702_v5 = vmov 0.0   ;;  %v2703_v8 = vmov -inf   ;;  %s2705_s17 = smov 115   ;;  %s2706_s19 = smov 3  }
  0x5a   : > { %v201_v2 = vcombine.high %v198_v1, %v198_v1  ;;  %v204_v3 = vsel %vm203_vm0, %v198_v1, 0.0  ;;  %v243_v4 = vsel %vm203_vm0, %v198_v1, -inf  ;;  %284 = vst [vmem:[#allocation4] sm:$0xff] %v2702_v5  ;;  %285 = vst [vmem:[#allocation4 + $0x8] sm:$0xff] %v2702_v5  ;;  %v2704_v18 = vmov 1966171168  }
  0x5b   : > { %286 = vst [vmem:[#allocation4 + $0x10] sm:$0xff] %v2702_v5  ;;  %287 = vst [vmem:[#allocation5] sm:$0xff] %v2702_v5  ;;  %vm2912_vm1 = vcmp.lt.s32.totalorder %v192_v0, 256  ;;  %v205_v7 = vrot.slane %v204_v3, 4  ;;  %v244_v10 = vrot.slane %v243_v4, 4  ;;  %v222_v19 = vunpack.c.l.s4 %v2704_v18  ;;  %s2707_s21 = smov 99  }
  0x5c   : > { %288 = vst [vmem:[#allocation5 + $0x8] sm:$0xff] %v2702_v5  ;;  %289 = vst [vmem:[#allocation5 + $0x10] sm:$0xff] %v2702_v5  ;;  %v211_v9 = vsel %vm203_vm0, %v201_v2, 0.0  ;;  %v250_v11 = vsel %vm203_vm0, %v201_v2, -inf  ;;  %v225_v25 = vshrl.u32 %v192_v0, 7  ;;  %s2708_s30 = smov 83  }
  0x5d   : > { %197 = vst.msk [vmem:[#allocation3] sm:$0x3] %vm2912_vm1, %v2703_v8  ;;  %196 = vst.msk [vmem:[#allocation2] sm:$0x3] %vm2912_vm1, %v2702_v5  ;;  %v206_v12 = vadd.f32 %v205_v7, %v204_v3  ;;  %v212_v13 = vrot.slane %v211_v9, 4  ;;  %v251_v14 = vrot.slane %v250_v11, 4  ;;  %v245_v15 = vmax.f32 %v243_v4, %v244_v10 }
  0x5e   : > { %v223_v29 = vunpack.c.0.s8 %v222_v19  ;;  %v293_v49 = vsub.s32 0, %v225_v25  ;;  %s2709_s3 = smov 67   ;;  %s2710_s25 = smov 51   ;;  %v367_v55 = vsub.s32 1, %v225_v25  ;;  %vm298_vm2 = vcmask 147480  }
  0x5f   : > { %v207_v16 = vrot.slane %v206_v12, 2  ;;  %v213_v17 = vadd.f32 %v212_v13, %v211_v9  ;;  %v252_v20 = vmax.f32 %v250_v11, %v251_v14  ;;  %v246_v21 = vrot.slane %v245_v15, 2  ;;  %s2711_s7 = smov 35   ;;  %s2712_s16 = smov 19  }
  0x60   : > { %v226_v37 = vsub.s32 %v223_v29, %v225_v25  ;;  %s2948_s8 = sld [smem:[#allocation6 + $0x1]]  ;;  %s2363_s24 = sld [smem:[#allocation6 + $0x8]]  ;;  %vm2142_vm3 = vcmask 1046528   ;;  %vm2183_vm4 = vcmask 1045504   ;;  %vm2231_vm5 = vcmask 130048  }
  0x61   : > { %v208_v22 = vadd.f32 %v207_v16, %v206_v12  ;;  %v214_v23 = vrot.slane %v213_v17, 2  ;;  %v253_v24 = vrot.slane %v252_v20, 2  ;;  %v247_v26 = vmax.f32 %v245_v15, %v246_v21  ;;  %s2713_s23 = smov 127   ;;  %s2364_s27 = sld [smem:[#allocation6 + $0xf]] }
  0x62   : > { %s2365_s28 = sld [smem:[#allocation6 + $0x16]]  ;;  %s2366_s29 = sld [smem:[#allocation6 + $0x1d]] }
  0x63   : > { %v209_v27 = vrot.slane %v208_v22, 1  ;;  %v215_v28 = vadd.f32 %v214_v23, %v213_v17  ;;  %v254_v30 = vmax.f32 %v252_v20, %v253_v24  ;;  %v248_v31 = vrot.slane %v247_v26, 1  ;;  %s2367_s5 = sld [smem:[#allocation6 + $0x24]]  ;;  %s2368_s4 = sld [smem:[#allocation6 + $0x2b]] }
  0x64   : > { %v242_v43 = vld [vmem:[#allocation3] sm:$0x3]  ;;  %v199_v44 = vld [vmem:[#allocation2] sm:$0x3]  ;;  %s2369_s6 = sld [smem:[#allocation6 + $0x2]]  ;;  %s4514_s0 = smov 126  }
  0x65   : > { %v210_v32 = vadd.f32 %v209_v27, %v208_v22  ;;  %v216_v33 = vrot.slane %v215_v28, 1  ;;  %v255_v34 = vrot.slane %v254_v30, 1  ;;  %v249_v35 = vmax.f32 %v247_v26, %v248_v31  ;;  %s3478_s1 = sld [smem:[#allocation6 + $0x3f]]  ;;  %s3480_s22 = sld [smem:[#allocation6 + $0x46]] }
  0x66   : > { %v475_v16 = vstv %s2948_s8  ;;  %v489_v21 = vstv %s2363_s24  ;;  %s2377_s8 = sld [smem:[#allocation6 + $0xa]]  ;;  %s2378_s24 = sld [smem:[#allocation6 + $0x11]] }
  0x67   : > { %v217_v36 = vadd.f32 %v216_v33, %v215_v28  ;;  %v256_v38 = vmax.f32 %v254_v30, %v255_v34  ;;  %v509_v34 = vstv %s2364_s27  ;;  %s4417_s27 = smov 125   ;;  %s3482_s13 = sld [smem:[#allocation6 + $0x4d]] }
  0x68   : > { %s3484_s26 = sld [smem:[#allocation6 + $0x5b]]  ;;  %s3508_s11 = sld [smem:[#allocation6 + $0x2a]] }
  0x69   : > { %v220_v39 = vcombine.low %v210_v32, %v217_v36  ;;  %v259_v40 = vcombine.low %v249_v35, %v256_v38  ;;  %p4643_p8 = scmp.ne.s32.totalorder %s4446_s15, 0 }
  0x6b   : > { %v227_v41 = vrot.slane %v220_v39, %v226_v37  ;;  %v266_v42 = vrot.slane %v259_v40, %v226_v37  ;;  %v529_v39 = vstv %s2365_s28  ;;  %s2379_s28 = sld [smem:[#allocation6 + $0x18]] }
  0x6d   : > { %v234_v45 = vrot.slane %v227_v41, %v226_v37  ;;  %v273_v46 = vrot.slane %v266_v42, %v226_v37  ;;  %v549_v42 = vstv %s2366_s29  ;;  %s2380_s29 = sld [smem:[#allocation6 + $0x1f]] }
  0x6f   : > { %v275_v47 = vmax.f32 %v242_v43, %v273_v46  ;;  %v236_v48 = vadd.f32 %v234_v45, %v199_v44 }
  0x71   : > { %276 = vst.msk [vmem:[#allocation3] sm:$0x3] %vm2912_vm1, %v275_v47  ;;  %241 = vst.msk [vmem:[#allocation2] sm:$0x3] %vm2912_vm1, %v236_v48  ;;  %v569_v47 = vstv %s2367_s5  ;;  %s2381_s5 = sld [smem:[#allocation6 + $0x26]] }
  0x78   : > { %v283_v50 = vld [vmem:[#allocation3] sm:$0x3]  ;;  %v280_v51 = vld [vmem:[#allocation2] sm:$0x3] }
  0x79   : > { %v304_v52 = vrot.slane %v283_v50, %v293_v49  ;;  %v282_v53 = vmul.f32 0.25, %v280_v51  ;;  %v376_v56 = vrot.slane %v283_v50, %v367_v55  ;;  %v589_v50 = vstv %s2368_s4  ;;  %s2382_s4 = sld [smem:[#allocation6 + $0x2d]] }
  0x7b   : > { %313 = vrot.lane.b32.xlu1 %v304_v52, %s2705_s17  ;;  %305 = vrot.lane.b32.xlu0 %v304_v52, %s2706_s19  ;;  %v294_v54 = vrot.slane %v282_v53, %v293_v49  ;;  %v368_v57 = vrot.slane %v282_v53, %v367_v55  ;;  %v609_v55 = vstv %s2369_s6  ;;  %s2383_s6 = sld [smem:[#allocation6 + $0x4]] }
  0x7f   : > { %321 = vrot.lane.b32.xlu1 %v304_v52, %s2707_s21  ;;  %295 = vrot.lane.b32.xlu0 %v294_v54, %s2706_s19 }
  0x83   : > { %329 = vrot.lane.b32.xlu1 %v304_v52, %s2708_s30  ;;  %317 = vrot.lane.b32.xlu0 %v294_v54, %s2707_s21 }
  0x87   : > { %337 = vrot.lane.b32.xlu1 %v304_v52, %s2709_s3  ;;  %325 = vrot.lane.b32.xlu0 %v294_v54, %s2708_s30 }
  0x8b   : > { %345 = vrot.lane.b32.xlu1 %v304_v52, %s2710_s25  ;;  %333 = vrot.lane.b32.xlu0 %v294_v54, %s2709_s3 }
  0x8f   : > { %353 = vrot.lane.b32.xlu1 %v304_v52, %s2711_s7  ;;  %341 = vrot.lane.b32.xlu0 %v294_v54, %s2710_s25 }
  0x93   : > { %361 = vrot.lane.b32.xlu1 %v304_v52, %s2712_s16  ;;  %349 = vrot.lane.b32.xlu0 %v294_v54, %s2711_s7 }
  0x97   : > { %377 = vrot.lane.b32.xlu1 %v376_v56, %s2706_s19  ;;  %357 = vrot.lane.b32.xlu0 %v294_v54, %s2712_s16 }
  0x9b   : > { %385 = vrot.lane.b32.xlu1 %v376_v56, %s2705_s17  ;;  %369 = vrot.lane.b32.xlu0 %v368_v57, %s2706_s19  ;;  %s2371_s19 = sld [smem:[#allocation6 + $0x10]] }
  0x9f   : > { %309 = vrot.lane.b32.xlu1 %v294_v54, %s2705_s17  ;;  %381 = vrot.lane.b32.xlu0 %v368_v57, %s2705_s17  ;;  %s2370_s17 = sld [smem:[#allocation6 + $0x9]] }
  0xa3   : > { %393 = vrot.lane.b32.xlu1 %v376_v56, %s2707_s21  ;;  %389 = vrot.lane.b32.xlu0 %v368_v57, %s2707_s21  ;;  %s4419_s21 = smov 126  }
  0xa7   : > { %401 = vrot.lane.b32.xlu1 %v376_v56, %s2708_s30  ;;  %397 = vrot.lane.b32.xlu0 %v368_v57, %s2708_s30  ;;  %s2372_s30 = sld [smem:[#allocation6 + $0x17]] }
  0xab   : > { %409 = vrot.lane.b32.xlu1 %v376_v56, %s2709_s3  ;;  %405 = vrot.lane.b32.xlu0 %v368_v57, %s2709_s3  ;;  %s2373_s3 = sld [smem:[#allocation6 + $0x1e]] }
  0xaf   : > { %413 = vrot.lane.b32.xlu0 %v368_v57, %s2710_s25  ;;  %417 = vrot.lane.b32.xlu1 %v376_v56, %s2710_s25  ;;  %s2374_s25 = sld [smem:[#allocation6 + $0x25]] }
  0xb3   : > { %421 = vrot.lane.b32.xlu0 %v368_v57, %s2711_s7  ;;  %425 = vrot.lane.b32.xlu1 %v376_v56, %s2711_s7  ;;  %s2375_s7 = sld [smem:[#allocation6 + $0x2c]] }
  0xb7   : > { %429 = vrot.lane.b32.xlu0 %v368_v57, %s2712_s16  ;;  %433 = vrot.lane.b32.xlu1 %v376_v56, %s2712_s16  ;;  %s2376_s16 = sld [smem:[#allocation6 + $0x3]] }
  0xed   : > { %v314_v58 = vpop.permute.xlu1 %313  ;;  %v306_v59 = vpop.permute.xlu0 %305 }
  0xee   : > { %316 = vst.msk [vmem:[#allocation5 + $0x4] sm:$0x1] %vm298_vm2, %v314_v58  ;;  %308 = vst.msk [vmem:[#allocation5 + $0x3] sm:$0x1] %vm298_vm2, %v306_v59  ;;  %v623_v58 = vstv %s2370_s17  ;;  %s2384_s17 = sld [smem:[#allocation6 + $0xb]] }
  0xf1   : > { %v322_v60 = vpop.permute.xlu1 %321  ;;  %v296_v61 = vpop.permute.xlu0 %295 }
  0xf2   : > { %324 = vst.msk [vmem:[#allocation5 + $0x5] sm:$0x1] %vm298_vm2, %v322_v60  ;;  %299 = vst.msk [vmem:[#allocation4 + $0x3] sm:$0x1] %vm298_vm2, %v296_v61  ;;  %v643_v61 = vstv %s2371_s19  ;;  %s2385_s19 = sld [smem:[#allocation6 + $0x12]] }
  0xf5   : > { %v330_v62 = vpop.permute.xlu1 %329  ;;  %v318_v63 = vpop.permute.xlu0 %317 }
  0xf6   : > { %332 = vst.msk [vmem:[#allocation5 + $0x6] sm:$0x1] %vm298_vm2, %v330_v62  ;;  %320 = vst.msk [vmem:[#allocation4 + $0x5] sm:$0x1] %vm298_vm2, %v318_v63 }
  0xf9   : > { %v338_v0 = vpop.permute.xlu1 %337  ;;  %v326_v1 = vpop.permute.xlu0 %325 }
  0xfa   : > { %340 = vst.msk [vmem:[#allocation5 + $0x7] sm:$0x1] %vm298_vm2, %v338_v0  ;;  %328 = vst.msk [vmem:[#allocation4 + $0x6] sm:$0x1] %vm298_vm2, %v326_v1 }
  0xfd   : > { %v346_v2 = vpop.permute.xlu1 %345  ;;  %v334_v3 = vpop.permute.xlu0 %333 }
  0xfe   : > { %348 = vst.msk [vmem:[#allocation5 + $0x8] sm:$0x1] %vm298_vm2, %v346_v2  ;;  %336 = vst.msk [vmem:[#allocation4 + $0x7] sm:$0x1] %vm298_vm2, %v334_v3  ;;  %v663_v2 = vstv %s2372_s30  ;;  %s4415_s30 = smov 124  }
 0x101   : > { %v354_v4 = vpop.permute.xlu1 %353  ;;  %v342_v5 = vpop.permute.xlu0 %341 }
 0x102   : > { %356 = vst.msk [vmem:[#allocation5 + $0x9] sm:$0x1] %vm298_vm2, %v354_v4  ;;  %344 = vst.msk [vmem:[#allocation4 + $0x8] sm:$0x1] %vm298_vm2, %v342_v5  ;;  %v683_v5 = vstv %s2373_s3  ;;  %s2386_s3 = sld [smem:[#allocation6 + $0x19]] }
 0x105   : > { %v362_v6 = vpop.permute.xlu1 %361  ;;  %v350_v7 = vpop.permute.xlu0 %349 }
 0x106   : > { %364 = vst.msk [vmem:[#allocation5 + $0xa] sm:$0x1] %vm298_vm2, %v362_v6  ;;  %352 = vst.msk [vmem:[#allocation4 + $0x9] sm:$0x1] %vm298_vm2, %v350_v7 }
 0x109   : > { %v378_v8 = vpop.permute.xlu1 %377  ;;  %v358_v9 = vpop.permute.xlu0 %357 }
 0x10a   : > { %380 = vst.msk [vmem:[#allocation5 + $0xb] sm:$0x1] %vm298_vm2, %v378_v8  ;;  %360 = vst.msk [vmem:[#allocation4 + $0xa] sm:$0x1] %vm298_vm2, %v358_v9 }
 0x10d   : > { %v386_v10 = vpop.permute.xlu1 %385  ;;  %v370_v11 = vpop.permute.xlu0 %369 }
 0x10e   : > { %388 = vst.msk [vmem:[#allocation5 + $0xc] sm:$0x1] %vm298_vm2, %v386_v10  ;;  %372 = vst.msk [vmem:[#allocation4 + $0xb] sm:$0x1] %vm298_vm2, %v370_v11  ;;  %v703_v10 = vstv %s2374_s25  ;;  %s2387_s25 = sld [smem:[#allocation6 + $0x20]] }
 0x111   : > { %v310_v12 = vpop.permute.xlu1 %309  ;;  %v382_v13 = vpop.permute.xlu0 %381 }
 0x112   : > { %312 = vst.msk [vmem:[#allocation4 + $0x4] sm:$0x1] %vm298_vm2, %v310_v12  ;;  %384 = vst.msk [vmem:[#allocation4 + $0xc] sm:$0x1] %vm298_vm2, %v382_v13  ;;  %v723_v13 = vstv %s2375_s7  ;;  %s2388_s7 = sld [smem:[#allocation6 + $0x27]] }
 0x115   : > { %v394_v14 = vpop.permute.xlu1 %393  ;;  %v390_v15 = vpop.permute.xlu0 %389 }
 0x116   : > { %396 = vst.msk [vmem:[#allocation5 + $0xd] sm:$0x1] %vm298_vm2, %v394_v14  ;;  %392 = vst.msk [vmem:[#allocation4 + $0xd] sm:$0x1] %vm298_vm2, %v390_v15 }
 0x119   : > { %v2955_v17 = vld [vmem:[#allocation4] sm:$0xff]  ;;  %v402_v18 = vpop.permute.xlu1 %401  ;;  %v398_v19 = vpop.permute.xlu0 %397 }
 0x11a   : > { %404 = vst.msk [vmem:[#allocation5 + $0xe] sm:$0x1] %vm298_vm2, %v402_v18  ;;  %400 = vst.msk [vmem:[#allocation4 + $0xe] sm:$0x1] %vm298_vm2, %v398_v19  ;;  %v476_v20 = vmul.f32 %v475_v16, %v2955_v17  ;;  %v490_v24 = vmul.f32 %v489_v21, %v2955_v17  ;;  %v510_v35 = vmul.f32 %v509_v34, %v2955_v17  ;;  %v743_v19 = vstv %s2376_s16  ;;  %s2389_s16 = sld [smem:[#allocation6 + $0x2e]] }
 0x11b   : > { %v550_v43 = vmul.f32 %v549_v42, %v2955_v17  ;;  %v530_v44 = vmul.f32 %v529_v39, %v2955_v17  ;;  %v590_v51 = vmul.f32 %v589_v50, %v2955_v17  ;;  %v570_v52 = vmul.f32 %v569_v47, %v2955_v17 }
 0x11c   : > { %480 = vrot.lane.b32.xlu0 %v476_v20, %s2713_s23  ;;  %v610_v60 = vmul.f32 %v609_v55, %v2955_v17  ;;  %v644_v62 = vmul.f32 %v643_v61, %v2955_v17  ;;  %v624_v63 = vmul.f32 %v623_v58, %v2955_v17  ;;  %v684_v6 = vmul.f32 %v683_v5, %v2955_v17 }
 0x11d   : > { %v410_v22 = vpop.permute.xlu1 %409  ;;  %v406_v23 = vpop.permute.xlu0 %405  ;;  %v664_v7 = vmul.f32 %v663_v2, %v2955_v17  ;;  %v724_v14 = vmul.f32 %v723_v13, %v2955_v17  ;;  %v704_v15 = vmul.f32 %v703_v10, %v2955_v17 }
 0x11e   : > { %412 = vst.msk [vmem:[#allocation5 + $0xf] sm:$0x1] %vm298_vm2, %v410_v22  ;;  %408 = vst.msk [vmem:[#allocation4 + $0xf] sm:$0x1] %vm298_vm2, %v406_v23  ;;  %v757_v22 = vstv %s2377_s8  ;;  %s2390_s8 = sld [smem:[#allocation6 + $0x5]] }
 0x120   : > { %496 = vrot.lane.b32.xlu0 %v490_v24, %s2713_s23  ;;  %v744_v24 = vmul.f32 %v743_v19, %v2955_v17 }
 0x121   : > { %v414_v25 = vpop.permute.xlu0 %413  ;;  %v418_v26 = vpop.permute.xlu1 %417 }
 0x122   : > { %416 = vst.msk [vmem:[#allocation4 + $0x10] sm:$0x1] %vm298_vm2, %v414_v25  ;;  %420 = vst.msk [vmem:[#allocation5 + $0x10] sm:$0x1] %vm298_vm2, %v418_v26  ;;  %v777_v25 = vstv %s2378_s24  ;;  %s2391_s24 = sld [smem:[#allocation6 + $0xc]] }
 0x123   : > { %v778_v26 = vmul.f32 %v777_v25, %v2955_v17 }
 0x125   : > { %v2967_v27 = vld [vmem:[#allocation4 + $0x8] sm:$0xff]  ;;  %v422_v28 = vpop.permute.xlu0 %421  ;;  %v426_v29 = vpop.permute.xlu1 %425 }
 0x126   : > { %424 = vst.msk [vmem:[#allocation4 + $0x11] sm:$0x1] %vm298_vm2, %v422_v28  ;;  %v477_v30 = vmul.f32 %v475_v16, %v2967_v27  ;;  %428 = vst.msk [vmem:[#allocation5 + $0x11] sm:$0x1] %vm298_vm2, %v426_v29  ;;  %v491_v33 = vmul.f32 %v489_v21, %v2967_v27  ;;  %v531_v40 = vmul.f32 %v529_v39, %v2967_v27 }
 0x127   : > { %v511_v41 = vmul.f32 %v509_v34, %v2967_v27  ;;  %v571_v48 = vmul.f32 %v569_v47, %v2967_v27  ;;  %v551_v49 = vmul.f32 %v549_v42, %v2967_v27  ;;  %v611_v56 = vmul.f32 %v609_v55, %v2967_v27 }
 0x128   : > { %482 = vrot.lane.b32.xlu1 %v477_v30, %s2713_s23  ;;  %v591_v57 = vmul.f32 %v589_v50, %v2967_v27  ;;  %v625_v59 = vmul.f32 %v623_v58, %v2967_v27  ;;  %v665_v3 = vmul.f32 %v663_v2, %v2967_v27  ;;  %v645_v4 = vmul.f32 %v643_v61, %v2967_v27 }
 0x129   : > { %v430_v31 = vpop.permute.xlu0 %429  ;;  %v434_v32 = vpop.permute.xlu1 %433  ;;  %v705_v11 = vmul.f32 %v703_v10, %v2967_v27  ;;  %v685_v12 = vmul.f32 %v683_v5, %v2967_v27  ;;  %v745_v20 = vmul.f32 %v743_v19, %v2967_v27  ;;  %v759_v23 = vmul.f32 %v757_v22, %v2967_v27 }
 0x12a   : > { %432 = vst.msk [vmem:[#allocation4 + $0x12] sm:$0x1] %vm298_vm2, %v430_v31  ;;  %436 = vst.msk [vmem:[#allocation5 + $0x12] sm:$0x1] %vm298_vm2, %v434_v32  ;;  %v758_v28 = vmul.f32 %v757_v22, %v2955_v17  ;;  %v797_v31 = vstv %s2379_s28  ;;  %v971_v19 = vstv %s2388_s7  ;;  %s2392_s28 = sld [smem:[#allocation6 + $0x13]]  ;;  %s4411_s7 = smov 122  }
 0x12b   : > { %v799_v32 = vmul.f32 %v797_v31, %v2967_v27 }
 0x12c   : > { %498 = vrot.lane.b32.xlu1 %v491_v33, %s2713_s23  ;;  %v779_v33 = vmul.f32 %v777_v25, %v2967_v27 }
 0x130   : > { %516 = vrot.lane.b32.xlu1 %v510_v35, %s2713_s23 }
 0x131   : > { %v2979_v36 = vld [vmem:[#allocation4 + $0x10] sm:$0xff] }
 0x132   : > { %v512_v37 = vmul.f32 %v509_v34, %v2979_v36  ;;  %v492_v38 = vmul.f32 %v489_v21, %v2979_v36  ;;  %v552_v45 = vmul.f32 %v549_v42, %v2979_v36  ;;  %v532_v46 = vmul.f32 %v529_v39, %v2979_v36 }
 0x133   : > { %v592_v53 = vmul.f32 %v589_v50, %v2979_v36  ;;  %v572_v54 = vmul.f32 %v569_v47, %v2979_v36  ;;  %v646_v0 = vmul.f32 %v643_v61, %v2979_v36  ;;  %v626_v1 = vmul.f32 %v623_v58, %v2979_v36 }
 0x134   : > { %520 = vrot.lane.b32.xlu1 %v512_v37, %s2713_s23  ;;  %500 = vrot.lane.b32.xlu0 %v492_v38, %s2713_s23  ;;  %v686_v8 = vmul.f32 %v683_v5, %v2979_v36  ;;  %v666_v9 = vmul.f32 %v663_v2, %v2979_v36  ;;  %v726_v16 = vmul.f32 %v723_v13, %v2979_v36  ;;  %v817_v34 = vstv %s2380_s29  ;;  %s4413_s29 = smov 123  }
 0x135   : > { %v706_v18 = vmul.f32 %v703_v10, %v2979_v36  ;;  %v725_v21 = vmul.f32 %v723_v13, %v2967_v27  ;;  %v780_v29 = vmul.f32 %v777_v25, %v2979_v36  ;;  %v760_v30 = vmul.f32 %v757_v22, %v2979_v36 }
 0x136   : > { %v818_v35 = vmul.f32 %v817_v34, %v2955_v17  ;;  %v798_v37 = vmul.f32 %v797_v31, %v2955_v17  ;;  %v820_v38 = vmul.f32 %v817_v34, %v2979_v36  ;;  %v800_v39 = vmul.f32 %v797_v31, %v2979_v36 }
 0x137   : > { %v819_v42 = vmul.f32 %v817_v34, %v2967_v27  ;;  %v877_v50 = vstv %s2383_s6  ;;  %v973_v22 = vmul.f32 %v971_v19, %v2967_v27  ;;  %v1011_v34 = vstv %s2390_s8  ;;  %s2395_s6 = sld [smem:[#allocation6 + $0x28]]  ;;  %s2401_s8 = sld [smem:[#allocation6 + $0x22]] }
 0x138   : > { %538 = vrot.lane.b32.xlu1 %v531_v40, %s2713_s23  ;;  %518 = vrot.lane.b32.xlu0 %v511_v41, %s2713_s23  ;;  %v837_v40 = vstv %s2381_s5  ;;  %v878_v58 = vmul.f32 %v877_v50, %v2955_v17  ;;  %s2393_s5 = sld [smem:[#allocation6 + $0x1a]] }
 0x139   : > { %v839_v41 = vmul.f32 %v837_v40, %v2967_v27 }
 0x13c   : > { %556 = vrot.lane.b32.xlu1 %v550_v43, %s2713_s23  ;;  %536 = vrot.lane.b32.xlu0 %v530_v44, %s2713_s23  ;;  %v857_v43 = vstv %s2382_s4  ;;  %s2394_s4 = sld [smem:[#allocation6 + $0x21]] }
 0x13d   : > { %v858_v44 = vmul.f32 %v857_v43, %v2955_v17  ;;  %v860_v47 = vmul.f32 %v857_v43, %v2979_v36 }
 0x140   : > { %560 = vrot.lane.b32.xlu1 %v552_v45, %s2713_s23  ;;  %540 = vrot.lane.b32.xlu0 %v532_v46, %s2713_s23  ;;  %v838_v45 = vmul.f32 %v837_v40, %v2955_v17 }
 0x144   : > { %578 = vrot.lane.b32.xlu1 %v571_v48, %s2713_s23  ;;  %558 = vrot.lane.b32.xlu0 %v551_v49, %s2713_s23  ;;  %v840_v48 = vmul.f32 %v837_v40, %v2979_v36  ;;  %v1025_v40 = vstv %s2391_s24  ;;  %s2402_s24 = sld [smem:[#allocation6 + $0x29]] }
 0x148   : > { %596 = vrot.lane.b32.xlu1 %v590_v51, %s2713_s23  ;;  %576 = vrot.lane.b32.xlu0 %v570_v52, %s2713_s23  ;;  %v879_v52 = vmul.f32 %v877_v50, %v2967_v27 }
 0x14c   : > { %600 = vrot.lane.b32.xlu1 %v592_v53, %s2713_s23  ;;  %580 = vrot.lane.b32.xlu0 %v572_v54, %s2713_s23  ;;  %v859_v53 = vmul.f32 %v857_v43, %v2967_v27  ;;  %v891_v54 = vstv %s2384_s17  ;;  %v1027_v43 = vmul.f32 %v1025_v40, %v2967_v27  ;;  %s2396_s17 = sld [smem:[#allocation6 + $0x2f]] }
 0x150   : > { %616 = vrot.lane.b32.xlu1 %v611_v56, %s4419_s21  ;;  %598 = vrot.lane.b32.xlu0 %v591_v57, %s2713_s23  ;;  %v893_v57 = vmul.f32 %v891_v54, %v2967_v27 }
 0x154   : > { %632 = vrot.lane.b32.xlu1 %v625_v59, %s4419_s21  ;;  %614 = vrot.lane.b32.xlu0 %v610_v60, %s4419_s21  ;;  %v911_v59 = vstv %s2385_s19  ;;  %s2397_s19 = sld [smem:[#allocation6 + $0x6]] }
 0x155   : > { %v914_v2 = vmul.f32 %v911_v59, %v2979_v36 }
 0x158   : > { %650 = vrot.lane.b32.xlu1 %v644_v62, %s4419_s21  ;;  %630 = vrot.lane.b32.xlu0 %v624_v63, %s4419_s21  ;;  %v912_v62 = vmul.f32 %v911_v59, %v2955_v17  ;;  %v892_v63 = vmul.f32 %v891_v54, %v2955_v17 }
 0x15c   : > { %654 = vrot.lane.b32.xlu1 %v646_v0, %s4419_s21  ;;  %634 = vrot.lane.b32.xlu0 %v626_v1, %s4419_s21 }
 0x160   : > { %672 = vrot.lane.b32.xlu1 %v665_v3, %s4419_s21  ;;  %652 = vrot.lane.b32.xlu0 %v645_v4, %s4419_s21  ;;  %v894_v3 = vmul.f32 %v891_v54, %v2979_v36  ;;  %v931_v4 = vstv %s2386_s3  ;;  %s2398_s3 = sld [smem:[#allocation6 + $0xd]] }
 0x161   : > { %v932_v13 = vmul.f32 %v931_v4, %v2955_v17 }
 0x164   : > { %690 = vrot.lane.b32.xlu1 %v684_v6, %s4419_s21  ;;  %670 = vrot.lane.b32.xlu0 %v664_v7, %s4419_s21  ;;  %v933_v7 = vmul.f32 %v931_v4, %v2967_v27 }
 0x168   : > { %694 = vrot.lane.b32.xlu1 %v686_v8, %s4419_s21  ;;  %674 = vrot.lane.b32.xlu0 %v666_v9, %s4419_s21  ;;  %v913_v8 = vmul.f32 %v911_v59, %v2967_v27  ;;  %v951_v9 = vstv %s2387_s25  ;;  %v1065_v59 = vstv %s2393_s5  ;;  %s2399_s25 = sld [smem:[#allocation6 + $0x14]]  ;;  %s2411_s5 = sld [smem:[#allocation6 + $0x32]] }
 0x16c   : > { %712 = vrot.lane.b32.xlu1 %v705_v11, %s4419_s21  ;;  %692 = vrot.lane.b32.xlu0 %v685_v12, %s4419_s21  ;;  %v952_v12 = vmul.f32 %v951_v9, %v2955_v17 }
 0x170   : > { %730 = vrot.lane.b32.xlu1 %v724_v14, %s4419_s21  ;;  %710 = vrot.lane.b32.xlu0 %v704_v15, %s4419_s21 }
 0x174   : > { %734 = vrot.lane.b32.xlu1 %v726_v16, %s4419_s21  ;;  %714 = vrot.lane.b32.xlu0 %v706_v18, %s4419_s21  ;;  %v954_v16 = vmul.f32 %v951_v9, %v2979_v36  ;;  %v934_v18 = vmul.f32 %v931_v4, %v2979_v36  ;;  %v1085_v4 = vstv %s2394_s4  ;;  %s2412_s4 = sld [smem:[#allocation6 + $0x39]] }
 0x178   : > { %750 = vrot.lane.b32.xlu1 %v745_v20, %s4417_s27  ;;  %732 = vrot.lane.b32.xlu0 %v725_v21, %s4419_s21 }
 0x17c   : > { %766 = vrot.lane.b32.xlu1 %v759_v23, %s4417_s27  ;;  %748 = vrot.lane.b32.xlu0 %v744_v24, %s4417_s27  ;;  %v953_v23 = vmul.f32 %v951_v9, %v2967_v27  ;;  %v991_v24 = vstv %s2389_s16  ;;  %v1086_v9 = vmul.f32 %v1085_v4, %v2955_v17  ;;  %s2400_s16 = sld [smem:[#allocation6 + $0x1b]] }
 0x180   : > { %784 = vrot.lane.b32.xlu1 %v778_v26, %s4417_s27  ;;  %764 = vrot.lane.b32.xlu0 %v758_v28, %s4417_s27  ;;  %v992_v28 = vmul.f32 %v991_v24, %v2955_v17 }
 0x184   : > { %788 = vrot.lane.b32.xlu1 %v780_v29, %s4417_s27  ;;  %768 = vrot.lane.b32.xlu0 %v760_v30, %s4417_s27  ;;  %v972_v29 = vmul.f32 %v971_v19, %v2955_v17 }
 0x188   : > { %806 = vrot.lane.b32.xlu1 %v799_v32, %s4417_s27  ;;  %786 = vrot.lane.b32.xlu0 %v779_v33, %s4417_s27  ;;  %v994_v32 = vmul.f32 %v991_v24, %v2979_v36  ;;  %v974_v33 = vmul.f32 %v971_v19, %v2979_v36  ;;  %v1068_v19 = vmul.f32 %v1065_v59, %v2979_v36 }
 0x18c   : > { %824 = vrot.lane.b32.xlu1 %v818_v35, %s4417_s27  ;;  %804 = vrot.lane.b32.xlu0 %v798_v37, %s4417_s27 }
 0x18e   : > { %v3089_v49 = vpop.permute.xlu0 %480 }
 0x190   : > { %828 = vrot.lane.b32.xlu1 %v820_v38, %s4417_s27  ;;  %808 = vrot.lane.b32.xlu0 %v800_v39, %s4417_s27  ;;  %v1013_v38 = vmul.f32 %v1011_v34, %v2967_v27  ;;  %v993_v39 = vmul.f32 %v991_v24, %v2967_v27 }
 0x192   : > { %v3099_v55 = vpop.permute.xlu0 %496 }
 0x194   : > { %846 = vrot.lane.b32.xlu1 %v839_v41, %s4417_s27  ;;  %826 = vrot.lane.b32.xlu0 %v819_v42, %s4417_s27 }
 0x198   : > { %864 = vrot.lane.b32.xlu1 %v858_v44, %s4417_s27  ;;  %844 = vrot.lane.b32.xlu0 %v838_v45, %s4417_s27  ;;  %v1012_v44 = vmul.f32 %v1011_v34, %v2955_v17  ;;  %v1045_v45 = vstv %s2392_s28  ;;  %s2403_s28 = sld [smem:[#allocation6 + $0x30]] }
 0x199   : > { %v1046_v50 = vmul.f32 %v1045_v45, %v2955_v17 }
 0x19a   : > { %v3085_v46 = vpop.permute.xlu1 %482 }
 0x19c   : > { %868 = vrot.lane.b32.xlu1 %v860_v47, %s4417_s27  ;;  %848 = vrot.lane.b32.xlu0 %v840_v48, %s4417_s27 }
 0x19e   : > { %v3093_v51 = vpop.permute.xlu1 %498 }
 0x1a0   : > { %884 = vrot.lane.b32.xlu1 %v879_v52, %s4415_s30  ;;  %866 = vrot.lane.b32.xlu0 %v859_v53, %s4417_s27  ;;  %v1026_v52 = vmul.f32 %v1025_v40, %v2955_v17  ;;  %s3472_s27 = sld [smem:[#allocation6 + $0x31]] }
 0x1a2   : > { %v3101_v56 = vpop.permute.xlu1 %516 }
 0x1a4   : > { %900 = vrot.lane.b32.xlu1 %v893_v57, %s4415_s30  ;;  %882 = vrot.lane.b32.xlu0 %v878_v58, %s4415_s30  ;;  %v1048_v57 = vmul.f32 %v1045_v45, %v2979_v36  ;;  %v1028_v58 = vmul.f32 %v1025_v40, %v2979_v36 }
 0x1a6   : > { %v3107_v60 = vpop.permute.xlu1 %520  ;;  %v3109_v61 = vpop.permute.xlu0 %500 }
 0x1a8   : > { %918 = vrot.lane.b32.xlu1 %v912_v62, %s4415_s30  ;;  %898 = vrot.lane.b32.xlu0 %v892_v63, %s4415_s30 }
 0x1aa   : > { %v3115_v0 = vpop.permute.xlu1 %538  ;;  %v3117_v1 = vpop.permute.xlu0 %518 }
 0x1ab   : > { %4454 = vst [vmem:[#allocation19_spill] sm:$0xff] %v3117_v1 }
 0x1ac   : > { %922 = vrot.lane.b32.xlu1 %v914_v2, %s4415_s30  ;;  %902 = vrot.lane.b32.xlu0 %v894_v3, %s4415_s30  ;;  %v1067_v2 = vmul.f32 %v1065_v59, %v2967_v27  ;;  %v1047_v3 = vmul.f32 %v1045_v45, %v2967_v27 }
 0x1ae   : > { %v3123_v5 = vpop.permute.xlu1 %556  ;;  %v3125_v6 = vpop.permute.xlu0 %536 }
 0x1af   : > { %4455 = vst [vmem:[#allocation20_spill] sm:$0xff] %v3123_v5  ;;  %4456 = vst [vmem:[#allocation21_spill] sm:$0xff] %v3125_v6 }
 0x1b0   : > { %940 = vrot.lane.b32.xlu1 %v933_v7, %s4415_s30  ;;  %920 = vrot.lane.b32.xlu0 %v913_v8, %s4415_s30 }
 0x1b2   : > { %v3131_v10 = vpop.permute.xlu1 %560  ;;  %v3133_v11 = vpop.permute.xlu0 %540 }
 0x1b3   : > { %4457 = vst [vmem:[#allocation22_spill] sm:$0xff] %v3131_v10  ;;  %4458 = vst [vmem:[#allocation23_spill] sm:$0xff] %v3133_v11  ;;  %v3560_v11 = vstv %s3484_s26  ;;  %s2433_s26 = sld [smem:[#allocation6 + $0x3c]] }
 0x1b4   : > { %958 = vrot.lane.b32.xlu1 %v952_v12, %s4415_s30  ;;  %938 = vrot.lane.b32.xlu0 %v932_v13, %s4415_s30  ;;  %v1066_v12 = vmul.f32 %v1065_v59, %v2955_v17  ;;  %4521 = vst [vmem:[#allocation85_spill] sm:$0xff] %v3560_v11 }
 0x1b6   : > { %v3139_v14 = vpop.permute.xlu1 %578  ;;  %v3141_v15 = vpop.permute.xlu0 %558 }
 0x1b7   : > { %4459 = vst [vmem:[#allocation24_spill] sm:$0xff] %v3139_v14  ;;  %4460 = vst [vmem:[#allocation25_spill] sm:$0xff] %v3141_v15 }
 0x1b8   : > { %962 = vrot.lane.b32.xlu1 %v954_v16, %s4415_s30  ;;  %942 = vrot.lane.b32.xlu0 %v934_v18, %s4415_s30  ;;  %v1088_v18 = vmul.f32 %v1085_v4, %v2979_v36 }
 0x1ba   : > { %v3147_v20 = vpop.permute.xlu1 %596  ;;  %v3149_v21 = vpop.permute.xlu0 %576 }
 0x1bb   : > { %4461 = vst [vmem:[#allocation26_spill] sm:$0xff] %v3147_v20  ;;  %4462 = vst [vmem:[#allocation27_spill] sm:$0xff] %v3149_v21 }
 0x1bc   : > { %980 = vrot.lane.b32.xlu1 %v973_v22, %s4415_s30  ;;  %960 = vrot.lane.b32.xlu0 %v953_v23, %s4415_s30  ;;  %v1105_v22 = vstv %s2395_s6  ;;  %s2413_s6 = sld [smem:[#allocation6 + $0x40]] }
 0x1bd   : > { %v1108_v45 = vmul.f32 %v1105_v22, %v2979_v36 }
 0x1be   : > { %v3155_v25 = vpop.permute.xlu1 %600  ;;  %v3157_v26 = vpop.permute.xlu0 %580 }
 0x1bf   : > { %4463 = vst [vmem:[#allocation28_spill] sm:$0xff] %v3155_v25  ;;  %4464 = vst [vmem:[#allocation29_spill] sm:$0xff] %v3157_v26  ;;  %v3339_v26 = vld [vmem:[#allocation5] sm:$0xff]  ;;  %v3357_v25 = vld [vmem:[#allocation5 + $0x10] sm:$0xff] }
 0x1c0   : > { %998 = vrot.lane.b32.xlu1 %v992_v28, %s4415_s30  ;;  %978 = vrot.lane.b32.xlu0 %v972_v29, %s4415_s30  ;;  %v1107_v28 = vmul.f32 %v1105_v22, %v2967_v27  ;;  %v1087_v29 = vmul.f32 %v1085_v4, %v2967_v27  ;;  %4494 = vst [vmem:[#allocation59_spill] sm:$0xff] %v3339_v26 }
 0x1c2   : > { %v3163_v30 = vpop.permute.xlu1 %616  ;;  %v3165_v31 = vpop.permute.xlu0 %598 }
 0x1c3   : > { %4465 = vst [vmem:[#allocation30_spill] sm:$0xff] %v3165_v31 }
 0x1c4   : > { %1002 = vrot.lane.b32.xlu1 %v994_v32, %s4415_s30  ;;  %982 = vrot.lane.b32.xlu0 %v974_v33, %s4415_s30  ;;  %v1125_v32 = vstv %s2396_s17  ;;  %s2414_s17 = sld [smem:[#allocation6 + $0x47]] }
 0x1c5   : > { %v1127_v59 = vmul.f32 %v1125_v32, %v2967_v27 }
 0x1c6   : > { %v3171_v35 = vpop.permute.xlu1 %632  ;;  %v3173_v37 = vpop.permute.xlu0 %614 }
 0x1c8   : > { %1018 = vrot.lane.b32.xlu1 %v1013_v38, %s4413_s29  ;;  %1000 = vrot.lane.b32.xlu0 %v993_v39, %s4415_s30  ;;  %v1126_v38 = vmul.f32 %v1125_v32, %v2955_v17  ;;  %v1106_v39 = vmul.f32 %v1105_v22, %v2955_v17  ;;  %s3470_s30 = sld [smem:[#allocation6 + $0x50]] }
 0x1ca   : > { %v3179_v41 = vpop.permute.xlu1 %650  ;;  %v3181_v42 = vpop.permute.xlu0 %630 }
 0x1cc   : > { %1034 = vrot.lane.b32.xlu1 %v1027_v43, %s4413_s29  ;;  %1016 = vrot.lane.b32.xlu0 %v1012_v44, %s4413_s29  ;;  %v1128_v44 = vmul.f32 %v1125_v32, %v2979_v36 }
 0x1ce   : > { %v3187_v47 = vpop.permute.xlu1 %654  ;;  %v3189_v48 = vpop.permute.xlu0 %634 }
 0x1d0   : > { %1052 = vrot.lane.b32.xlu1 %v1046_v50, %s4413_s29  ;;  %1032 = vrot.lane.b32.xlu0 %v1026_v52, %s4413_s29  ;;  %v1145_v50 = vstv %s2397_s19  ;;  %s2415_s19 = sld [smem:[#allocation6 + $0x4e]] }
 0x1d2   : > { %v3195_v53 = vpop.permute.xlu1 %672  ;;  %v3197_v54 = vpop.permute.xlu0 %652 }
 0x1d3   : > { %4466 = vst [vmem:[#allocation31_spill] sm:$0xff] %v3195_v53  ;;  %4467 = vst [vmem:[#allocation32_spill] sm:$0xff] %v3197_v54 }
 0x1d4   : > { %1056 = vrot.lane.b32.xlu1 %v1048_v57, %s4413_s29  ;;  %1036 = vrot.lane.b32.xlu0 %v1028_v58, %s4413_s29  ;;  %v1147_v58 = vmul.f32 %v1145_v50, %v2967_v27 }
 0x1d6   : > { %v3203_v62 = vpop.permute.xlu1 %690  ;;  %v3205_v63 = vpop.permute.xlu0 %670 }
 0x1d7   : > { %4468 = vst [vmem:[#allocation33_spill] sm:$0xff] %v3203_v62  ;;  %4469 = vst [vmem:[#allocation34_spill] sm:$0xff] %v3205_v63 }
 0x1d8   : > { %1074 = vrot.lane.b32.xlu1 %v1067_v2, %s4413_s29  ;;  %1054 = vrot.lane.b32.xlu0 %v1047_v3, %s4413_s29  ;;  %v1159_v2 = vstv %s2398_s3  ;;  %s2416_s3 = sld [smem:[#allocation6 + $0x55]] }
 0x1da   : > { %v3211_v7 = vpop.permute.xlu1 %694  ;;  %v3213_v8 = vpop.permute.xlu0 %674 }
 0x1db   : > { %4470 = vst [vmem:[#allocation35_spill] sm:$0xff] %v3211_v7  ;;  %4471 = vst [vmem:[#allocation36_spill] sm:$0xff] %v3213_v8 }
 0x1dc   : > { %1092 = vrot.lane.b32.xlu1 %v1086_v9, %s4413_s29  ;;  %1072 = vrot.lane.b32.xlu0 %v1066_v12, %s4413_s29  ;;  %v1161_v9 = vmul.f32 %v1159_v2, %v2967_v27  ;;  %v1146_v12 = vmul.f32 %v1145_v50, %v2955_v17 }
 0x1de   : > { %v3219_v13 = vpop.permute.xlu1 %712  ;;  %v3221_v16 = vpop.permute.xlu0 %692 }
 0x1df   : > { %4472 = vst [vmem:[#allocation37_spill] sm:$0xff] %v3219_v13  ;;  %4473 = vst [vmem:[#allocation38_spill] sm:$0xff] %v3221_v16  ;;  %v1410_v13 = vstv %s2415_s19  ;;  %s3438_s19 = sld [smem:[#allocation6 + $0x23]] }
 0x1e0   : > { %1096 = vrot.lane.b32.xlu1 %v1088_v18, %s4413_s29  ;;  %1076 = vrot.lane.b32.xlu0 %v1068_v19, %s4413_s29  ;;  %v1179_v18 = vstv %s2399_s25  ;;  %s2417_s25 = sld [smem:[#allocation6 + $0x5c]] }
 0x1e2   : > { %v3227_v23 = vpop.permute.xlu1 %730  ;;  %v3229_v24 = vpop.permute.xlu0 %710 }
 0x1e3   : > { %4474 = vst [vmem:[#allocation39_spill] sm:$0xff] %v3227_v23  ;;  %4475 = vst [vmem:[#allocation40_spill] sm:$0xff] %v3229_v24  ;;  %v1370_v23 = vstv %s2413_s6  ;;  %s3434_s6 = sld [smem:[#allocation6 + $0x15]] }
 0x1e4   : > { %1114 = vrot.lane.b32.xlu1 %v1107_v28, %s4413_s29  ;;  %1094 = vrot.lane.b32.xlu0 %v1087_v29, %s4413_s29  ;;  %v1180_v28 = vmul.f32 %v1179_v18, %v2955_v17  ;;  %v1160_v29 = vmul.f32 %v1159_v2, %v2955_v17 }
 0x1e6   : > { %v3235_v33 = vpop.permute.xlu1 %734  ;;  %v3237_v34 = vpop.permute.xlu0 %714 }
 0x1e7   : > { %4476 = vst [vmem:[#allocation41_spill] sm:$0xff] %v3235_v33  ;;  %4477 = vst [vmem:[#allocation42_spill] sm:$0xff] %v3237_v34  ;;  %v1259_v33 = vstv %s2403_s28  ;;  %s3426_s28 = sld [smem:[#allocation6]] }
 0x1e8   : > { %1132 = vrot.lane.b32.xlu1 %v1126_v38, %s4413_s29  ;;  %1112 = vrot.lane.b32.xlu0 %v1106_v39, %s4413_s29  ;;  %v1182_v39 = vmul.f32 %v1179_v18, %v2979_v36 }
 0x1e9   : > { %v3500_v14 = vstv %s3434_s6  ;;  %s4641_s6 = smov 123  }
 0x1ea   : > { %v3243_v40 = vpop.permute.xlu1 %750  ;;  %v3245_v43 = vpop.permute.xlu0 %732 }
 0x1eb   : > { %4478 = vst [vmem:[#allocation43_spill] sm:$0xff] %v3245_v43  ;;  %v1239_v43 = vstv %s2402_s24  ;;  %s2420_s24 = sld [smem:[#allocation6 + $0x41]] }
 0x1ec   : > { %1136 = vrot.lane.b32.xlu1 %v1128_v44, %s4413_s29  ;;  %1116 = vrot.lane.b32.xlu0 %v1108_v45, %s4413_s29  ;;  %v1162_v44 = vmul.f32 %v1159_v2, %v2979_v36  ;;  %v1199_v45 = vstv %s2400_s16  ;;  %s3401_s16 = sld [smem:[#allocation6 + $0x33]] }
 0x1ee   : > { %v3251_v52 = vpop.permute.xlu1 %766  ;;  %v3253_v57 = vpop.permute.xlu0 %748 }
 0x1f0   : > { %1152 = vrot.lane.b32.xlu1 %v1147_v58, %s4411_s7  ;;  %1134 = vrot.lane.b32.xlu0 %v1127_v59, %s4413_s29  ;;  %v1201_v59 = vmul.f32 %v1199_v45, %v2967_v27  ;;  %s3460_s29 = sld [smem:[#allocation6 + $0x42]] }
 0x1f2   : > { %v3259_v3 = vpop.permute.xlu1 %784  ;;  %v3261_v4 = vpop.permute.xlu0 %764 }
 0x1f4   : > { %1168 = vrot.lane.b32.xlu1 %v1161_v9, %s4411_s7  ;;  %1150 = vrot.lane.b32.xlu0 %v1146_v12, %s4411_s7  ;;  %v1181_v9 = vmul.f32 %v1179_v18, %v2967_v27  ;;  %v1219_v12 = vstv %s2401_s8  ;;  %s2419_s8 = sld [smem:[#allocation6 + $0x3a]] }
 0x1f6   : > { %v3267_v19 = vpop.permute.xlu1 %788  ;;  %v3269_v22 = vpop.permute.xlu0 %768  ;;  %v3533_v62 = vstv %s3460_s29  ;;  %s2437_s29 = sld [smem:[#allocation6 + $0x58]] }
 0x1f7   : > { %4479 = vst [vmem:[#allocation44_spill] sm:$0xff] %v3267_v19  ;;  %4480 = vst [vmem:[#allocation45_spill] sm:$0xff] %v3269_v22  ;;  %v3581_v53 = vmul.f32 %v3533_v62, %v3339_v26 }
 0x1f8   : > { %1186 = vrot.lane.b32.xlu1 %v1180_v28, %s4411_s7  ;;  %1166 = vrot.lane.b32.xlu0 %v1160_v29, %s4411_s7  ;;  %v1220_v29 = vmul.f32 %v1219_v12, %v2955_v17 }
 0x1f9   : > { %4526 = vst [vmem:[#allocation89_spill] sm:$0xff] %v3581_v53  ;;  %v4535_v53 = vstv %s3426_s28 }
 0x1fa   : > { %v3275_v32 = vpop.permute.xlu1 %806  ;;  %v3277_v38 = vpop.permute.xlu0 %786 }
 0x1fb   : > { %4481 = vst [vmem:[#allocation46_spill] sm:$0xff] %v3275_v32  ;;  %4482 = vst [vmem:[#allocation47_spill] sm:$0xff] %v3277_v38  ;;  %v3557_v32 = vstv %s3482_s13  ;;  %s3878_s13 = sld [smem:[#allocation6 + $0x5e]] }
 0x1fc   : > { %1190 = vrot.lane.b32.xlu1 %v1182_v39, %s4411_s7  ;;  %1170 = vrot.lane.b32.xlu0 %v1162_v44, %s4411_s7  ;;  %v1200_v39 = vmul.f32 %v1199_v45, %v2955_v17  ;;  %4520 = vst [vmem:[#allocation84_spill] sm:$0xff] %v3557_v32 }
 0x1fe   : > { %v3283_v50 = vpop.permute.xlu1 %824  ;;  %v3285_v58 = vpop.permute.xlu0 %804 }
 0x1ff   : > { %4483 = vst [vmem:[#allocation48_spill] sm:$0xff] %v3283_v50  ;;  %4484 = vst [vmem:[#allocation49_spill] sm:$0xff] %v3285_v58 }
 0x200   : > { %1208 = vrot.lane.b32.xlu1 %v1201_v59, %s4411_s7  ;;  %1188 = vrot.lane.b32.xlu0 %v1181_v9, %s4411_s7  ;;  %v1222_v59 = vmul.f32 %v1219_v12, %v2979_v36  ;;  %v1202_v9 = vmul.f32 %v1199_v45, %v2979_v36 }
 0x202   : > { %v3291_v2 = vpop.permute.xlu1 %828  ;;  %v3293_v28 = vpop.permute.xlu0 %808 }
 0x203   : > { %4485 = vst [vmem:[#allocation50_spill] sm:$0xff] %v3291_v2  ;;  %4486 = vst [vmem:[#allocation51_spill] sm:$0xff] %v3293_v28 }
 0x204   : > { %1226 = vrot.lane.b32.xlu1 %v1220_v29, %s4411_s7  ;;  %1206 = vrot.lane.b32.xlu0 %v1200_v39, %s4411_s7  ;;  %v1241_v29 = vmul.f32 %v1239_v43, %v2967_v27  ;;  %v1221_v39 = vmul.f32 %v1219_v12, %v2967_v27 }
 0x206   : > { %v3299_v18 = vpop.permute.xlu1 %846  ;;  %v3301_v44 = vpop.permute.xlu0 %826 }
 0x207   : > { %4487 = vst [vmem:[#allocation52_spill] sm:$0xff] %v3299_v18  ;;  %4488 = vst [vmem:[#allocation53_spill] sm:$0xff] %v3301_v44  ;;  %v1390_v18 = vstv %s2414_s17  ;;  %s3436_s17 = sld [smem:[#allocation6 + $0x1c]] }
 0x208   : > { %1230 = vrot.lane.b32.xlu1 %v1222_v59, %s4411_s7  ;;  %1210 = vrot.lane.b32.xlu0 %v1202_v9, %s4411_s7  ;;  %v1260_v9 = vmul.f32 %v1259_v33, %v2955_v17  ;;  %v1391_v20 = vmul.f32 %v1390_v18, %v3339_v26 }
 0x20a   : > { %v3307_v31 = vpop.permute.xlu1 %864  ;;  %v3309_v34 = vpop.permute.xlu0 %844 }
 0x20b   : > { %4489 = vst [vmem:[#allocation54_spill] sm:$0xff] %v3307_v31  ;;  %4490 = vst [vmem:[#allocation55_spill] sm:$0xff] %v3309_v34  ;;  %v1240_v31 = vmul.f32 %v1239_v43, %v2955_v17  ;;  %v1336_v17 = vstv %s2411_s5  ;;  %s3428_s5 = sld [smem:[#allocation6 + $0x7]] }
 0x20c   : > { %1248 = vrot.lane.b32.xlu1 %v1241_v29, %s4411_s7  ;;  %1228 = vrot.lane.b32.xlu0 %v1221_v39, %s4411_s7  ;;  %v1262_v29 = vmul.f32 %v1259_v33, %v2979_v36  ;;  %v1242_v39 = vmul.f32 %v1239_v43, %v2979_v36  ;;  %v1350_v36 = vstv %s2412_s4  ;;  %v1337_v24 = vmul.f32 %v1336_v17, %v3339_v26  ;;  %s3430_s4 = sld [smem:[#allocation6 + $0xe]] }
 0x20d   : > { %v1353_v44 = vmul.f32 %v1350_v36, %v3357_v25  ;;  %v3503_v58 = vstv %s3436_s17  ;;  %s2445_s17 = sld [smem:[#allocation6 + $0x60]] }
 0x20e   : > { %v3315_v45 = vpop.permute.xlu1 %868  ;;  %v3317_v59 = vpop.permute.xlu0 %848 }
 0x20f   : > { %4491 = vst [vmem:[#allocation56_spill] sm:$0xff] %v3315_v45  ;;  %4492 = vst [vmem:[#allocation57_spill] sm:$0xff] %v3317_v59  ;;  %v3329_v45 = vld [vmem:[#allocation5 + $0x8] sm:$0xff] }
 0x210   : > { %1266 = vrot.lane.b32.xlu1 %v1260_v9, %s4411_s7  ;;  %1246 = vrot.lane.b32.xlu0 %v1240_v31, %s4411_s7  ;;  %v1338_v59 = vmul.f32 %v1336_v17, %v3329_v45 }
 0x211   : > { %v3494_v8 = vstv %s3428_s5  ;;  %s2444_s5 = sld [smem:[#allocation6 + $0x59]] }
 0x212   : > { %v3323_v12 = vpop.permute.xlu1 %884  ;;  %v3325_v34 = vpop.permute.xlu0 %866  ;;  %v3497_v7 = vstv %s3430_s4  ;;  %s2436_s4 = sld [smem:[#allocation6 + $0x51]] }
 0x213   : > { %4493 = vst [vmem:[#allocation58_spill] sm:$0xff] %v3325_v34  ;;  %v1261_v34 = vmul.f32 %v1259_v33, %v2967_v27 }
 0x214   : > { %1270 = vrot.lane.b32.xlu1 %v1262_v29, %s4411_s7  ;;  %1250 = vrot.lane.b32.xlu0 %v1242_v39, %s4411_s7  ;;  %v1352_v39 = vmul.f32 %v1350_v36, %v3329_v45 }
 0x216   : > { %v3333_v9 = vpop.permute.xlu1 %900  ;;  %v3335_v31 = vpop.permute.xlu0 %882 }
 0x218   : > { %1343 = vrot.lane.b32.xlu1 %v1338_v59, %s2713_s23  ;;  %1268 = vrot.lane.b32.xlu0 %v1261_v34, %s4411_s7  ;;  %v1371_v34 = vmul.f32 %v1370_v23, %v3339_v26  ;;  %v1351_v59 = vmul.f32 %v1350_v36, %v3339_v26  ;;  %s3458_s7 = sld [smem:[#allocation6 + $0x3b]] }
 0x21a   : > { %v3343_v43 = vpop.permute.xlu1 %918  ;;  %v3345_v29 = vpop.permute.xlu0 %898 }
 0x21c   : > { %1359 = vrot.lane.b32.xlu1 %v1352_v39, %s2713_s23  ;;  %1341 = vrot.lane.b32.xlu0 %v1337_v24, %s2713_s23  ;;  %v1373_v24 = vmul.f32 %v1370_v23, %v3357_v25 }
 0x21e   : > { %v3351_v27 = vpop.permute.xlu1 %922  ;;  %v3353_v33 = vpop.permute.xlu0 %902  ;;  %v3530_v63 = vstv %s3458_s7  ;;  %s2438_s7 = sld [smem:[#allocation6 + $0x5f]] }
 0x21f   : > { %4495 = vst [vmem:[#allocation60_spill] sm:$0xff] %v3351_v27  ;;  %4496 = vst [vmem:[#allocation61_spill] sm:$0xff] %v3353_v33 }
 0x220   : > { %1377 = vrot.lane.b32.xlu1 %v1371_v34, %s2713_s23  ;;  %1357 = vrot.lane.b32.xlu0 %v1351_v59, %s2713_s23  ;;  %v1392_v34 = vmul.f32 %v1390_v18, %v3329_v45  ;;  %v1372_v59 = vmul.f32 %v1370_v23, %v3329_v45 }
 0x222   : > { %v3361_v17 = vpop.permute.xlu1 %940  ;;  %v3363_v39 = vpop.permute.xlu0 %920 }
 0x223   : > { %4497 = vst [vmem:[#allocation62_spill] sm:$0xff] %v3361_v17  ;;  %4498 = vst [vmem:[#allocation63_spill] sm:$0xff] %v3363_v39 }
 0x224   : > { %1381 = vrot.lane.b32.xlu1 %v1373_v24, %s2713_s23  ;;  %1361 = vrot.lane.b32.xlu0 %v1353_v44, %s2713_s23  ;;  %v1411_v44 = vmul.f32 %v1410_v13, %v3339_v26 }
 0x226   : > { %v3369_v21 = vpop.permute.xlu1 %958  ;;  %v3371_v16 = vpop.permute.xlu0 %938 }
 0x227   : > { %4499 = vst [vmem:[#allocation64_spill] sm:$0xff] %v3369_v21  ;;  %4500 = vst [vmem:[#allocation65_spill] sm:$0xff] %v3371_v16 }
 0x228   : > { %1399 = vrot.lane.b32.xlu1 %v1392_v34, %s2713_s23  ;;  %1379 = vrot.lane.b32.xlu0 %v1372_v59, %s2713_s23  ;;  %v1413_v34 = vmul.f32 %v1410_v13, %v3357_v25  ;;  %v1393_v59 = vmul.f32 %v1390_v18, %v3357_v25 }
 0x22a   : > { %v3377_v36 = vpop.permute.xlu1 %962  ;;  %v3379_v24 = vpop.permute.xlu0 %942 }
 0x22b   : > { %4501 = vst [vmem:[#allocation66_spill] sm:$0xff] %v3377_v36  ;;  %4502 = vst [vmem:[#allocation67_spill] sm:$0xff] %v3379_v24  ;;  %v1430_v24 = vstv %s2416_s3  ;;  %s3446_s3 = sld [smem:[#allocation6 + $0x48]] }
 0x22c   : > { %1417 = vrot.lane.b32.xlu1 %v1411_v44, %s2713_s23  ;;  %1397 = vrot.lane.b32.xlu0 %v1391_v20, %s2713_s23  ;;  %v1432_v44 = vmul.f32 %v1430_v24, %v3329_v45  ;;  %v1412_v20 = vmul.f32 %v1410_v13, %v3329_v45 }
 0x22e   : > { %v3385_v23 = vpop.permute.xlu1 %980  ;;  %v3387_v28 = vpop.permute.xlu0 %960 }
 0x22f   : > { %4503 = vst [vmem:[#allocation68_spill] sm:$0xff] %v3385_v23  ;;  %4504 = vst [vmem:[#allocation69_spill] sm:$0xff] %v3387_v28  ;;  %v1450_v23 = vstv %s2417_s25  ;;  %s3448_s25 = sld [smem:[#allocation6 + $0x4f]] }
 0x230   : > { %1421 = vrot.lane.b32.xlu1 %v1413_v34, %s2713_s23  ;;  %1401 = vrot.lane.b32.xlu0 %v1393_v59, %s2713_s23  ;;  %v1451_v59 = vmul.f32 %v1450_v23, %v3339_v26  ;;  %v1452_v28 = vmul.f32 %v1450_v23, %v3329_v45 }
 0x232   : > { %v3393_v36 = vpop.permute.xlu1 %998  ;;  %v3395_v2 = vpop.permute.xlu0 %978 }
 0x233   : > { %4505 = vst [vmem:[#allocation70_spill] sm:$0xff] %v3393_v36  ;;  %4506 = vst [vmem:[#allocation71_spill] sm:$0xff] %v3395_v2  ;;  %v1431_v2 = vmul.f32 %v1430_v24, %v3339_v26  ;;  %v1433_v36 = vmul.f32 %v1430_v24, %v3357_v25 }
 0x234   : > { %1439 = vrot.lane.b32.xlu1 %v1432_v44, %s2713_s23  ;;  %1419 = vrot.lane.b32.xlu0 %v1412_v20, %s2713_s23  ;;  %v1453_v20 = vmul.f32 %v1450_v23, %v3357_v25 }
 0x236   : > { %v3403_v18 = vpop.permute.xlu1 %1002  ;;  %v3405_v34 = vpop.permute.xlu0 %982 }
 0x237   : > { %4507 = vst [vmem:[#allocation72_spill] sm:$0xff] %v3403_v18  ;;  %4508 = vst [vmem:[#allocation73_spill] sm:$0xff] %v3405_v34  ;;  %v1470_v34 = vstv %s3401_s16  ;;  %s3454_s16 = sld [smem:[#allocation6 + $0x5d]] }
 0x238   : > { %1457 = vrot.lane.b32.xlu1 %v1451_v59, %s2713_s23  ;;  %1437 = vrot.lane.b32.xlu0 %v1431_v2, %s2713_s23  ;;  %v1472_v2 = vmul.f32 %v1470_v34, %v3329_v45 }
 0x23a   : > { %v3411_v13 = vpop.permute.xlu1 %1018  ;;  %v3413_v44 = vpop.permute.xlu0 %1000 }
 0x23b   : > { %4509 = vst [vmem:[#allocation74_spill] sm:$0xff] %v3413_v44  ;;  %v1471_v44 = vmul.f32 %v1470_v34, %v3339_v26 }
 0x23c   : > { %1461 = vrot.lane.b32.xlu1 %v1453_v20, %s2713_s23  ;;  %1441 = vrot.lane.b32.xlu0 %v1433_v36, %s2713_s23  ;;  %v1484_v36 = vstv %s2419_s8  ;;  %s3456_s8 = sld [smem:[#allocation6 + $0x34]] }
 0x23d   : > { %v1486_v20 = vmul.f32 %v1484_v36, %v3329_v45  ;;  %v1485_v16 = vmul.f32 %v1484_v36, %v3339_v26  ;;  %v3520_v50 = vstv %s3454_s16  ;;  %s2441_s16 = sld [smem:[#allocation6 + $0x44]] }
 0x23e   : > { %v3420_v18 = vpop.permute.xlu1 %1034  ;;  %v3422_v59 = vpop.permute.xlu0 %1016 }
 0x240   : > { %1477 = vrot.lane.b32.xlu1 %v1472_v2, %s4419_s21  ;;  %1459 = vrot.lane.b32.xlu0 %v1452_v28, %s2713_s23  ;;  %v1504_v2 = vstv %s2420_s24  ;;  %s3450_s23 = sld [smem:[#allocation6 + $0x56]]  ;;  %s3468_s24 = sld [smem:[#allocation6 + $0x49]] }
 0x241   : > { %v1505_v15 = vmul.f32 %v1504_v2, %v3339_v26 }
 0x242   : > { %v3440_v24 = vpop.permute.xlu1 %1052  ;;  %v3442_v23 = vpop.permute.xlu0 %1032  ;;  %v4524_v27 = vstv %s3456_s8 }
 0x243   : > { %4510 = vst [vmem:[#allocation75_spill] sm:$0xff] %v3440_v24  ;;  %4511 = vst [vmem:[#allocation76_spill] sm:$0xff] %v3442_v23  ;;  %v3577_v54 = vmul.f32 %v4524_v27, %v3339_v26  ;;  %v4530_v23 = vstv %s3472_s27 }
 0x244   : > { %1493 = vrot.lane.b32.xlu1 %v1486_v20, %s4419_s21  ;;  %1475 = vrot.lane.b32.xlu0 %v1471_v44, %s4419_s21  ;;  %s3474_s21 = sld [smem:[#allocation6 + $0x38]]  ;;  %v3506_v44 = vstv %s3438_s19  ;;  %v3598_v27 = vmul.f32 %v4530_v23, %v3339_v26  ;;  %v2563_v23 = vld [vmem:[#allocation4] sm:$0xff]  ;;  %s2449_s19 = sld [smem:[#allocation6 + $0x4c]] }
 0x245   : > { %4525 = vst [vmem:[#allocation88_spill] sm:$0xff] %v3577_v54  ;;  %v470_v54 = vstv %s3508_s11  ;;  %v451_v24 = vmul.f32 %v2563_v23, %v3497_v7  ;;  %s3851_s11 = sld [smem:[#allocation6 + $0x54]] }
 0x246   : > { %v3462_v28 = vpop.permute.xlu1 %1056  ;;  %v3464_v34 = vpop.permute.xlu0 %1036  ;;  %v3536_v10 = vstv %s3468_s24  ;;  %4531 = vst [vmem:[#allocation93_spill] sm:$0xff] %v3598_v27  ;;  %v442_v27 = vmul.f32 %v2563_v23, %v4535_v53  ;;  %s2452_s24 = sld [smem:[#allocation6 + $0x61]] }
 0x247   : > { %4512 = vst [vmem:[#allocation77_spill] sm:$0xff] %v3462_v28  ;;  %4513 = vst [vmem:[#allocation78_spill] sm:$0xff] %v3464_v34  ;;  %v3539_v34 = vstv %s3470_s30  ;;  %v3593_v5 = vmul.f32 %v3536_v10, %v3339_v26  ;;  %s2435_s30 = sld [smem:[#allocation6 + $0x4a]] }
 0x248   : > { %1511 = vrot.lane.b32.xlu1 %v1505_v15, %s4514_s0  ;;  %1491 = vrot.lane.b32.xlu0 %v1485_v16, %s4514_s0  ;;  %v1507_v15 = vmul.f32 %v1504_v2, %v3357_v25  ;;  %v1487_v16 = vmul.f32 %v1484_v36, %v3357_v25  ;;  %v1524_v36 = vstv %s3446_s3  ;;  %s2451_s3 = sld [smem:[#allocation6 + $0x5a]] }
 0x249   : > { %v1525_v38 = vmul.f32 %v1524_v36, %v3339_v26  ;;  %4529 = vst [vmem:[#allocation92_spill] sm:$0xff] %v3593_v5  ;;  %v3613_v5 = vmul.f32 %v3557_v32, %v3339_v26  ;;  %v1527_v22 = vmul.f32 %v1524_v36, %v3357_v25 }
 0x24a   : > { %v3487_v20 = vpop.permute.xlu1 %1074  ;;  %v3489_v21 = vpop.permute.xlu0 %1054  ;;  %v3543_v28 = vstv %s3474_s21  ;;  %s2434_s21 = sld [smem:[#allocation6 + $0x43]] }
 0x24b   : > { %4515 = vst [vmem:[#allocation79_spill] sm:$0xff] %v3487_v20  ;;  %4516 = vst [vmem:[#allocation80_spill] sm:$0xff] %v3489_v21  ;;  %v3514_v21 = vstv %s3448_s25  ;;  %v3517_v20 = vstv %s3450_s23  ;;  %s2440_s25 = sld [smem:[#allocation6 + $0x3d]]  ;;  %s4642_s23 = smov 122  }
 0x24c   : > { %1515 = vrot.lane.b32.xlu1 %v1507_v15, %s4514_s0  ;;  %1495 = vrot.lane.b32.xlu0 %v1487_v16, %s4514_s0  ;;  %v1526_v15 = vmul.f32 %v1524_v36, %v3329_v45  ;;  %v1506_v16 = vmul.f32 %v1504_v2, %v3329_v45  ;;  %v3551_v2 = vstv %s3480_s22  ;;  %v3572_v33 = vmul.f32 %v3517_v20, %v3339_v26  ;;  %s3946_s22 = sld [smem:[#allocation6 + $0x35]] }
 0x24d   : > { %4519 = vst [vmem:[#allocation83_spill] sm:$0xff] %v3551_v2  ;;  %4534 = vst [vmem:[#allocation96_spill] sm:$0xff] %v3613_v5  ;;  %v1547_v53 = vmul.f32 %v3514_v21, %v3357_v25 }
 0x24e   : > { %v3523_v39 = vpop.permute.xlu1 %1092  ;;  %v3525_v17 = vpop.permute.xlu0 %1072 }
 0x24f   : > { %4517 = vst [vmem:[#allocation81_spill] sm:$0xff] %v3523_v39  ;;  %4518 = vst [vmem:[#allocation82_spill] sm:$0xff] %v3525_v17  ;;  %v3548_v17 = vstv %s3478_s1  ;;  %v1545_v39 = vmul.f32 %v3514_v21, %v3339_v26  ;;  %s4554_s1 = smov 125  }
 0x250   : > { %1533 = vrot.lane.b32.xlu1 %v1526_v15, %s4514_s0  ;;  %1513 = vrot.lane.b32.xlu0 %v1506_v16, %s4514_s0  ;;  %v3568_v16 = vmul.f32 %v3520_v50, %v3339_v26 }
 0x252   : > { %v3562_v6 = vpop.permute.xlu1 %1096  ;;  %v3564_v15 = vpop.permute.xlu0 %1076 }
 0x253   : > { %4522 = vst [vmem:[#allocation86_spill] sm:$0xff] %v3562_v6  ;;  %4523 = vst [vmem:[#allocation87_spill] sm:$0xff] %v3564_v15  ;;  %v3585_v15 = vmul.f32 %v3530_v63, %v3339_v26  ;;  %v3589_v6 = vmul.f32 %v3539_v34, %v3339_v26 }
 0x254   : > { %1551 = vrot.lane.b32.xlu1 %v1545_v39, %s4514_s0  ;;  %1531 = vrot.lane.b32.xlu0 %v1525_v38, %s4514_s0  ;;  %v446_v39 = vmul.f32 %v2563_v23, %v3494_v8  ;;  %v3620_v38 = vmul.f32 %v3551_v2, %v3339_v26  ;;  %v2564_v2 = vld [vmem:[#allocation4 + $0x8] sm:$0xff] }
 0x255   : > { %4527 = vst [vmem:[#allocation90_spill] sm:$0xff] %v3585_v15  ;;  %4528 = vst [vmem:[#allocation91_spill] sm:$0xff] %v3589_v6  ;;  %v3605_v15 = vmul.f32 %v3548_v17, %v3339_v26  ;;  %v3609_v6 = vmul.f32 %v3543_v28, %v3339_v26 }
 0x256   : > { %4536 = vst [vmem:[#allocation97_spill] sm:$0xff] %v3620_v38  ;;  %v3630_v32 = vpop.permute.xlu1 %1114  ;;  %v3632_v5 = vpop.permute.xlu0 %1094  ;;  %v4541_v38 = vstv %s3426_s28  ;;  %s2442_s28 = sld [smem:[#allocation6 + $0x4b]] }
 0x257   : > { %4532 = vst [vmem:[#allocation94_spill] sm:$0xff] %v3605_v15  ;;  %4533 = vst [vmem:[#allocation95_spill] sm:$0xff] %v3609_v6  ;;  %v3624_v15 = vmul.f32 %v3560_v11, %v3339_v26  ;;  %v3628_v6 = vmul.f32 %v2563_v23, %v3503_v58  ;;  %v443_v19 = vmul.f32 %v2564_v2, %v4541_v38 }
 0x258   : > { %4539 = vst [vmem:[#allocation100_spill] sm:$0xff] %v3630_v32  ;;  %4540 = vst [vmem:[#allocation101_spill] sm:$0xff] %v3632_v5  ;;  %v3640_v11 = vmul.f32 %v2563_v23, %v3500_v14  ;;  %v3645_v26 = vmul.f32 %v2563_v23, %v3506_v44  ;;  %v447_v32 = vmul.f32 %v2564_v2, %v3494_v8  ;;  %1555 = vrot.lane.b32.xlu1 %v1547_v53, %s4514_s0 }
 0x259   : > { %4537 = vst [vmem:[#allocation98_spill] sm:$0xff] %v3624_v15  ;;  %4538 = vst [vmem:[#allocation99_spill] sm:$0xff] %v3628_v6  ;;  %v3642_v15 = vmul.f32 %v2563_v23, %v470_v54  ;;  %v3649_v5 = vmul.f32 %v2564_v2, %v3500_v14  ;;  %v3652_v6 = vmul.f32 %v2564_v2, %v3497_v7  ;;  %1535 = vrot.lane.b32.xlu0 %v1527_v22, %s4514_s0 }
 0x25a   : > { %4542 = vst [vmem:[#allocation102_spill] sm:$0xff] %v3640_v11  ;;  %4544 = vst [vmem:[#allocation104_spill] sm:$0xff] %v3645_v26  ;;  %v487_v36 = vadd.f32 %v3085_v46, %v443_v19  ;;  %v3658_v38 = vmul.f32 %v2564_v2, %v3506_v44  ;;  %v3661_v23 = vmul.f32 %v2564_v2, %v3503_v58  ;;  %v3669_v53 = vpop.permute.xlu0 %1112 }
 0x25b   : > { %4543 = vst [vmem:[#allocation103_spill] sm:$0xff] %v3642_v15  ;;  %4545 = vst [vmem:[#allocation105_spill] sm:$0xff] %v3652_v6  ;;  %v3663_v26 = vmul.f32 %v2564_v2, %v470_v54  ;;  %v2565_v15 = vld [vmem:[#allocation4 + $0x10] sm:$0xff]  ;;  %v3667_v6 = vpop.permute.xlu1 %1132  ;;  %v1566_v46 = vmul.f32 %v3517_v20, %v3329_v45  ;;  %v1546_v19 = vmul.f32 %v3514_v21, %v3329_v45 }
 0x25c   : > { %v453_v11 = vmul.f32 %v2565_v15, %v3497_v7  ;;  %v448_v1 = vmul.f32 %v2565_v15, %v3494_v8  ;;  %4546 = vst [vmem:[#allocation106_spill] sm:$0xff] %v3667_v6  ;;  %4547 = vst [vmem:[#allocation107_spill] sm:$0xff] %v3669_v53  ;;  %v3676_v22 = vmul.f32 %v2565_v15, %v3503_v58 }
 0x25d   : > { %v3679_v2 = vmul.f32 %v2565_v15, %v3500_v14  ;;  %v3681_v7 = vmul.f32 %v2565_v15, %v470_v54  ;;  %v621_v8 = vadd.f32 %v3163_v30, %v487_v36  ;;  %v3685_v6 = vmul.f32 %v2565_v15, %v3506_v44  ;;  %1573 = vrot.lane.b32.xlu1 %v1566_v46, %s4514_s0 }
 0x25e   : > { %1553 = vrot.lane.b32.xlu0 %v1546_v19, %s4514_s0  ;;  %v1587_v21 = vmul.f32 %v3520_v50, %v3357_v25  ;;  %v1567_v58 = vmul.f32 %v3517_v20, %v3357_v25  ;;  %v486_v14 = vadd.f32 %v3089_v49, %v442_v27  ;;  %v506_v54 = vadd.f32 %v3093_v51, %v447_v32  ;;  %v3701_v36 = vpop.permute.xlu0 %1116 }
 0x25f   : > { %v755_v53 = vadd.f32 %v3243_v40, %v621_v8  ;;  %v4548_v30 = vstv %s3456_s8  ;;  %v3699_v15 = vpop.permute.xlu1 %1136  ;;  %v1586_v46 = vmul.f32 %v3520_v50, %v3329_v45  ;;  %v3707_v19 = vmul.f32 %v3530_v63, %v3329_v45  ;;  %s2443_s8 = sld [smem:[#allocation6 + $0x52]] }
 0x260   : > { %v1606_v44 = vmul.f32 %v4548_v30, %v3329_v45  ;;  %v3711_v49 = vmul.f32 %v3533_v62, %v3357_v25  ;;  %v3715_v51 = vmul.f32 %v3530_v63, %v3357_v25  ;;  %v640_v40 = vadd.f32 %v3171_v35, %v506_v54 }
 0x261   : > { %v620_v32 = vadd.f32 %v3173_v37, %v486_v14  ;;  %v889_v20 = vadd.f32 %v3323_v12, %v755_v53  ;;  %v3722_v50 = vmul.f32 %v3536_v10, %v3329_v45  ;;  %v525_v27 = vadd.f32 %v3101_v56, %v451_v24  ;;  %1591 = vrot.lane.b32.xlu1 %v3568_v16, %s4514_s0 }
 0x262   : > { %1571 = vrot.lane.b32.xlu0 %v3572_v33, %s4514_s0  ;;  %v3731_v35 = vmul.f32 %v3533_v62, %v3329_v45  ;;  %v3735_v37 = vmul.f32 %v3539_v34, %v3357_v25  ;;  %v505_v63 = vadd.f32 %v3099_v55, %v446_v39  ;;  %v774_v12 = vadd.f32 %v3251_v52, %v640_v40  ;;  %v3742_v33 = vpop.permute.xlu0 %1134 }
 0x263   : > { %v754_v56 = vadd.f32 %v3253_v57, %v620_v32  ;;  %v1023_v24 = vadd.f32 %v3411_v13, %v889_v20  ;;  %v659_v16 = vadd.f32 %v3179_v41, %v525_v27  ;;  %v1153_v53 = vpop.permute.xlu1 %1152  ;;  %v3746_v62 = vmul.f32 %v3536_v10, %v3357_v25  ;;  %v4551_v32 = vld [vmem:[#allocation19_spill] sm:$0xff]  ;;  %v4552_v27 = vld [vmem:[#allocation44_spill] sm:$0xff] }
 0x264   : > { %v4549_v8 = vstv %s3472_s27  ;;  %v1290_v55 = vmul.f32 %v3543_v28, %v3329_v45  ;;  %v639_v52 = vadd.f32 %v3181_v42, %v505_v63  ;;  %v908_v57 = vadd.f32 %v3333_v9, %v774_v12  ;;  %v4556_v12 = vld [vmem:[#allocation76_spill] sm:$0xff]  ;;  %s4640_s27 = smov 124  }
 0x265   : > { %v1284_v14 = vmul.f32 %v4549_v8, %v3329_v45  ;;  %v888_v13 = vadd.f32 %v3335_v31, %v754_v56  ;;  %v1157_v41 = vadd.f32 %v1153_v53, %v1023_v24  ;;  %v527_v39 = vadd.f32 %v3107_v60, %v453_v11  ;;  %1595 = vrot.lane.b32.xlu1 %v1587_v21, %s4514_s0  ;;  %v4559_v53 = vld [vmem:[#allocation20_spill] sm:$0xff] }
 0x266   : > { %v507_v54 = vadd.f32 %v3109_v61, %v448_v1  ;;  %v793_v10 = vadd.f32 %v3259_v3, %v659_v16  ;;  %1575 = vrot.lane.b32.xlu0 %v1567_v58, %s4514_s0  ;;  %v773_v30 = vadd.f32 %v3261_v4, %v639_v52  ;;  %v1042_v40 = vadd.f32 %v3420_v18, %v908_v57  ;;  %v1151_v11 = vpop.permute.xlu0 %1150  ;;  %v4550_v58 = vld [vmem:[#allocation105_spill] sm:$0xff]  ;;  %v4558_v16 = vld [vmem:[#allocation99_spill] sm:$0xff]  ;;  %v4561_v57 = vld [vmem:[#allocation32_spill] sm:$0xff] }
 0x267   : > { %v1022_v42 = vadd.f32 %v3422_v59, %v888_v13  ;;  %v3764_v9 = vadd.f32 %v1284_v14, %v1157_v41  ;;  %v546_v31 = vadd.f32 %v3115_v0, %v3649_v5  ;;  %v661_v60 = vadd.f32 %v3187_v47, %v527_v39  ;;  %v1169_v1 = vpop.permute.xlu1 %1168  ;;  %v4553_v5 = vld [vmem:[#allocation45_spill] sm:$0xff]  ;;  %v4560_v14 = vld [vmem:[#allocation31_spill] sm:$0xff]  ;;  %v4562_v39 = vld [vmem:[#allocation60_spill] sm:$0xff] }
 0x268   : > { %v641_v61 = vadd.f32 %v3189_v48, %v507_v54  ;;  %v1299_v3 = vmul.f32 %v3548_v17, %v3357_v25  ;;  %v927_v4 = vadd.f32 %v3343_v43, %v793_v10  ;;  %v907_v18 = vadd.f32 %v3345_v29, %v773_v30  ;;  %v4555_v48 = vld [vmem:[#allocation75_spill] sm:$0xff]  ;;  %v4557_v29 = vld [vmem:[#allocation93_spill] sm:$0xff] }
 0x269   : > { %v1176_v21 = vadd.f32 %v1169_v1, %v1042_v40  ;;  %v1156_v59 = vadd.f32 %v1151_v11, %v1022_v42  ;;  %v526_v20 = vadd.f32 %v4551_v32, %v4550_v58  ;;  %v795_v0 = vadd.f32 %v4552_v27, %v661_v60  ;;  %1611 = vrot.lane.b32.xlu1 %v1606_v44, %s4554_s1  ;;  %v4563_v10 = vld [vmem:[#allocation61_spill] sm:$0xff]  ;;  %v4564_v42 = vld [vmem:[#allocation102_spill] sm:$0xff]  ;;  %v4572_v27 = vld [vmem:[#allocation95_spill] sm:$0xff] }
 0x26a   : > { %v775_v47 = vadd.f32 %v4553_v5, %v641_v61  ;;  %1593 = vrot.lane.b32.xlu0 %v1586_v46, %s4514_s0  ;;  %v1061_v63 = vadd.f32 %v4555_v48, %v927_v4  ;;  %v1041_v56 = vadd.f32 %v4556_v12, %v907_v18  ;;  %v565_v8 = vadd.f32 %v4559_v53, %v4558_v16  ;;  %v1167_v44 = vpop.permute.xlu0 %1166  ;;  %v4565_v60 = vld [vmem:[#allocation21_spill] sm:$0xff]  ;;  %v4566_v1 = vld [vmem:[#allocation46_spill] sm:$0xff]  ;;  %v4567_v4 = vld [vmem:[#allocation47_spill] sm:$0xff]  ;;  %s3827_s0 = sld [smem:[#allocation6 + $0x57]] }
 0x26b   : > { %v3782_v43 = vadd.f32 %v1290_v55, %v1176_v21  ;;  %v3785_v24 = vadd.f32 %v4557_v29, %v1156_v59  ;;  %v680_v52 = vadd.f32 %v4560_v14, %v546_v31  ;;  %v660_v13 = vadd.f32 %v4561_v57, %v526_v20  ;;  %v1187_v41 = vpop.permute.xlu1 %1186  ;;  %v4568_v18 = vld [vmem:[#allocation88_spill] sm:$0xff]  ;;  %v4570_v59 = vld [vmem:[#allocation78_spill] sm:$0xff]  ;;  %v4574_v48 = vld [vmem:[#allocation33_spill] sm:$0xff] }
 0x26c   : > { %v1291_v46 = vmul.f32 %v3543_v28, %v3357_v25  ;;  %v929_v54 = vadd.f32 %v4562_v39, %v795_v0  ;;  %v909_v55 = vadd.f32 %v4563_v10, %v775_v47  ;;  %v1195_v30 = vadd.f32 %v1187_v41, %v1061_v63  ;;  %v4569_v28 = vld [vmem:[#allocation77_spill] sm:$0xff]  ;;  %v4571_v32 = vld [vmem:[#allocation94_spill] sm:$0xff]  ;;  %v4576_v16 = vld [vmem:[#allocation83_spill] sm:$0xff] }
 0x26d   : > { %v1175_v40 = vadd.f32 %v1167_v44, %v1041_v56  ;;  %v545_v61 = vadd.f32 %v4565_v60, %v4564_v42  ;;  %v814_v11 = vadd.f32 %v4566_v1, %v680_v52  ;;  %v794_v31 = vadd.f32 %v4567_v4, %v660_v13  ;;  %1627 = vrot.lane.b32.xlu1 %v3707_v19, %s4554_s1  ;;  %v4573_v5 = vld [vmem:[#allocation22_spill] sm:$0xff]  ;;  %v4578_v57 = vld [vmem:[#allocation63_spill] sm:$0xff]  ;;  %v4580_v10 = vld [vmem:[#allocation48_spill] sm:$0xff] }
 0x26e   : > { %1609 = vrot.lane.b32.xlu0 %v4568_v18, %s4554_s1  ;;  %v1063_v21 = vadd.f32 %v4569_v28, %v929_v54  ;;  %v1043_v58 = vadd.f32 %v4570_v59, %v909_v55  ;;  %v3806_v20 = vadd.f32 %v4571_v32, %v1195_v30  ;;  %v567_v47 = vadd.f32 %v4573_v5, %v3676_v22  ;;  %v4575_v12 = vld [vmem:[#allocation34_spill] sm:$0xff]  ;;  %v1171_v29 = vpop.permute.xlu0 %1170  ;;  %v4579_v39 = vld [vmem:[#allocation23_spill] sm:$0xff]  ;;  %v4581_v55 = vld [vmem:[#allocation49_spill] sm:$0xff] }
 0x26f   : > { %v3809_v0 = vadd.f32 %v4572_v27, %v1175_v40  ;;  %v699_v63 = vadd.f32 %v4574_v48, %v565_v8  ;;  %v679_v19 = vadd.f32 %v4575_v12, %v545_v61  ;;  %v1191_v56 = vpop.permute.xlu1 %1190  ;;  %v1306_v53 = vmul.f32 %v4576_v16, %v3329_v45  ;;  %v4577_v14 = vld [vmem:[#allocation62_spill] sm:$0xff]  ;;  %v4582_v30 = vld [vmem:[#allocation89_spill] sm:$0xff]  ;;  %v4584_v42 = vld [vmem:[#allocation79_spill] sm:$0xff] }
 0x270   : > { %v948_v52 = vadd.f32 %v4577_v14, %v814_v11  ;;  %v928_v13 = vadd.f32 %v4578_v57, %v794_v31  ;;  %v1197_v41 = vadd.f32 %v1191_v56, %v1063_v21  ;;  %v1177_v44 = vadd.f32 %v1171_v29, %v1043_v58  ;;  %v4583_v40 = vld [vmem:[#allocation90_spill] sm:$0xff]  ;;  %v4585_v61 = vld [vmem:[#allocation80_spill] sm:$0xff]  ;;  %v4587_v18 = vld [vmem:[#allocation35_spill] sm:$0xff] }
 0x271   : > { %v547_v54 = vadd.f32 %v4579_v39, %v3679_v2  ;;  %v833_v22 = vadd.f32 %v4580_v10, %v699_v63  ;;  %v813_v8 = vadd.f32 %v4581_v55, %v679_v19  ;;  %1645 = vrot.lane.b32.xlu1 %v4582_v30, %s4554_s1  ;;  %v4586_v2 = vld [vmem:[#allocation24_spill] sm:$0xff]  ;;  %v701_v28 = vadd.f32 %v4587_v18, %v567_v47  ;;  %v4590_v63 = vld [vmem:[#allocation65_spill] sm:$0xff]  ;;  %v4592_v29 = vld [vmem:[#allocation50_spill] sm:$0xff] }
 0x272   : > { %1625 = vrot.lane.b32.xlu0 %v4583_v40, %s4554_s1  ;;  %v1082_v60 = vadd.f32 %v4584_v42, %v948_v52  ;;  %v1062_v1 = vadd.f32 %v4585_v61, %v928_v13  ;;  %v3831_v11 = vadd.f32 %v1299_v3, %v1197_v41  ;;  %v3833_v4 = vadd.f32 %v1291_v46, %v1177_v44  ;;  %v4588_v21 = vld [vmem:[#allocation36_spill] sm:$0xff]  ;;  %v1189_v32 = vpop.permute.xlu0 %1188  ;;  %v4591_v46 = vld [vmem:[#allocation25_spill] sm:$0xff]  ;;  %v4593_v14 = vld [vmem:[#allocation51_spill] sm:$0xff] }
 0x273   : > { %v586_v31 = vadd.f32 %v4586_v2, %v3658_v38  ;;  %v681_v59 = vadd.f32 %v4588_v21, %v547_v54  ;;  %v1209_v58 = vpop.permute.xlu1 %1208  ;;  %v1298_v27 = vmul.f32 %v3548_v17, %v3329_v45  ;;  %v4589_v5 = vld [vmem:[#allocation64_spill] sm:$0xff]  ;;  %v947_v12 = vadd.f32 %v4590_v63, %v813_v8  ;;  %v4594_v17 = vld [vmem:[#allocation81_spill] sm:$0xff]  ;;  %v4595_v57 = vld [vmem:[#allocation82_spill] sm:$0xff] }
 0x274   : > { %v967_v48 = vadd.f32 %v4589_v5, %v833_v22  ;;  %v1216_v3 = vadd.f32 %v1209_v58, %v1082_v60  ;;  %v1196_v19 = vadd.f32 %v1189_v32, %v1062_v1  ;;  %v566_v56 = vadd.f32 %v4591_v46, %v3661_v23  ;;  %v4596_v23 = vld [vmem:[#allocation103_spill] sm:$0xff]  ;;  %v4597_v39 = vld [vmem:[#allocation26_spill] sm:$0xff]  ;;  %v4598_v10 = vld [vmem:[#allocation37_spill] sm:$0xff] }
 0x275   : > { %v835_v38 = vadd.f32 %v4592_v29, %v701_v28  ;;  %v815_v47 = vadd.f32 %v4593_v14, %v681_v59  ;;  %1649 = vrot.lane.b32.xlu1 %v3711_v49, %s4554_s1  ;;  %v1081_v13 = vadd.f32 %v4595_v57, %v947_v12  ;;  %v605_v54 = vadd.f32 %v4597_v39, %v4596_v23  ;;  %v4599_v49 = vld [vmem:[#allocation38_spill] sm:$0xff]  ;;  %v4600_v30 = vld [vmem:[#allocation84_spill] sm:$0xff]  ;;  %v4602_v61 = vld [vmem:[#allocation67_spill] sm:$0xff] }
 0x276   : > { %1629 = vrot.lane.b32.xlu0 %v3715_v51, %s4554_s1  ;;  %v1101_v52 = vadd.f32 %v4594_v17, %v967_v48  ;;  %v3855_v41 = vadd.f32 %v1306_v53, %v1216_v3  ;;  %v3857_v44 = vadd.f32 %v1298_v27, %v1196_v19  ;;  %v720_v22 = vadd.f32 %v4598_v10, %v586_v31  ;;  %v1207_v51 = vpop.permute.xlu0 %1206  ;;  %v4601_v42 = vld [vmem:[#allocation66_spill] sm:$0xff]  ;;  %v4603_v18 = vld [vmem:[#allocation104_spill] sm:$0xff]  ;;  %v4604_v28 = vld [vmem:[#allocation27_spill] sm:$0xff] }
 0x277   : > { %v700_v55 = vadd.f32 %v4599_v49, %v566_v56  ;;  %v1227_v8 = vpop.permute.xlu1 %1226  ;;  %v1315_v40 = vmul.f32 %v4600_v30, %v3357_v25  ;;  %v969_v60 = vadd.f32 %v4601_v42, %v835_v38  ;;  %v949_v53 = vadd.f32 %v4602_v61, %v815_v47  ;;  %v4605_v59 = vld [vmem:[#allocation52_spill] sm:$0xff]  ;;  %v4606_v32 = vld [vmem:[#allocation53_spill] sm:$0xff]  ;;  %v4607_v5 = vld [vmem:[#allocation86_spill] sm:$0xff] }
 0x278   : > { %v1235_v1 = vadd.f32 %v1227_v8, %v1101_v52  ;;  %v1215_v2 = vadd.f32 %v1207_v51, %v1081_v13  ;;  %v585_v21 = vadd.f32 %v4604_v28, %v4603_v18  ;;  %v854_v58 = vadd.f32 %v4605_v59, %v720_v22  ;;  %v4608_v63 = vld [vmem:[#allocation87_spill] sm:$0xff]  ;;  %v4609_v3 = vld [vmem:[#allocation96_spill] sm:$0xff]  ;;  %v4610_v46 = vld [vmem:[#allocation97_spill] sm:$0xff] }
 0x279   : > { %v834_v31 = vadd.f32 %v4606_v32, %v700_v55  ;;  %1667 = vrot.lane.b32.xlu1 %v3722_v50, %s4554_s1  ;;  %v3876_v27 = vstv %s3827_s0  ;;  %v1103_v48 = vadd.f32 %v4607_v5, %v969_v60  ;;  %v1083_v12 = vadd.f32 %v4608_v63, %v949_v53  ;;  %v4611_v29 = vld [vmem:[#allocation28_spill] sm:$0xff]  ;;  %v4612_v38 = vld [vmem:[#allocation39_spill] sm:$0xff]  ;;  %v4615_v39 = vld [vmem:[#allocation69_spill] sm:$0xff]  ;;  %s2448_s0 = sld [smem:[#allocation6 + $0x45]] }
 0x27a   : > { %1647 = vrot.lane.b32.xlu0 %v3731_v35, %s4554_s1  ;;  %v3883_v19 = vadd.f32 %v4609_v3, %v1235_v1  ;;  %v3886_v56 = vadd.f32 %v4610_v46, %v1215_v2  ;;  %v607_v50 = vadd.f32 %v4611_v29, %v3681_v7  ;;  %v739_v35 = vadd.f32 %v4612_v38, %v605_v54  ;;  %v4613_v14 = vld [vmem:[#allocation40_spill] sm:$0xff]  ;;  %v1211_v52 = vpop.permute.xlu0 %1210  ;;  %v4616_v55 = vld [vmem:[#allocation29_spill] sm:$0xff]  ;;  %v4617_v51 = vld [vmem:[#allocation54_spill] sm:$0xff] }
 0x27b   : > { %v719_v47 = vadd.f32 %v4613_v14, %v585_v21  ;;  %v1231_v17 = vpop.permute.xlu1 %1230  ;;  %v1307_v57 = vmul.f32 %v4576_v16, %v3357_v25  ;;  %v4614_v13 = vld [vmem:[#allocation68_spill] sm:$0xff]  ;;  %v968_v10 = vadd.f32 %v4615_v39, %v834_v31  ;;  %v1217_v49 = vadd.f32 %v1211_v52, %v1083_v12  ;;  %v4618_v42 = vld [vmem:[#allocation55_spill] sm:$0xff]  ;;  %v4622_v2 = vld [vmem:[#allocation101_spill] sm:$0xff] }
 0x27c   : > { %v988_v23 = vadd.f32 %v4614_v13, %v854_v58  ;;  %v1237_v22 = vadd.f32 %v1231_v17, %v1103_v48  ;;  %v587_v8 = vadd.f32 %v4616_v55, %v3685_v6  ;;  %v873_v7 = vadd.f32 %v4617_v51, %v739_v35  ;;  %v4619_v60 = vld [vmem:[#allocation91_spill] sm:$0xff]  ;;  %v4620_v61 = vld [vmem:[#allocation92_spill] sm:$0xff]  ;;  %v4623_v6 = vld [vmem:[#allocation41_spill] sm:$0xff] }
 0x27d   : > { %v853_v54 = vadd.f32 %v4618_v42, %v719_v47  ;;  %1685 = vrot.lane.b32.xlu1 %v4619_v60, %s4554_s1  ;;  %v1320_v16 = vstv %s3851_s11  ;;  %v4621_v53 = vld [vmem:[#allocation100_spill] sm:$0xff]  ;;  %v1102_v18 = vadd.f32 %v4622_v2, %v968_v10  ;;  %v3909_v21 = vadd.f32 %v1307_v57, %v1217_v49  ;;  %v4624_v58 = vld [vmem:[#allocation42_spill] sm:$0xff]  ;;  %v4626_v46 = vld [vmem:[#allocation71_spill] sm:$0xff]  ;;  %s2450_s11 = sld [smem:[#allocation6 + $0x53]] }
 0x27e   : > { %1665 = vrot.lane.b32.xlu0 %v4620_v61, %s4554_s1  ;;  %v1122_v1 = vadd.f32 %v4621_v53, %v988_v23  ;;  %v3907_v28 = vadd.f32 %v1315_v40, %v1237_v22  ;;  %v741_v59 = vadd.f32 %v4623_v6, %v607_v50  ;;  %v721_v32 = vadd.f32 %v4624_v58, %v587_v8  ;;  %v1229_v5 = vpop.permute.xlu0 %1228  ;;  %v4625_v12 = vld [vmem:[#allocation70_spill] sm:$0xff]  ;;  %v4628_v47 = vld [vmem:[#allocation56_spill] sm:$0xff]  ;;  %v4629_v17 = vld [vmem:[#allocation57_spill] sm:$0xff] }
 0x27f   : > { %v1249_v31 = vpop.permute.xlu1 %1248  ;;  %v1322_v48 = vmul.f32 %v1320_v16, %v3329_v45  ;;  %v1314_v63 = vmul.f32 %v4600_v30, %v3329_v45  ;;  %v1007_v3 = vadd.f32 %v4625_v12, %v873_v7  ;;  %v987_v29 = vadd.f32 %v4626_v46, %v853_v54  ;;  %v4627_v35 = vld [vmem:[#allocation30_spill] sm:$0xff]  ;;  %v4631_v23 = vld [vmem:[#allocation107_spill] sm:$0xff]  ;;  %v4634_v42 = vld [vmem:[#allocation72_spill] sm:$0xff] }
 0x280   : > { %v1256_v40 = vadd.f32 %v1249_v31, %v1122_v1  ;;  %v1236_v38 = vadd.f32 %v1229_v5, %v1102_v18  ;;  %v606_v14 = vadd.f32 %v4627_v35, %v3663_v26  ;;  %v875_v50 = vadd.f32 %v4628_v47, %v741_v59  ;;  %v4630_v57 = vld [vmem:[#allocation106_spill] sm:$0xff]  ;;  %v4632_v26 = vld [vmem:[#allocation43_spill] sm:$0xff]  ;;  %v4635_v60 = vld [vmem:[#allocation73_spill] sm:$0xff] }
 0x281   : > { %v855_v52 = vadd.f32 %v4629_v17, %v721_v32  ;;  %1689 = vrot.lane.b32.xlu1 %v3735_v37, %s4554_s1  ;;  %v1718_v30 = vstv %s3878_s13  ;;  %v1141_v13 = vadd.f32 %v4630_v57, %v1007_v3  ;;  %v1121_v39 = vadd.f32 %v4631_v23, %v987_v29  ;;  %v4636_v2 = vld [vmem:[#allocation58_spill] sm:$0xff]  ;;  %v4638_v12 = vld [vmem:[#allocation85_spill] sm:$0xff]  ;;  %s4246_s13 = sld [smem:[#allocation6 + $0x36]] }
 0x282   : > { %1669 = vrot.lane.b32.xlu0 %v3746_v62, %s4554_s1  ;;  %v3929_v10 = vadd.f32 %v1322_v48, %v1256_v40  ;;  %v3931_v22 = vadd.f32 %v1314_v63, %v1236_v38  ;;  %v740_v49 = vadd.f32 %v4632_v26, %v606_v14  ;;  %v1247_v8 = vpop.permute.xlu0 %1246  ;;  %v1700_v51 = vmul.f32 %v3876_v27, %v3329_v45  ;;  %v4633_v62 = vld [vmem:[#allocation59_spill] sm:$0xff] }
 0x283   : > { %v1267_v55 = vpop.permute.xlu1 %1266  ;;  %v1680_v37 = vmul.f32 %v3539_v34, %v3329_v45  ;;  %v1321_v7 = vmul.f32 %v1320_v16, %v4633_v62  ;;  %v1009_v54 = vadd.f32 %v4634_v42, %v875_v50  ;;  %v989_v61 = vadd.f32 %v4635_v60, %v855_v52  ;;  %v4637_v34 = vld [vmem:[#allocation98_spill] sm:$0xff] }
 0x284   : > { %v1275_v53 = vadd.f32 %v1267_v55, %v1141_v13  ;;  %v1255_v1 = vadd.f32 %v1247_v8, %v1121_v39  ;;  %v874_v18 = vadd.f32 %v4636_v2, %v740_v49  ;;  %v1719_v48 = vmul.f32 %v1718_v30, %v4633_v62 }
 0x285   : > { %1707 = vrot.lane.b32.xlu1 %v1700_v51, %s4554_s1  ;;  %v1143_v6 = vadd.f32 %v3699_v15, %v1009_v54  ;;  %v1123_v59 = vadd.f32 %v3701_v36, %v989_v61  ;;  %v1699_v63 = vmul.f32 %v3876_v27, %v4633_v62  ;;  %v1331_v3 = vmul.f32 %v4638_v12, %v3357_v25  ;;  %v4639_v15 = vld [vmem:[#allocation74_spill] sm:$0xff] }
 0x286   : > { %1687 = vrot.lane.b32.xlu0 %v1680_v37, %s4554_s1  ;;  %v3949_v58 = vadd.f32 %v4637_v34, %v1275_v53  ;;  %v3951_v32 = vadd.f32 %v1321_v7, %v1255_v1  ;;  %v1251_v5 = vpop.permute.xlu0 %1250  ;;  %v1008_v46 = vadd.f32 %v4639_v15, %v874_v18  ;;  %v1323_v40 = vmul.f32 %v1320_v16, %v3357_v25 }
 0x287   : > { %v1271_v31 = vpop.permute.xlu1 %1270  ;;  %v1257_v29 = vadd.f32 %v1251_v5, %v1123_v59  ;;  %v1721_v17 = vmul.f32 %v1718_v30, %v3357_v25  ;;  %v1701_v16 = vmul.f32 %v3876_v27, %v3357_v25  ;;  %v1330_v57 = vmul.f32 %v4638_v12, %v3329_v45 }
 0x288   : > { %v1277_v36 = vadd.f32 %v1271_v31, %v1143_v6  ;;  %v1142_v38 = vadd.f32 %v3742_v33, %v1008_v46  ;;  %v1738_v33 = vstv %s3946_s22  ;;  %v1720_v27 = vmul.f32 %v1718_v30, %v3329_v45  ;;  %s2446_s22 = sld [smem:[#allocation6 + $0x37]] }
 0x289   : > { %1725 = vrot.lane.b32.xlu1 %v1719_v48, %s4554_s1  ;;  %v3965_v14 = vadd.f32 %v1323_v40, %v1257_v29  ;;  %v1740_v26 = vmul.f32 %v1738_v33, %v3329_v45  ;;  %v1752_v49 = vstv %s2433_s26  ;;  %v1739_v37 = vmul.f32 %v1738_v33, %v4633_v62  ;;  %s2355_s26 = sshll.u32 %s2902_s18, 4 }
 0x28a   : > { %1705 = vrot.lane.b32.xlu0 %v1699_v63, %s4554_s1  ;;  %v3963_v35 = vadd.f32 %v1331_v3, %v1277_v36  ;;  %v1269_v50 = vpop.permute.xlu0 %1268  ;;  %v1754_v51 = vmul.f32 %v1752_v49, %v3329_v45  ;;  %v1772_v7 = vstv %s2434_s21  ;;  %v1753_v60 = vmul.f32 %v1752_v49, %v4633_v62  ;;  %s2461_s21 = sshll.u32 %s2690_s12, 8  ;;  %s2719_s12 = smov [#allocation11]  }
 0x28b   : > { %v3967_v47 = vpop.permute.xlu1 %1343  ;;  %v1276_v52 = vadd.f32 %v1269_v50, %v1142_v38  ;;  %v1773_v54 = vmul.f32 %v1772_v7, %v4633_v62  ;;  %v1775_v1 = vmul.f32 %v1772_v7, %v3357_v25  ;;  %v1755_v2 = vmul.f32 %v1752_v49, %v3357_v25 }
 0x28c   : > { %v1792_v18 = vstv %s2435_s30  ;;  %v1774_v31 = vmul.f32 %v1772_v7, %v3329_v45  ;;  %v1832_v5 = vstv %s2437_s29  ;;  %v1852_v40 = vstv %s2438_s7 }
 0x28d   : > { %1729 = vrot.lane.b32.xlu1 %v1721_v17, %s4554_s1  ;;  %v3977_v13 = vadd.f32 %v1330_v57, %v1276_v52  ;;  %v1794_v34 = vmul.f32 %v1792_v18, %v3329_v45  ;;  %v1833_v12 = vmul.f32 %v1832_v5, %v4633_v62  ;;  %v1793_v3 = vmul.f32 %v1792_v18, %v4633_v62 }
 0x28e   : > { %1709 = vrot.lane.b32.xlu0 %v1701_v16, %s4554_s1  ;;  %v3981_v39 = vpop.permute.xlu0 %1341  ;;  %v1835_v36 = vmul.f32 %v1832_v5, %v3357_v25  ;;  %v1795_v29 = vmul.f32 %v1792_v18, %v3357_v25  ;;  %v1854_v17 = vmul.f32 %v1852_v40, %v3329_v45  ;;  %v1834_v16 = vmul.f32 %v1832_v5, %v3329_v45 }
 0x28f   : > { %v3979_v23 = vpop.permute.xlu1 %1359  ;;  %v1926_v52 = vstv %s2442_s28  ;;  %v1966_v7 = vstv %s2444_s5  ;;  %s4353_s28 = scalar_lea.hbm %s4406_s2, %s2461_s21  ;;  %s2235_s5 = scalar_lea.sflag [#allocation8], %s2902_s18 }
 0x291   : > { %1745 = vrot.lane.b32.xlu1 %v1740_v26, %s4640_s27  ;;  %v1927_v26 = vmul.f32 %v1926_v52, %v4633_v62 }
 0x292   : > { %1727 = vrot.lane.b32.xlu0 %v1720_v27, %s4554_s1  ;;  %v3989_v8 = vpop.permute.xlu0 %1357  ;;  %v1853_v27 = vmul.f32 %v1852_v40, %v4633_v62  ;;  %v1367_v62 = vadd.f32 %v3979_v23, %v3782_v43  ;;  %s2447_s1 = sld [smem:[#allocation6 + $0x3e]] }
 0x293   : > { %v3987_v55 = vpop.permute.xlu1 %1377  ;;  %v1366_v23 = vadd.f32 %v3989_v8, %v3809_v0 }
 0x294   : > { %v1386_v43 = vadd.f32 %v3987_v55, %v3806_v20 }
 0x295   : > { %1761 = vrot.lane.b32.xlu1 %v1754_v51, %s4640_s27  ;;  %v1929_v51 = vmul.f32 %v1926_v52, %v3357_v25 }
 0x296   : > { %1743 = vrot.lane.b32.xlu0 %v1739_v37, %s4640_s27  ;;  %v3997_v42 = vpop.permute.xlu0 %1361  ;;  %v1855_v37 = vmul.f32 %v1852_v40, %v3357_v25 }
 0x297   : > { %v3995_v30 = vpop.permute.xlu1 %1381  ;;  %v1368_v0 = vadd.f32 %v3997_v42, %v3833_v4 }
 0x298   : > { %v1388_v20 = vadd.f32 %v3995_v30, %v3831_v11  ;;  %v1986_v30 = vstv %s2445_s17 }
 0x299   : > { %1779 = vrot.lane.b32.xlu1 %v1773_v54, %s4640_s27 }
 0x29a   : > { %1759 = vrot.lane.b32.xlu0 %v1753_v60, %s4640_s27  ;;  %v4005_v53 = vpop.permute.xlu0 %1379 }
 0x29b   : > { %v4003_v61 = vpop.permute.xlu1 %1399  ;;  %v1387_v4 = vadd.f32 %v4005_v53, %v3857_v44 }
 0x29c   : > { %v1407_v11 = vadd.f32 %v4003_v61, %v3855_v41 }
 0x29d   : > { %1783 = vrot.lane.b32.xlu1 %v1775_v1, %s4640_s27  ;;  %v4063_v1 = vld [vmem:[#allocation5 + $0x8] sm:$0xff] }
 0x29e   : > { %1763 = vrot.lane.b32.xlu0 %v1755_v2, %s4640_s27  ;;  %v4013_v59 = vpop.permute.xlu0 %1397  ;;  %v1968_v2 = vmul.f32 %v4063_v1, %v1966_v7  ;;  %v1928_v18 = vmul.f32 %v4063_v1, %v1926_v52  ;;  %v1969_v52 = vmul.f32 %v1966_v7, %v3357_v25 }
 0x29f   : > { %v4011_v6 = vpop.permute.xlu1 %1417  ;;  %v1406_v44 = vadd.f32 %v4013_v59, %v3886_v56 }
 0x2a0   : > { %v1426_v41 = vadd.f32 %v4011_v6, %v3883_v19 }
 0x2a1   : > { %1801 = vrot.lane.b32.xlu1 %v1794_v34, %s4640_s27 }
 0x2a2   : > { %1781 = vrot.lane.b32.xlu0 %v1774_v31, %s4640_s27  ;;  %v4021_v63 = vpop.permute.xlu0 %1401  ;;  %v1812_v31 = vstv %s2436_s4 }
 0x2a3   : > { %v4019_v48 = vpop.permute.xlu1 %1421  ;;  %v1408_v56 = vadd.f32 %v4021_v63, %v3909_v21 }
 0x2a4   : > { %v1428_v19 = vadd.f32 %v4019_v48, %v3907_v28  ;;  %v2100_v48 = vstv %s2451_s3 }
 0x2a5   : > { %1839 = vrot.lane.b32.xlu1 %v1833_v12, %s4640_s27 }
 0x2a6   : > { %1799 = vrot.lane.b32.xlu0 %v1793_v3, %s4640_s27  ;;  %v4029_v46 = vpop.permute.xlu0 %1419  ;;  %v4075_v3 = vld [vmem:[#allocation5] sm:$0xff] }
 0x2a7   : > { %v4027_v15 = vpop.permute.xlu1 %1439  ;;  %v1427_v21 = vadd.f32 %v4029_v46, %v3931_v22 }
 0x2a8   : > { %v1447_v28 = vadd.f32 %v4027_v15, %v3929_v10 }
 0x2a9   : > { %1843 = vrot.lane.b32.xlu1 %v1835_v36, %s4640_s27  ;;  %v1813_v36 = vmul.f32 %v4075_v3, %v1812_v31 }
 0x2aa   : > { %1803 = vrot.lane.b32.xlu0 %v1795_v29, %s4640_s27  ;;  %v4037_v50 = vpop.permute.xlu0 %1437  ;;  %v1967_v29 = vmul.f32 %v4075_v3, %v1966_v7 }
 0x2ab   : > { %v4035_v38 = vpop.permute.xlu1 %1457  ;;  %v1446_v22 = vadd.f32 %v4037_v50, %v3951_v32 }
 0x2ac   : > { %v1466_v10 = vadd.f32 %v4035_v38, %v3949_v58 }
 0x2ad   : > { %1861 = vrot.lane.b32.xlu1 %v1854_v17, %s4640_s27 }
 0x2ae   : > { %1841 = vrot.lane.b32.xlu0 %v1834_v16, %s4640_s27  ;;  %v4045_v33 = vpop.permute.xlu0 %1441  ;;  %v1815_v16 = vmul.f32 %v1812_v31, %v3357_v25  ;;  %v1814_v25 = vmul.f32 %v4063_v1, %v1812_v31 }
 0x2af   : > { %v4043_v57 = vpop.permute.xlu1 %1461  ;;  %v1448_v32 = vadd.f32 %v4045_v33, %v3965_v14 }
 0x2b0   : > { %v1468_v58 = vadd.f32 %v4043_v57, %v3963_v35  ;;  %v1906_v57 = vstv %s2441_s16 }
 0x2b1   : > { %1933 = vrot.lane.b32.xlu1 %v1927_v26, %s4641_s6 }
 0x2b2   : > { %1859 = vrot.lane.b32.xlu0 %v1853_v27, %s4640_s27  ;;  %v4053_v49 = vpop.permute.xlu0 %1459 }
 0x2b3   : > { %v4051_v45 = vpop.permute.xlu1 %1477  ;;  %v1467_v14 = vadd.f32 %v4053_v49, %v3977_v13 }
 0x2b5   : > { %1937 = vrot.lane.b32.xlu1 %v1929_v51, %s4641_s6 }
 0x2b6   : > { %1863 = vrot.lane.b32.xlu0 %v1855_v37, %s4640_s27  ;;  %v4061_v60 = vpop.permute.xlu0 %1475  ;;  %v1988_v37 = vmul.f32 %v4063_v1, %v1986_v30 }
 0x2b7   : > { %v1494_v54 = vpop.permute.xlu1 %1493 }
 0x2b8   : > { %v4067_v34 = vadd.f32 %v1494_v54, %v1367_v62  ;;  %v2060_v54 = vstv %s2449_s19 }
 0x2b9   : > { %1975 = vrot.lane.b32.xlu1 %v1968_v2, %s4641_s6  ;;  %v2061_v2 = vmul.f32 %v4075_v3, %v2060_v54 }
 0x2ba   : > { %1935 = vrot.lane.b32.xlu0 %v1928_v18, %s4641_s6  ;;  %v1492_v12 = vpop.permute.xlu0 %1491  ;;  %v1987_v18 = vmul.f32 %v4075_v3, %v1986_v30 }
 0x2bb   : > { %v1512_v5 = vpop.permute.xlu1 %1511  ;;  %v4081_v17 = vadd.f32 %v1492_v12, %v1366_v23  ;;  %v4125_v23 = vld [vmem:[#allocation5 + $0x10] sm:$0xff] }
 0x2bc   : > { %v4079_v40 = vadd.f32 %v1512_v5, %v1386_v43  ;;  %v2063_v5 = vmul.f32 %v4125_v23, %v2060_v54  ;;  %v1989_v12 = vmul.f32 %v4125_v23, %v1986_v30 }
 0x2bd   : > { %1819 = vrot.lane.b32.xlu1 %v1813_v36, %s4640_s27 }
 0x2be   : > { %1973 = vrot.lane.b32.xlu0 %v1967_v29, %s4641_s6  ;;  %v1496_v8 = vpop.permute.xlu0 %1495 }
 0x2bf   : > { %v1516_v55 = vpop.permute.xlu1 %1515  ;;  %v4093_v27 = vadd.f32 %v1496_v8, %v1368_v0  ;;  %v2102_v0 = vmul.f32 %v4063_v1, %v2100_v48 }
 0x2c0   : > { %v4091_v26 = vadd.f32 %v1516_v55, %v1388_v20  ;;  %v2062_v55 = vmul.f32 %v4063_v1, %v2060_v54 }
 0x2c1   : > { %1823 = vrot.lane.b32.xlu1 %v1815_v16, %s4640_s27 }
 0x2c2   : > { %1977 = vrot.lane.b32.xlu0 %v1969_v52, %s4641_s6  ;;  %v1514_v51 = vpop.permute.xlu0 %1513  ;;  %v1886_v52 = vstv %s2440_s25 }
 0x2c3   : > { %v1534_v42 = vpop.permute.xlu1 %1533  ;;  %v4105_v7 = vadd.f32 %v1514_v51, %v1387_v4  ;;  %v2101_v4 = vmul.f32 %v4075_v3, %v2100_v48  ;;  %v1889_v51 = vmul.f32 %v4125_v23, %v1886_v52 }
 0x2c4   : > { %v4103_v62 = vadd.f32 %v1534_v42, %v1407_v11  ;;  %v1887_v11 = vmul.f32 %v4075_v3, %v1886_v52 }
 0x2c5   : > { %1995 = vrot.lane.b32.xlu1 %v1988_v37, %s4641_s6  ;;  %v2103_v37 = vmul.f32 %v4125_v23, %v2100_v48 }
 0x2c6   : > { %1821 = vrot.lane.b32.xlu0 %v1814_v25, %s4640_s27  ;;  %v1532_v53 = vpop.permute.xlu0 %1531  ;;  %v1348_v25 = vadd.f32 %v3967_v47, %v3764_v9  ;;  %v1888_v9 = vmul.f32 %v4063_v1, %v1886_v52  ;;  %v1347_v47 = vadd.f32 %v3981_v39, %v3785_v24  ;;  %s187_s27 = scalar_lea.vmem [#allocation11], %s2355_s26 }
 0x2c7   : > { %v1552_v61 = vpop.permute.xlu1 %1551  ;;  %v4117_v43 = vadd.f32 %v1532_v53, %v1406_v44  ;;  %s2248_s30 = sshll.u32 %s187_s27, 4  ;;  %s4355_s30 = int_to_ptr.vmem [resolvable:$true] %s2248_s30 }
 0x2c8   : > { %v4115_v31 = vadd.f32 %v1552_v61, %v1426_v41  ;;  %v1482_v35 = vadd.f32 %v4051_v45, %v1348_v25  ;;  %v1908_v61 = vmul.f32 %v4063_v1, %v1906_v57  ;;  %v1481_v13 = vadd.f32 %v4061_v60, %v1347_v47  ;;  %s2612_s4 = scalar_lea.vmem %s4355_s30, 256 }
 0x2c9   : > { %2067 = vrot.lane.b32.xlu1 %v2061_v2, %s4642_s23  ;;  %v2080_v25 = vstv %s2450_s11  ;;  %p2613_p4 = scmp.ne.s32.totalorder %s4355_s30, %s2612_s4 }
 0x2ca   : > { %1993 = vrot.lane.b32.xlu0 %v1987_v18, %s4641_s6  ;;  %v1946_v18 = vstv %s2443_s8 }
 0x2cb   : > { %v1556_v6 = vpop.permute.xlu1 %1555  ;;  %v1536_v59 = vpop.permute.xlu0 %1535  ;;  %v1949_v60 = vmul.f32 %v4125_v23, %v1946_v18  ;;  %p2614_p2 = pnand %p2613_p4, %p4643_p8 }
 0x2cc   : > { %v4129_v36 = vadd.f32 %v1556_v6, %v1428_v19  ;;  %v4131_v29 = vadd.f32 %v1536_v59, %v1408_v56  ;;  %v1947_v19 = vmul.f32 %v4075_v3, %v1946_v18  ;;  %v1907_v56 = vmul.f32 %v4075_v3, %v1906_v57 }
 0x2cd   : > { %2071 = vrot.lane.b32.xlu1 %v2063_v5, %s4642_s23  ;;  %v1909_v5 = vmul.f32 %v4125_v23, %v1906_v57  ;;  %p2615_p12 = pneg %p2614_p2 }
 0x2ce   : > { %1997 = vrot.lane.b32.xlu0 %v1989_v12, %s4641_s6 }
 0x2cf   : > { %v1574_v63 = vpop.permute.xlu1 %1573 }
 0x2d0   : > { %v1554_v20 = vpop.permute.xlu0 %1553  ;;  %v4141_v8 = vadd.f32 %v1574_v63, %v1447_v28 }
 0x2d1   : > { %v4143_v16 = vadd.f32 %v1554_v20, %v1427_v21  ;;  %2109 = vrot.lane.b32.xlu1 %v2102_v0, %s4642_s23  ;;  %v1948_v20 = vmul.f32 %v4063_v1, %v1946_v18 }
 0x2d2   : > { %2069 = vrot.lane.b32.xlu0 %v2062_v55, %s4642_s23  ;;  %v2020_v55 = vstv %s2447_s1 }
 0x2d3   : > { %v1592_v15 = vpop.permute.xlu1 %1591 }
 0x2d4   : > { %v1572_v46 = vpop.permute.xlu0 %1571  ;;  %v4153_v30 = vadd.f32 %v1592_v15, %v1466_v10  ;;  %v2021_v10 = vmul.f32 %v4075_v3, %v2020_v55 }
 0x2d5   : > { %v4155_v42 = vadd.f32 %v1572_v46, %v1446_v22  ;;  %1893 = vrot.lane.b32.xlu1 %v1887_v11, %s4641_s6  ;;  %v2023_v11 = vmul.f32 %v4125_v23, %v2020_v55 }
 0x2d6   : > { %2107 = vrot.lane.b32.xlu0 %v2101_v4, %s4642_s23 }
 0x2d7   : > { %v1596_v38 = vpop.permute.xlu1 %1595 }
 0x2d8   : > { %v1576_v50 = vpop.permute.xlu0 %1575  ;;  %v4167_v54 = vadd.f32 %v1596_v38, %v1468_v58 }
 0x2d9   : > { %v4169_v41 = vadd.f32 %v1576_v50, %v1448_v32  ;;  %1897 = vrot.lane.b32.xlu1 %v1889_v51, %s4641_s6  ;;  %v2022_v51 = vmul.f32 %v4063_v1, %v2020_v55 }
 0x2da   : > { %2111 = vrot.lane.b32.xlu0 %v2103_v37, %s4642_s23 }
 0x2db   : > { %v1612_v33 = vpop.permute.xlu1 %1611 }
 0x2dc   : > { %v1594_v44 = vpop.permute.xlu0 %1593  ;;  %v4180_v53 = vadd.f32 %v1612_v33, %v1482_v35 }
 0x2dd   : > { %v4182_v2 = vadd.f32 %v1594_v44, %v1467_v14  ;;  %1915 = vrot.lane.b32.xlu1 %v1908_v61, %s4641_s6  ;;  %v2081_v14 = vmul.f32 %v4075_v3, %v2080_v25  ;;  %v2083_v61 = vmul.f32 %v4125_v23, %v2080_v25 }
 0x2de   : > { %1895 = vrot.lane.b32.xlu0 %v1888_v9, %s4641_s6 }
 0x2df   : > { %v1628_v45 = vpop.permute.xlu1 %1627 }
 0x2e0   : > { %v1610_v49 = vpop.permute.xlu0 %1609  ;;  %v4190_v24 = vadd.f32 %v1628_v45, %v4067_v34  ;;  %v2120_v34 = vstv %s2452_s24 }
 0x2e1   : > { %v4192_v39 = vadd.f32 %v1610_v49, %v1481_v13  ;;  %1953 = vrot.lane.b32.xlu1 %v1947_v19, %s4641_s6  ;;  %v2122_v63 = vmul.f32 %v4063_v1, %v2120_v34  ;;  %v2121_v22 = vmul.f32 %v4075_v3, %v2120_v34  ;;  %v2123_v4 = vmul.f32 %v4125_v23, %v2120_v34 }
 0x2e2   : > { %1913 = vrot.lane.b32.xlu0 %v1907_v56, %s4641_s6  ;;  %v2082_v49 = vmul.f32 %v4063_v1, %v2080_v25 }
 0x2e3   : > { %v1646_v6 = vpop.permute.xlu1 %1645 }
 0x2e4   : > { %v1626_v59 = vpop.permute.xlu0 %1625  ;;  %v4199_v12 = vadd.f32 %v1646_v6, %v4079_v40 }
 0x2e5   : > { %v4202_v28 = vadd.f32 %v1626_v59, %v4081_v17  ;;  %1957 = vrot.lane.b32.xlu1 %v1949_v60, %s4641_s6 }
 0x2e6   : > { %1917 = vrot.lane.b32.xlu0 %v1909_v5, %s4641_s6 }
 0x2e7   : > { %v1650_v21 = vpop.permute.xlu1 %1649 }
 0x2e8   : > { %v1630_v48 = vpop.permute.xlu0 %1629  ;;  %v4209_v0 = vadd.f32 %v1650_v21, %v4091_v26 }
 0x2e9   : > { %v4212_v40 = vadd.f32 %v1630_v48, %v4093_v27  ;;  %2129 = vrot.lane.b32.xlu1 %v2122_v63, %s4642_s23 }
 0x2ea   : > { %1955 = vrot.lane.b32.xlu0 %v1948_v20, %s4641_s6 }
 0x2eb   : > { %v1668_v17 = vpop.permute.xlu1 %1667 }
 0x2ec   : > { %v1648_v52 = vpop.permute.xlu0 %1647  ;;  %v4219_v15 = vadd.f32 %v1668_v17, %v4103_v62 }
 0x2ed   : > { %v4222_v26 = vadd.f32 %v1648_v52, %v4105_v7  ;;  %2027 = vrot.lane.b32.xlu1 %v2021_v10, %s4642_s23  ;;  %v2040_v7 = vstv %s2448_s0 }
 0x2ee   : > { %2127 = vrot.lane.b32.xlu0 %v2121_v22, %s4642_s23  ;;  %v2042_v50 = vmul.f32 %v4063_v1, %v2040_v7  ;;  %v2041_v57 = vmul.f32 %v4075_v3, %v2040_v7  ;;  %v2043_v9 = vmul.f32 %v4125_v23, %v2040_v7  ;;  %v2006_v23 = vstv %s2446_s22 }
 0x2ef   : > { %v1686_v27 = vpop.permute.xlu1 %1685  ;;  %v2008_v6 = vmul.f32 %v4063_v1, %v2006_v23  ;;  %v2007_v34 = vmul.f32 %v4075_v3, %v2006_v23 }
 0x2f0   : > { %v1666_v46 = vpop.permute.xlu0 %1665  ;;  %v4229_v58 = vadd.f32 %v1686_v27, %v4115_v31 }
 0x2f1   : > { %v4232_v62 = vadd.f32 %v1666_v46, %v4117_v43  ;;  %2031 = vrot.lane.b32.xlu1 %v2023_v11, %s4642_s23 }
 0x2f2   : > { %2131 = vrot.lane.b32.xlu0 %v2123_v4, %s4642_s23 }
 0x2f3   : > { %v1690_v32 = vpop.permute.xlu1 %1689 }
 0x2f4   : > { %v1670_v38 = vpop.permute.xlu0 %1669  ;;  %v4239_v37 = vadd.f32 %v1690_v32, %v4129_v36 }
 0x2f5   : > { %v4242_v31 = vadd.f32 %v1670_v38, %v4131_v29  ;;  %2049 = vrot.lane.b32.xlu1 %v2042_v50, %s4642_s23 }
 0x2f6   : > { %2029 = vrot.lane.b32.xlu0 %v2022_v51, %s4642_s23 }
 0x2f7   : > { %v1708_v43 = vpop.permute.xlu1 %1707 }
 0x2f8   : > { %v1688_v35 = vpop.permute.xlu0 %1687  ;;  %v1715_v36 = vadd.f32 %v1708_v43, %v4141_v8  ;;  %v1872_v8 = vstv %s4246_s13 }
 0x2f9   : > { %v4252_v33 = vadd.f32 %v1688_v35, %v4143_v16  ;;  %2087 = vrot.lane.b32.xlu1 %v2081_v14, %s4642_s23  ;;  %v1874_v45 = vmul.f32 %v4063_v1, %v1872_v8  ;;  %v1873_v59 = vmul.f32 %v4075_v3, %v1872_v8 }
 0x2fa   : > { %2047 = vrot.lane.b32.xlu0 %v2041_v57, %s4642_s23 }
 0x2fb   : > { %v1726_v29 = vpop.permute.xlu1 %1725 }
 0x2fc   : > { %v1706_v44 = vpop.permute.xlu0 %1705  ;;  %v1734_v47 = vadd.f32 %v1726_v29, %v4153_v30 }
 0x2fd   : > { %v1714_v18 = vadd.f32 %v1706_v44, %v4155_v42  ;;  %2091 = vrot.lane.b32.xlu1 %v2083_v61, %s4642_s23 }
 0x2fe   : > { %2051 = vrot.lane.b32.xlu0 %v2043_v9, %s4642_s23 }
 0x2ff   : > { %v1730_v16 = vpop.permute.xlu1 %1729 }
 0x300   : > { %v1710_v13 = vpop.permute.xlu0 %1709  ;;  %v1736_v19 = vadd.f32 %v1730_v16, %v4167_v54 }
 0x301   : > { %v1716_v56 = vadd.f32 %v1710_v13, %v4169_v41  ;;  %1879 = vrot.lane.b32.xlu1 %v1874_v45, %s4641_s6 }
 0x302   : > { %2089 = vrot.lane.b32.xlu0 %v2082_v49, %s4642_s23 }
 0x303   : > { %v1746_v30 = vpop.permute.xlu1 %1745 }
 0x304   : > { %v1728_v42 = vpop.permute.xlu0 %1727  ;;  %v4272_v60 = vadd.f32 %v1746_v30, %v4180_v53 }
 0x305   : > { %v1735_v5 = vadd.f32 %v1728_v42, %v4182_v2  ;;  %2013 = vrot.lane.b32.xlu1 %v2008_v6, %s4642_s23 }
 0x306   : > { %1877 = vrot.lane.b32.xlu0 %v1873_v59, %s4641_s6  ;;  %s2616_s6 = sshll.u32 %s2719_s12, 4  ;;  %s2617_s6 = int_to_ptr.vmem [resolvable:$false] %s2616_s6 }
 0x307   : > { %v1762_v54 = vpop.permute.xlu1 %1761  ;;  %s2618_s17 = scalar_lea.vmem %s2617_s6, 512  ;;  %p2619_p0 = scmp.lt.s32.totalorder %s4355_s30, %s2617_s6 }
 0x308   : > { %v1744_v41 = vpop.permute.xlu0 %1743  ;;  %v4279_v21 = vadd.f32 %v1762_v54, %v4190_v24  ;;  %p2620_p3 = scmp.lt.s32.totalorder %s2618_s17, %s2612_s4 }
 0x309   : > { %v4282_v1 = vadd.f32 %v1744_v41, %v4192_v39 }
 0x30a   : > { %2011 = vrot.lane.b32.xlu0 %v2007_v34, %s4642_s23  ;;  %p2621_p5 = por %p2620_p3, %p2619_p0 }
 0x30b   : > { %v1780_v53 = vpop.permute.xlu1 %1779 }
 0x30c   : > { %v1760_v48 = vpop.permute.xlu0 %1759  ;;  %v4286_v2 = vadd.f32 %v1780_v53, %v4199_v12  ;;  %p2622_p11 = pnand %p2621_p5, %p2615_p12 }
 0x30d   : > { %v4289_v63 = vadd.f32 %v1760_v48, %v4202_v28 }
 0x30f   : > { %v1784_v20 = vpop.permute.xlu1 %1783 }
 0x310   : > { %v1764_v55 = vpop.permute.xlu0 %1763  ;;  %v4292_v3 = vadd.f32 %v1784_v20, %v4209_v0 }
 0x311   : > { %v4295_v24 = vadd.f32 %v1764_v55, %v4212_v40 }
 0x313   : > { %v1802_v39 = vpop.permute.xlu1 %1801 }
 0x314   : > { %v1782_v17 = vpop.permute.xlu0 %1781  ;;  %v1809_v52 = vadd.f32 %v1802_v39, %v4219_v15 }
 0x315   : > { %v4299_v10 = vadd.f32 %v1782_v17, %v4222_v26 }
 0x317   : > { %v1840_v12 = vpop.permute.xlu1 %1839 }
 0x318   : > { %v1800_v22 = vpop.permute.xlu0 %1799  ;;  %v1848_v27 = vadd.f32 %v1840_v12, %v1714_v18 }
 0x319   : > { %v1808_v28 = vadd.f32 %v1800_v22, %v4232_v62 }
 0x31b   : > { %v1844_v46 = vpop.permute.xlu1 %1843 }
 0x31c   : > { %v1804_v11 = vpop.permute.xlu0 %1803  ;;  %v1850_v4 = vadd.f32 %v1844_v46, %v1716_v56 }
 0x31d   : > { %v1810_v0 = vadd.f32 %v1804_v11, %v4242_v31 }
 0x31f   : > { %v1862_v7 = vpop.permute.xlu1 %1861 }
 0x320   : > { %v1842_v40 = vpop.permute.xlu0 %1841  ;;  %v1869_v32 = vadd.f32 %v1862_v7, %v1735_v5 }
 0x321   : > { %v1849_v38 = vadd.f32 %v1842_v40, %v1715_v36 }
 0x323   : > { %v1934_v50 = vpop.permute.xlu1 %1933 }
 0x324   : > { %v1860_v51 = vpop.permute.xlu0 %1859  ;;  %v1942_v15 = vadd.f32 %v1934_v50, %v1808_v28 }
 0x325   : > { %v1868_v25 = vadd.f32 %v1860_v51, %v1734_v47 }
 0x327   : > { %v1938_v26 = vpop.permute.xlu1 %1937 }
 0x328   : > { %v1864_v43 = vpop.permute.xlu0 %1863  ;;  %v1944_v35 = vadd.f32 %v1938_v26, %v1810_v0 }
 0x329   : > { %v1870_v14 = vadd.f32 %v1864_v43, %v1736_v19 }
 0x32b   : > { %v1976_v57 = vpop.permute.xlu1 %1975 }
 0x32c   : > { %v1936_v29 = vpop.permute.xlu0 %1935  ;;  %v1983_v62 = vadd.f32 %v1976_v57, %v1849_v38 }
 0x32d   : > { %v1943_v44 = vadd.f32 %v1936_v29, %v1809_v52 }
 0x32f   : > { %v1820_v61 = vpop.permute.xlu1 %1819 }
 0x330   : > { %v1974_v9 = vpop.permute.xlu0 %1973  ;;  %v4304_v31 = vadd.f32 %v1820_v61, %v4229_v58 }
 0x331   : > { %v1982_v18 = vadd.f32 %v1974_v9, %v1848_v27 }
 0x333   : > { %v4306_v8 = vpop.permute.xlu1 %1823 }
 0x334   : > { %v1978_v36 = vpop.permute.xlu0 %1977 }
 0x335   : > { %v1984_v55 = vadd.f32 %v1978_v36, %v1850_v4 }
 0x337   : > { %v1996_v16 = vpop.permute.xlu1 %1995 }
 0x338   : > { %v4308_v13 = vpop.permute.xlu0 %1821 }
 0x33b   : > { %v2068_v47 = vpop.permute.xlu1 %2067 }
 0x33c   : > { %v1994_v45 = vpop.permute.xlu0 %1993  ;;  %v2076_v56 = vadd.f32 %v2068_v47, %v1942_v15  ;;  %v2003_v15 = vadd.f32 %v1996_v16, %v1869_v32 }
 0x33d   : > { %v2002_v26 = vadd.f32 %v1994_v45, %v1868_v25 }
 0x33e   : > { %v2155_v58 = vrot.slane %v2076_v56, 1 }
 0x33f   : > { %v2072_v49 = vpop.permute.xlu1 %2071 }
 0x340   : > { %v1998_v19 = vpop.permute.xlu0 %1997  ;;  %v4310_v23 = vadd.f32 %v2072_v49, %v1944_v35 }
 0x342   : > { %v2158_v59 = vrot.slane %v4310_v23, 1 }
 0x343   : > { %v2110_v30 = vpop.permute.xlu1 %2109 }
 0x344   : > { %v2070_v42 = vpop.permute.xlu0 %2069  ;;  %v2117_v5 = vadd.f32 %v2110_v30, %v1983_v62  ;;  %v2004_v62 = vadd.f32 %v1998_v19, %v1870_v14 }
 0x345   : > { %v2077_v6 = vadd.f32 %v2070_v42, %v1943_v44 }
 0x346   : > { %v2170_v39 = vrot.slane %v2117_v5, 1 }
 0x347   : > { %v2156_v54 = vrot.slane %v2077_v6, 1  ;;  %v1894_v41 = vpop.permute.xlu1 %1893 }
 0x348   : > { %v2108_v34 = vpop.permute.xlu0 %2107  ;;  %v1902_v56 = vadd.f32 %v1894_v41, %v4289_v63 }
 0x349   : > { %v2116_v53 = vadd.f32 %v2108_v34, %v1982_v18  ;;  %v2159_v48 = vsel %vm2142_vm3, %v2156_v54, %v2158_v59  ;;  %v2157_v20 = vsel %vm2142_vm3, %v2155_v58, %v2156_v54 }
 0x34b   : > { %v2169_v17 = vrot.slane %v2116_v53, 1  ;;  %v1898_v52 = vpop.permute.xlu1 %1897 }
 0x34c   : > { %v2112_v12 = vpop.permute.xlu0 %2111  ;;  %v1904_v36 = vadd.f32 %v1898_v52, %v4295_v24 }
 0x34d   : > { %v4317_v22 = vadd.f32 %v2112_v12, %v1984_v55  ;;  %v2171_v27 = vsel %vm2142_vm3, %v2169_v17, %v2170_v39 }
 0x34f   : > { %v2172_v28 = vrot.slane %v4317_v22, 1  ;;  %v1916_v46 = vpop.permute.xlu1 %1915 }
 0x350   : > { %v1896_v11 = vpop.permute.xlu0 %1895  ;;  %v1923_v32 = vadd.f32 %v1916_v46, %v4299_v10 }
 0x351   : > { %v4322_v0 = vsel %vm2142_vm3, %v2170_v39, %v2172_v28  ;;  %v1903_v25 = vadd.f32 %v1896_v11, %v4279_v21  ;;  %v1830_v21 = vadd.f32 %v4306_v8, %v4239_v37 }
 0x353   : > { %v1954_v7 = vpop.permute.xlu1 %1953 }
 0x354   : > { %v1914_v40 = vpop.permute.xlu0 %1913  ;;  %v1962_v24 = vadd.f32 %v1954_v7, %v4304_v31 }
 0x355   : > { %v1922_v5 = vadd.f32 %v1914_v40, %v4286_v2 }
 0x357   : > { %v1958_v38 = vpop.permute.xlu1 %1957 }
 0x358   : > { %v1918_v50 = vpop.permute.xlu0 %1917  ;;  %v1964_v12 = vadd.f32 %v1958_v38, %v1830_v21 }
 0x359   : > { %v1924_v31 = vadd.f32 %v1918_v50, %v4292_v3 }
 0x35b   : > { %v2130_v4 = vpop.permute.xlu1 %2129 }
 0x35c   : > { %v1956_v51 = vpop.permute.xlu0 %1955  ;;  %v2137_v43 = vadd.f32 %v2130_v4, %v2003_v15 }
 0x35e   : > { %v2197_v44 = vrot.slane %v2137_v43, 2 }
 0x35f   : > { %v2028_v35 = vpop.permute.xlu1 %2027 }
 0x360   : > { %v2128_v57 = vpop.permute.xlu0 %2127  ;;  %v2036_v30 = vadd.f32 %v2028_v35, %v1902_v56 }
 0x361   : > { %v2136_v29 = vadd.f32 %v2128_v57, %v2002_v26 }
 0x362   : > { %v2143_v41 = vrot.slane %v2036_v30, 1 }
 0x363   : > { %v2196_v61 = vrot.slane %v2136_v29, 2  ;;  %v2032_v9 = vpop.permute.xlu1 %2031 }
 0x364   : > { %v2132_v18 = vpop.permute.xlu0 %2131  ;;  %v2038_v16 = vadd.f32 %v2032_v9, %v1904_v36 }
 0x365   : > { %v2138_v47 = vadd.f32 %v2132_v18, %v2004_v62  ;;  %v2198_v49 = vsel %vm2183_vm4, %v2196_v61, %v2197_v44 }
 0x366   : > { %v2146_v54 = vrot.slane %v2038_v16, 1 }
 0x367   : > { %v2199_v45 = vrot.slane %v2138_v47, 2  ;;  %v2050_v42 = vpop.permute.xlu1 %2049 }
 0x368   : > { %v2030_v14 = vpop.permute.xlu0 %2029  ;;  %v2057_v19 = vadd.f32 %v2050_v42, %v1923_v32 }
 0x369   : > { %v2037_v6 = vadd.f32 %v2030_v14, %v1903_v25  ;;  %v2200_v58 = vsel %vm2183_vm4, %v2197_v44, %v2199_v45 }
 0x36a   : > { %v2164_v34 = vadd.f32 %v2159_v48, %v2057_v19  ;;  %v1829_v48 = vadd.f32 %v4308_v13, %v4252_v33 }
 0x36b   : > { %v2144_v63 = vrot.slane %v2037_v6, 1  ;;  %v2088_v10 = vpop.permute.xlu1 %2087 }
 0x36c   : > { %v2048_v53 = vpop.permute.xlu0 %2047  ;;  %v2096_v55 = vadd.f32 %v2088_v10, %v1962_v24  ;;  %v2185_v46 = vrot.slane %v2164_v34, 2  ;;  %v1963_v15 = vadd.f32 %v1956_v51, %v1829_v48 }
 0x36d   : > { %v2056_v39 = vadd.f32 %v2048_v53, %v1922_v5  ;;  %v2147_v17 = vsel %vm2142_vm3, %v2144_v63, %v2146_v54  ;;  %v2145_v52 = vsel %vm2142_vm3, %v2143_v41, %v2144_v63 }
 0x36e   : > { %v2177_v22 = vadd.f32 %v2171_v27, %v2096_v55 }
 0x36f   : > { %v2163_v2 = vadd.f32 %v2157_v20, %v2056_v39  ;;  %v2092_v11 = vpop.permute.xlu1 %2091 }
 0x370   : > { %v2052_v7 = vpop.permute.xlu0 %2051  ;;  %v2204_v40 = vadd.f32 %v2198_v49, %v2177_v22  ;;  %v2098_v37 = vadd.f32 %v2092_v11, %v1964_v12 }
 0x371   : > { %v2184_v4 = vrot.slane %v2163_v2, 2  ;;  %v2058_v8 = vadd.f32 %v2052_v7, %v1924_v31 }
 0x372   : > { %v2179_v26 = vadd.f32 %v2172_v28, %v2098_v37  ;;  %v2210_v44 = vrot.slane %v2204_v40, 4 }
 0x373   : > { %v2165_v43 = vadd.f32 %v2158_v59, %v2058_v8  ;;  %v2186_v38 = vsel %vm2183_vm4, %v2184_v4, %v2185_v46  ;;  %v1880_v3 = vpop.permute.xlu1 %1879 }
 0x374   : > { %v2090_v27 = vpop.permute.xlu0 %2089  ;;  %v2206_v20 = vadd.f32 %v2199_v45, %v2179_v26  ;;  %v1884_v33 = vadd.f32 %v1880_v3, %v4272_v60 }
 0x375   : > { %v2187_v50 = vrot.slane %v2165_v43, 2  ;;  %v2097_v35 = vadd.f32 %v2090_v27, %v1963_v15 }
 0x376   : > { %v2213_v23 = vrot.slane %v2206_v20, 4 }
 0x377   : > { %v2178_v13 = vadd.f32 %v4322_v0, %v2097_v35  ;;  %v2188_v57 = vsel %vm2183_vm4, %v2185_v46, %v2187_v50  ;;  %v2014_v29 = vpop.permute.xlu1 %2013 }
 0x378   : > { %v1878_v62 = vpop.permute.xlu0 %1877  ;;  %v2018_v28 = vadd.f32 %v2014_v29, %v1884_v33 }
 0x379   : > { %v2205_v51 = vadd.f32 %v2200_v58, %v2178_v13  ;;  %v1883_v9 = vadd.f32 %v1878_v62, %v4282_v1 }
 0x37a   : > { %v2151_v61 = vadd.f32 %v2147_v17, %v2018_v28 }
 0x37b   : > { %v2211_v59 = vrot.slane %v2205_v51, 4 }
 0x37c   : > { %v2012_v18 = vpop.permute.xlu0 %2011  ;;  %v2192_v36 = vadd.f32 %v2188_v57, %v2151_v61 }
 0x37d   : > { %v2214_v47 = vsel %vm203_vm0, %v2211_v59, %v2213_v23  ;;  %v2212_v60 = vsel %vm203_vm0, %v2210_v44, %v2211_v59  ;;  %v2017_v0 = vadd.f32 %v2012_v18, %v1883_v9 }
 0x37e   : > { %v2218_v49 = vadd.f32 %v2214_v47, %v2192_v36 }
 0x37f   : > { %v2150_v56 = vadd.f32 %v2145_v52, %v2017_v0 }
 0x380   : > { %v2454_v32 = vmul.f32 -1.442695, %v2218_v49 }
 0x381   : > { %v2191_v25 = vadd.f32 %v2186_v38, %v2150_v56 }
 0x382   : > { %2555 = vpow2.f32 %v2454_v32 }
 0x383   : > { %v2217_v16 = vadd.f32 %v2212_v60, %v2191_v25 }
 0x385   : > { %v2453_v45 = vmul.f32 -1.442695, %v2217_v16 }
 0x387   : > { %2557 = vpow2.f32 %v2453_v45 }
 0x38c   : > { %v2556_v30 = vpop.eup %2555 }
 0x38d   : > { %v2226_v42 = vadd.f32 1.0, %v2556_v30 }
 0x38f   : > { %2559 = vrcp.f32 %v2226_v42 }
 0x391   : > { %v2558_v1 = vpop.eup %2557 }
 0x392   : > { %v2225_v14 = vadd.f32 1.0, %v2558_v1 }
 0x394   : > { %2561 = vrcp.f32 %v2225_v14 }
 0x399   : > { %v2560_v19 = vpop.eup %2559 }
 0x39a   : > { %2233 = vst.msk [vmem:[%s187_s27 + $0x8] sm:$0xff] %vm2231_vm5, %v2560_v19 }
 0x39e   : > { %v2562_v6 = vpop.eup %2561 }
 0x39f   : > { %2232 = vst.msk [vmem:[%s187_s27] sm:$0xff] %vm2231_vm5, %v2562_v6 }
 0x3a0   : > { %2625 = shalt.err (!%p2622_p11)
}
 0x3a1   : > { %s2626_s19 = scalar_lea.hbm %s4353_s28, 256  ;;  %s2630_s23 = scalar_lea.hbm %s4406_s2, 512 }
 0x3a2   : > { %p2627_p13 = scmp.ne.s32.totalorder %s4353_s28, %s2626_s19  ;;  %p2631_p6 = scmp.lt.u32.totalorder %s4353_s28, %s4406_s2 }
 0x3a3   : > { %p2632_p9 = scmp.lt.u32.totalorder %s2630_s23, %s2626_s19  ;;  %p2634_p4 = scmp.lt.u32.totalorder %s2626_s19, %s4353_s28 }
 0x3a4   : > { %p2628_p7 = pnand %p2627_p13, %p4643_p8 }
 0x3a5   : > { %p2633_p1 = por %p2632_p9, %p2631_p6 }
 0x3a6   : > { %p2629_p10 = pneg %p2628_p7 }
 0x3a7   : > { %p2635_p2 = por %p2634_p4, %p2633_p1 }
 0x3a9   : > { %p2636_p12 = pnand %p2635_p2, %p2629_p10 }
 0x3ab   : > { %2639 = shalt.err (!%p2636_p12)
}
 0x3ac   : > { %s2720_s24 = smov 128   ;;  %s2721_s1 = smov 8  }
 0x3ad   : > { %2468 = dma.vmem_to_hbm [thread:$0]  (%p4643_p8), %s4355_s30, 256, %s4353_s28, %s2235_s5, %s2720_s24, %s2720_s24, %s2721_s1  }
 0x3ae PF: > { %s2263_s0 = sand.u32 1, %s2678_s9   ;;  %p4644_p0 = scmp.ne.s32.totalorder %s4439_s20, 0 }
 0x3af   : > { %p4645_p3 = scmp.ge.s32.totalorder %s2698_s14, 2  ;;  %s2264_s11 = scalar_lea.sflag [#allocation8], %s2263_s0 }
 0x3b1   : > { %p2479_p5 = pnand %p4645_p3, %p4644_p0 }
 0x3b3   : > { %2673 = dma.done.wait (!%p2479_p5), %s2264_s11, 256  }
 0x3b4   : > { %2675 = vsyncadd (!%p2479_p5), %s2264_s11, 4294967040  ;;  %s19_s14 = sadd.s32 1, %s2698_s14   ;;  %s4646_s13 = sld [smem:[#allocation15_spill]] }
 0x3b5   : > { %p16_p11 = scmp.ge.s32.totalorder %s19_s14, 4   ;;  %s4647_s11 = sld [smem:[#allocation18_spill]] }
 0x3b6   : > { %s4648_s12 = sld [smem:[#allocation16_spill]]  ;;  %s4649_s15 = sld [smem:[#allocation17_spill]] }
 0x3b7   : > { %s4650_s9 = smov %s2682_s10  ;;  %18 = sbr.rel (!%p16_p11) target bundleno = 10 (0xa), region = 86 }
 0x3ba   : > { %s4651_s10 = smov %s4646_s13 }
 0x3bc   : > { %s4652_s13 = smov %s4649_s15 }
 0x3be   :  { %2269 = vsyncpa [#allocation7], 1 }
 0x3bf   :  { %2271 = vsyncpa [#allocation7 + $0x1], 1 }
 0x3c0   :  { %2272 = vsyncpa [#allocation8], 1 }
 0x3c1   :  { %2274 = vsyncpa [#allocation8 + $0x1], 1 }
 0x3c2   :  { %2275 = vsyncpa [#allocation9], 1 }
 0x3c3   :  { %2277 = vsyncpa [#allocation9 + $0x1], 1 }

</bundles_post_ra>
